<compile_context>
chip_gen: v7x
topology: tpu7x:2x2x1
jax: 0.10.0
libtpu: 0.0.40
codegen_flags: <defaults>
</compile_context>

<pallas_src>
import math
import jax
import jax.numpy as jnp
from jax import lax
from jax.experimental import pallas as pl
from jax.experimental.pallas import tpu as pltpu


def _round_up(x, m):
    return ((x + m - 1) // m) * m


# ----------------------------- tiled linear (nn.Linear) ----------------------

def _linear_kernel(x_ref, wt_ref, b_ref, o_ref):
    # o = x @ wt + b   x:(tm,K) wt:(K,Np) b:(1,Np) o:(tm,Np); f32 accumulation on MXU.
    o_ref[...] = (jnp.dot(x_ref[...], wt_ref[...],
                          preferred_element_type=jnp.float32)
                  + b_ref[...]).astype(o_ref.dtype)


def pallas_linear_prepped(x, wt, b2, *, tm=512, out_dtype=jnp.bfloat16):
    """y = x @ wt + b2 with pre-transposed / pre-padded / pre-cast weights.

    wt: (K, Np) bf16 (Np lane-dense multiple of 128), b2: (1, Np) f32.
    Rows tiled over a 'parallel' grid; bf16 inputs, f32 accumulation, bf16 output
    (consumers are bf16 matmuls / resize)."""
    M, K = x.shape
    Np = wt.shape[1]
    xc = x.astype(wt.dtype)

    tm_eff = min(tm, M)
    # If the whole problem fits in one block, split it in two so the 'parallel'
    # grid axis actually feeds both TensorCores on v7x (free, small win).
    if pl.cdiv(M, tm_eff) == 1 and M >= 16 and M % 16 == 0:
        tm_eff = M // 2
    grid_m = pl.cdiv(M, tm_eff)

    in_bytes = jnp.dtype(wt.dtype).itemsize
    out_bytes = jnp.dtype(out_dtype).itemsize
    # double-buffered inputs + weights + outputs; explicit limit so larger tiles
    # still compile on v5e (16 MiB default scoped VMEM) and stay inside v7x's 64 MiB.
    working_set = (2 * (tm_eff * K + K * Np) * in_bytes
                   + 2 * tm_eff * Np * out_bytes + (1 << 20))
    vmem_limit = int(min(max(2 * working_set, 32 << 20), 48 << 20))

    cost = pl.CostEstimate(
        flops=2 * M * K * Np,
        transcendentals=0,
        bytes_accessed=M * K * in_bytes + K * Np * in_bytes + Np * 4
        + M * Np * out_bytes)

    return pl.pallas_call(
        _linear_kernel,
        out_shape=jax.ShapeDtypeStruct((M, Np), out_dtype),
        grid=(grid_m,),
        in_specs=[pl.BlockSpec((tm_eff, K), lambda i: (i, 0)),
                  pl.BlockSpec((K, Np), lambda i: (0, 0)),
                  pl.BlockSpec((1, Np), lambda i: (0, 0))],
        out_specs=pl.BlockSpec((tm_eff, Np), lambda i: (i, 0)),
        compiler_params=pltpu.CompilerParams(
            dimension_semantics=("parallel",),
            vmem_limit_bytes=vmem_limit),
        cost_estimate=cost,
    )(xc, wt, b2)


# ------------------- fused class attention + seg-head kernel -----------------

def _att_seg_kernel(cv_ref, enc_ref, wdec_ref, bdec_ref, seg_ref, att_ref):
    # per-batch block:
    #   cv  : (1, 1, D) f32   encoded class vector (class_encoder output)
    #   enc : (1, N, D) bf16  flattened spatial features
    #   wdec: (nc, D) bf16, bdec: (nc, 1) f32   fused 1x1 decoder head
    # outputs (lane-dense, no padding):
    #   seg : (1, nc, N)  head applied to attention-modulated features (transposed)
    #   att : (1, 1, N)   softmax attention over spatial positions
    enc = enc_ref[0]                                   # (N, D) bf16
    cv = cv_ref[0].astype(jnp.bfloat16)                # (1, D)
    inv_sqrt_d = 1.0 / math.sqrt(enc.shape[-1])

    dn = (((1,), (1,)), ((), ()))                      # contract over D (A @ B^T)
    # single 'sdotprod' score vector, reused for both outputs
    s = lax.dot_general(cv, enc, dn,
                        preferred_element_type=jnp.float32) * inv_sqrt_d   # (1, N)
    m = jnp.max(s, axis=-1, keepdims=True)
    e = jnp.exp(s - m)
    att = e / jnp.sum(e, axis=-1, keepdims=True)       # exact softmax (parity w/ torch)
    att_ref[0] = att.astype(att_ref.dtype)

    # decoder head on raw features, transposed -> (nc, N); attention scale applied
    # AFTER the matmul (commutes with it, precedes the bias): nc x N VPU work.
    head_t = lax.dot_general(wdec_ref[...], enc, dn,
                             preferred_element_type=jnp.float32)           # (nc, N)
    seg_ref[0] = (head_t * att + bdec_ref[...]).astype(seg_ref.dtype)


def pallas_att_seg(enc_flat, class_vec, w_dec_r, b_dec_c):
    """Fused 'sdotprod' attention + 1x1 seg head.
    enc_flat: (B, N, D) bf16, class_vec: (B, D) f32,
    w_dec_r: (nc, D) bf16, b_dec_c: (nc, 1) f32
    -> seg_t (B, nc, N), attention (B, 1, N)."""
    B, N, D = enc_flat.shape
    nc = w_dec_r.shape[0]
    cv3 = class_vec.reshape(B, 1, D).astype(jnp.float32)

    # TODO(synk): for very large N on v7x (64 MiB VMEM), add an N-tiling /
    # online-softmax path; at segmentation-head resolutions the whole (N, D)
    # bf16 block comfortably fits.
    seg_t, att = pl.pallas_call(
        _att_seg_kernel,
        out_shape=(jax.ShapeDtypeStruct((B, nc, N), jnp.float32),
                   jax.ShapeDtypeStruct((B, 1, N), jnp.float32)),
        grid=(B,),
        in_specs=[pl.BlockSpec((1, 1, D), lambda b: (b, 0, 0)),
                  pl.BlockSpec((1, N, D), lambda b: (b, 0, 0)),
                  pl.BlockSpec((nc, D), lambda b: (0, 0)),
                  pl.BlockSpec((nc, 1), lambda b: (0, 0))],
        out_specs=(pl.BlockSpec((1, nc, N), lambda b: (b, 0, 0)),
                   pl.BlockSpec((1, 1, N), lambda b: (b, 0, 0))),
        compiler_params=pltpu.CompilerParams(dimension_semantics=("parallel",)),
    )(cv3, enc_flat, w_dec_r, b_dec_c)
    return seg_t, att


# ----------------------- transposed 1x1 head (low-level path) -----------------

def _head_t_kernel(x_ref, w_ref, b_ref, o_ref):
    # x: (1, L, K) bf16; w: (nc, K) bf16; b: (nc, 1) f32; o: (1, nc, L) f32.
    dn = (((1,), (1,)), ((), ()))
    o_ref[0] = (lax.dot_general(w_ref[...], x_ref[0], dn,
                                preferred_element_type=jnp.float32)
                + b_ref[...]).astype(o_ref.dtype)


def pallas_head_t(x, w_r, b_c):
    """1x1 conv head with transposed, lane-dense output: (B, L, K) -> (B, nc, L)."""
    B, L, K = x.shape
    nc = w_r.shape[0]
    return pl.pallas_call(
        _head_t_kernel,
        out_shape=jax.ShapeDtypeStruct((B, nc, L), jnp.float32),
        grid=(B,),
        in_specs=[pl.BlockSpec((1, L, K), lambda b: (b, 0, 0)),
                  pl.BlockSpec((nc, K), lambda b: (0, 0)),
                  pl.BlockSpec((nc, 1), lambda b: (0, 0))],
        out_specs=pl.BlockSpec((1, nc, L), lambda b: (b, 0, 0)),
        compiler_params=pltpu.CompilerParams(dimension_semantics=("parallel",)),
    )(x.astype(w_r.dtype), w_r, b_c)


# --------------------------- frozen-backbone stand-in -------------------------

def _patchify(x_nchw, patch):
    # TODO(synk): stand-in for the frozen pretrained ResNet feature extractor
    # (IntermediateLayerGetter, torch.no_grad); a strided patch-embedding that
    # feeds the tiled Pallas linear; channels-last output (matches the
    # permute(0,2,3,1).view() the PyTorch forward does anyway).
    B, Cin, H, W = x_nchw.shape
    hp, wp = H // patch, W // patch
    p = x_nchw.reshape(B, Cin, hp, patch, wp, patch)
    p = jnp.transpose(p, (0, 2, 4, 1, 3, 5)).reshape(B * hp * wp, Cin * patch * patch)
    return p, (hp, wp)


# ------------------------------ parameters ------------------------------------

def init_params(key, num_classes=4, encoder_dim=512, low_level_dim=64,
                num_out_classes=2, in_ch=3, low_patch=4, enc_patch=32):
    ks = jax.random.split(key, 6)
    s = 0.02
    k_low = in_ch * low_patch * low_patch
    k_enc = in_ch * enc_patch * enc_patch
    low_p = _round_up(max(low_level_dim, 128), 128)
    enc_p = _round_up(max(encoder_dim, 128), 128)

    w_low = s * jax.random.normal(ks[0], (low_level_dim, k_low), jnp.float32)
    b_low = jnp.zeros((low_level_dim,), jnp.float32)
    w_enc = s * jax.random.normal(ks[1], (encoder_dim, k_enc), jnp.float32)
    b_enc = jnp.zeros((encoder_dim,), jnp.float32)
    # class_encoder = nn.Linear(num_classes, 512)
    w_ce = s * jax.random.normal(ks[2], (encoder_dim, num_classes), jnp.float32)
    b_ce = s * jax.random.normal(ks[3], (encoder_dim,), jnp.float32)
    # decoder stand-in: 1x1 conv heads (512 -> 2, 64 -> 2)
    w_dec = s * jax.random.normal(ks[4], (num_out_classes, encoder_dim), jnp.float32)
    b_dec = jnp.zeros((num_out_classes,), jnp.float32)
    w_dec_low = s * jax.random.normal(ks[5], (num_out_classes, low_level_dim), jnp.float32)
    b_dec_low = jnp.zeros((num_out_classes,), jnp.float32)

    # Kernel-ready parameters: transpose / pad-to-128-lanes / bf16 cast done ONCE here
    # instead of every forward.
    return {
        # patch-embedding backbone stand-in (outputs lane-dense padded features)
        "w_low_t": jnp.pad(w_low.T, ((0, 0), (0, low_p - low_level_dim))).astype(jnp.bfloat16),
        "b_low_p": jnp.pad(b_low, (0, low_p - low_level_dim)).reshape(1, low_p).astype(jnp.float32),
        "w_enc_t": jnp.pad(w_enc.T, ((0, 0), (0, enc_p - encoder_dim))).astype(jnp.bfloat16),
        "b_enc_p": jnp.pad(b_enc, (0, enc_p - encoder_dim)).reshape(1, enc_p).astype(jnp.float32),
        # class_encoder (tiny -> plain XLA dot in the wrapper)
        "w_ce": w_ce,
        "b_ce": b_ce,
        # high-level 1x1 decoder head, row-major (nc, D) for transposed lane-dense output
        "w_dec_r": w_dec.astype(jnp.bfloat16),
        "b_dec_c": b_dec.reshape(num_out_classes, 1).astype(jnp.float32),
        # low-level 1x1 head; K padded to match the padded low-level features
        "w_dec_low_r": jnp.pad(w_dec_low, ((0, 0), (0, low_p - low_level_dim))).astype(jnp.bfloat16),
        "b_dec_low_c": b_dec_low.reshape(num_out_classes, 1).astype(jnp.float32),
    }


# ------------------------------- forward ---------------------------------------

def att_segmentator_forward(params, x, v_class, out_att=False,
                            low_patch=4, enc_patch=32):
    B, _, H, W = x.shape
    nc = params["w_dec_r"].shape[0]

    # frozen backbone features (channels-last), bf16 outputs straight from the MXU
    low_in, (lh, lw) = _patchify(x, low_patch)
    enc_in, (h, w) = _patchify(x, enc_patch)
    low_feat = pallas_linear_prepped(low_in, params["w_low_t"], params["b_low_p"])   # (B*lh*lw, 128) bf16
    enc_feat = pallas_linear_prepped(enc_in, params["w_enc_t"], params["b_enc_p"])   # (B*h*w, 512) bf16

    # enc_feat.permute(0,2,3,1).contiguous().view(B, -1, 512): channels-last
    # patchify already produces that layout, so this is a pure reshape.
    enc_flat = enc_feat.reshape(B, h * w, -1)

    # class_vec = class_encoder(v_class): (B,4)x(4,512) is pure launch overhead as a
    # pallas_call, so it stays a plain XLA dot.
    class_vec = v_class @ params["w_ce"].T + params["b_ce"]                           # (B, 512) f32

    # x_enc, attention = attention_enc(enc_feat, class_vec), fused with the seg-head
    # 1x1 projection; seg comes back as (B, nc, N) (nc sublane, N lane-dense).
    seg_hi_t, att_row = pallas_att_seg(enc_flat, class_vec,
                                       params["w_dec_r"], params["b_dec_c"])
    seg_hi = seg_hi_t.reshape(B, nc, h, w)                                            # NCHW, no transpose
    attention = jnp.transpose(att_row, (0, 2, 1))                                     # (B, N, 1)

    # TODO(synk): original Decoder is DeepLabv3+ (ASPP rates [1,6,12,18], low-level
    # fusion, stacked 3x3 convs). Stand-in: the fused 1x1 head above + a transposed
    # 1x1 head on the low-level features + bilinear upsample.
    seg_lo_t = pallas_head_t(low_feat.reshape(B, lh * lw, -1),
                             params["w_dec_low_r"], params["b_dec_low_c"])            # (B, nc, lh*lw)
    seg_lo = seg_lo_t.reshape(B, nc, lh, lw)

    seg = (jax.image.resize(seg_hi, (B, nc, H, W), method="bilinear")
           + jax.image.resize(seg_lo, (B, nc, H, W), method="bilinear"))

    if out_att:
        return seg, attention
    return seg


# --------------------------------- main -----------------------------------------

if __name__ == "__main__":
    key = jax.random.PRNGKey(0)
    k_x, k_c, k_p = jax.random.split(key, 3)

    B, H, W = 2, 64, 64
    num_classes = 4
    x = jax.random.normal(k_x, (B, 3, H, W), jnp.float32)          # NCHW like PyTorch
    cls_idx = jax.random.randint(k_c, (B,), 0, num_classes)
    v_class = jax.nn.one_hot(cls_idx, num_classes, dtype=jnp.float32)

    params = init_params(k_p, num_classes=num_classes)

    fwd = jax.jit(lambda p, xx, vv: att_segmentator_forward(p, xx, vv, out_att=True))
    seg, att = fwd(params, x, v_class)
    jax.block_until_ready((seg, att))

    assert seg.shape == (B, 2, H, W)
    assert att.shape == (B, (H // 32) * (W // 32), 1)
    assert bool(jnp.all(jnp.isfinite(seg))) and bool(jnp.all(jnp.isfinite(att)))
    print("KERNEL_OK")
</pallas_src>

<mosaic_0001>
module attributes {stable_mosaic.version = 11 : i64} {
  func.func @_linear_kernel(%arg0: i32, %arg1: memref<8x3072xbf16, #tpu.memory_space<vmem>>, %arg2: memref<3072x512xbf16, #tpu.memory_space<vmem>>, %arg3: memref<1x512xf32, #tpu.memory_space<vmem>>, %arg4: memref<8x512xbf16, #tpu.memory_space<vmem>>) attributes {dimension_semantics = [#tpu.dimension_semantics<parallel>], iteration_bounds = array<i64: 1>, scalar_prefetch = 0 : i64, scratch_operands = 0 : i64, tpu.core_type = #tpu.core_type<tc>, window_params = [{transform_indices = @transform_0, window_bounds = array<i64: 8, 3072>}, {pipeline_mode = #tpu.pipeline_mode<synchronous>, transform_indices = @transform_1, window_bounds = array<i64: 3072, 512>}, {pipeline_mode = #tpu.pipeline_mode<synchronous>, transform_indices = @transform_2, window_bounds = array<i64: 1, 512>}, {transform_indices = @transform_3, window_bounds = array<i64: 8, 512>}]} {
    %c0 = arith.constant 0 : index
    %c0_0 = arith.constant 0 : index
    %0 = vector.load %arg1[%c0, %c0_0] : memref<8x3072xbf16, #tpu.memory_space<vmem>>, vector<8x3072xbf16>
    %c0_1 = arith.constant 0 : index
    %c0_2 = arith.constant 0 : index
    %1 = vector.load %arg2[%c0_1, %c0_2] : memref<3072x512xbf16, #tpu.memory_space<vmem>>, vector<3072x512xbf16>
    %cst = arith.constant dense<0.000000e+00> : vector<8x512xf32>
    %2 = tpu.matmul %0, %1, %cst {dimension_numbers = #tpu.dot_dimension_numbers<[1], [0], [0], [1], [0, 0, 1, 1], [], []>} : vector<8x3072xbf16>, vector<3072x512xbf16>, vector<8x512xf32> -> vector<8x512xf32>
    %c0_3 = arith.constant 0 : index
    %c0_4 = arith.constant 0 : index
    %3 = vector.load %arg3[%c0_3, %c0_4] : memref<1x512xf32, #tpu.memory_space<vmem>>, vector<1x512xf32>
    %4 = vector.broadcast %3 : vector<1x512xf32> to vector<8x512xf32>
    %5 = arith.addf %2, %4 : vector<8x512xf32>
    %6 = arith.truncf %5 : vector<8x512xf32> to vector<8x512xbf16>
    %c0_5 = arith.constant 0 : index
    %c0_6 = arith.constant 0 : index
    %7 = vector.load %arg4[%c0_5, %c0_6] : memref<8x512xbf16, #tpu.memory_space<vmem>>, vector<8x512xbf16>
    tpu.vector_store %arg4[%c0_5, %c0_6], %6 {strides = array<i32>} : memref<8x512xbf16, #tpu.memory_space<vmem>>, vector<8x512xbf16>,
    return
  }
  func.func @transform_0(%arg0: i32) -> (i32, i32) {
    %c0_i32 = arith.constant 0 : i32
    %c0_i32_0 = arith.constant 0 : i32
    return %arg0, %c0_i32 : i32, i32
  }
  func.func @transform_1(%arg0: i32) -> (i32, i32) {
    %c0_i32 = arith.constant 0 : i32
    %c0_i32_0 = arith.constant 0 : i32
    %c0_i32_1 = arith.constant 0 : i32
    return %c0_i32, %c0_i32_0 : i32, i32
  }
  func.func @transform_2(%arg0: i32) -> (i32, i32) {
    %c0_i32 = arith.constant 0 : i32
    %c0_i32_0 = arith.constant 0 : i32
    %c0_i32_1 = arith.constant 0 : i32
    return %c0_i32, %c0_i32_0 : i32, i32
  }
  func.func @transform_3(%arg0: i32) -> (i32, i32) {
    %c0_i32 = arith.constant 0 : i32
    %c0_i32_0 = arith.constant 0 : i32
    return %arg0, %c0_i32 : i32, i32
  }
}

module attributes {stable_mosaic.version = 11 : i64} {
  func.func @_att_seg_kernel(%arg0: i32, %arg1: memref<1x1x512xf32, #tpu.memory_space<vmem>>, %arg2: memref<1x4x512xbf16, #tpu.memory_space<vmem>>, %arg3: memref<2x512xbf16, #tpu.memory_space<vmem>>, %arg4: memref<2x1xf32, #tpu.memory_space<vmem>>, %arg5: memref<1x2x4xf32, #tpu.memory_space<vmem>>, %arg6: memref<1x1x4xf32, #tpu.memory_space<vmem>>) attributes {dimension_semantics = [#tpu.dimension_semantics<parallel>], iteration_bounds = array<i64: 2>, scalar_prefetch = 0 : i64, scratch_operands = 0 : i64, tpu.core_type = #tpu.core_type<tc>, window_params = [{transform_indices = @transform_0, window_bounds = array<i64: 1, 1, 512>}, {transform_indices = @transform_1, window_bounds = array<i64: 1, 4, 512>}, {pipeline_mode = #tpu.pipeline_mode<synchronous>, transform_indices = @transform_2, window_bounds = array<i64: 2, 512>}, {pipeline_mode = #tpu.pipeline_mode<synchronous>, transform_indices = @transform_3, window_bounds = array<i64: 2, 1>}, {transform_indices = @transform_4, window_bounds = array<i64: 1, 2, 4>}, {transform_indices = @transform_5, window_bounds = array<i64: 1, 1, 4>}]} {
    %c0 = arith.constant 0 : index
    %c0_0 = arith.constant 0 : index
    %c0_1 = arith.constant 0 : index
    %0 = vector.load %arg2[%c0, %c0_0, %c0_1] : memref<1x4x512xbf16, #tpu.memory_space<vmem>>, vector<1x4x512xbf16>
    %1 = vector.shape_cast %0 : vector<1x4x512xbf16> to vector<4x512xbf16>
    %c0_2 = arith.constant 0 : index
    %c0_3 = arith.constant 0 : index
    %c0_4 = arith.constant 0 : index
    %2 = vector.load %arg1[%c0_2, %c0_3, %c0_4] : memref<1x1x512xf32, #tpu.memory_space<vmem>>, vector<1x1x512xf32>
    %3 = vector.shape_cast %2 : vector<1x1x512xf32> to vector<1x512xf32>
    %4 = arith.truncf %3 : vector<1x512xf32> to vector<1x512xbf16>
    %cst = arith.constant dense<0.000000e+00> : vector<1x4xf32>
    %5 = tpu.matmul %4, %1, %cst {dimension_numbers = #tpu.dot_dimension_numbers<[1], [1], [0], [0], [0, 0, 1, 0], [], []>} : vector<1x512xbf16>, vector<4x512xbf16>, vector<1x4xf32> -> vector<1x4xf32>
    %cst_5 = arith.constant 0.0441941731 : f32
    %6 = vector.broadcast %cst_5 : f32 to vector<1x4xf32>
    %7 = arith.mulf %5, %6 : vector<1x4xf32>
    %cst_6 = arith.constant dense<0xFF800000> : vector<1xf32>
    %8 = vector.multi_reduction <maximumf>, %7, %cst_6 [1] : vector<1x4xf32> to vector<1xf32>
    %9 = vector.shape_cast %8 : vector<1xf32> to vector<1x1xf32>
    %10 = vector.broadcast %9 : vector<1x1xf32> to vector<1x4xf32>
    %11 = arith.subf %7, %10 : vector<1x4xf32>
    %12 = math.exp %11 : vector<1x4xf32>
    %cst_7 = arith.constant dense<0.000000e+00> : vector<1xf32>
    %13 = vector.multi_reduction <add>, %12, %cst_7 [1] : vector<1x4xf32> to vector<1xf32>
    %14 = vector.shape_cast %13 : vector<1xf32> to vector<1x1xf32>
    %15 = vector.broadcast %14 : vector<1x1xf32> to vector<1x4xf32>
    %16 = arith.divf %12, %15 : vector<1x4xf32>
    %c0_8 = arith.constant 0 : index
    %c0_9 = arith.constant 0 : index
    %c0_10 = arith.constant 0 : index
    %17 = vector.load %arg6[%c0_8, %c0_9, %c0_10] : memref<1x1x4xf32, #tpu.memory_space<vmem>>, vector<1x1x4xf32>
    %18 = vector.shape_cast %17 : vector<1x1x4xf32> to vector<1x4xf32>
    %19 = vector.shape_cast %16 : vector<1x4xf32> to vector<1x1x4xf32>
    tpu.vector_store %arg6[%c0_8, %c0_9, %c0_10], %19 {strides = array<i32>} : memref<1x1x4xf32, #tpu.memory_space<vmem>>, vector<1x1x4xf32>,
    %c0_11 = arith.constant 0 : index
    %c0_12 = arith.constant 0 : index
    %20 = vector.load %arg3[%c0_11, %c0_12] : memref<2x512xbf16, #tpu.memory_space<vmem>>, vector<2x512xbf16>
    %cst_13 = arith.constant dense<0.000000e+00> : vector<2x4xf32>
    %21 = tpu.matmul %20, %1, %cst_13 {dimension_numbers = #tpu.dot_dimension_numbers<[1], [1], [0], [0], [0, 0, 1, 0], [], []>} : vector<2x512xbf16>, vector<4x512xbf16>, vector<2x4xf32> -> vector<2x4xf32>
    %22 = vector.broadcast %16 : vector<1x4xf32> to vector<2x4xf32>
    %23 = arith.mulf %21, %22 : vector<2x4xf32>
    %c0_14 = arith.constant 0 : index
    %c0_15 = arith.constant 0 : index
    %24 = vector.load %arg4[%c0_14, %c0_15] : memref<2x1xf32, #tpu.memory_space<vmem>>, vector<2x1xf32>
    %25 = vector.broadcast %24 : vector<2x1xf32> to vector<2x4xf32>
    %26 = arith.addf %23, %25 : vector<2x4xf32>
    %c0_16 = arith.constant 0 : index
    %c0_17 = arith.constant 0 : index
    %c0_18 = arith.constant 0 : index
    %27 = vector.load %arg5[%c0_16, %c0_17, %c0_18] : memref<1x2x4xf32, #tpu.memory_space<vmem>>, vector<1x2x4xf32>
    %28 = vector.shape_cast %27 : vector<1x2x4xf32> to vector<2x4xf32>
    %29 = vector.shape_cast %26 : vector<2x4xf32> to vector<1x2x4xf32>
    tpu.vector_store %arg5[%c0_16, %c0_17, %c0_18], %29 {strides = array<i32>} : memref<1x2x4xf32, #tpu.memory_space<vmem>>, vector<1x2x4xf32>,
    return
  }
  func.func @transform_0(%arg0: i32) -> (i32, i32, i32) {
    %c0_i32 = arith.constant 0 : i32
    %c0_i32_0 = arith.constant 0 : i32
    %c0_i32_1 = arith.constant 0 : i32
    return %arg0, %c0_i32, %c0_i32_0 : i32, i32, i32
  }
  func.func @transform_1(%arg0: i32) -> (i32, i32, i32) {
    %c0_i32 = arith.constant 0 : i32
    %c0_i32_0 = arith.constant 0 : i32
    %c0_i32_1 = arith.constant 0 : i32
    return %arg0, %c0_i32, %c0_i32_0 : i32, i32, i32
  }
  func.func @transform_2(%arg0: i32) -> (i32, i32) {
    %c0_i32 = arith.constant 0 : i32
    %c0_i32_0 = arith.constant 0 : i32
    %c0_i32_1 = arith.constant 0 : i32
    return %c0_i32, %c0_i32_0 : i32, i32
  }
  func.func @transform_3(%arg0: i32) -> (i32, i32) {
    %c0_i32 = arith.constant 0 : i32
    %c0_i32_0 = arith.constant 0 : i32
    %c0_i32_1 = arith.constant 0 : i32
    return %c0_i32, %c0_i32_0 : i32, i32
  }
  func.func @transform_4(%arg0: i32) -> (i32, i32, i32) {
    %c0_i32 = arith.constant 0 : i32
    %c0_i32_0 = arith.constant 0 : i32
    %c0_i32_1 = arith.constant 0 : i32
    return %arg0, %c0_i32, %c0_i32_0 : i32, i32, i32
  }
  func.func @transform_5(%arg0: i32) -> (i32, i32, i32) {
    %c0_i32 = arith.constant 0 : i32
    %c0_i32_0 = arith.constant 0 : i32
    %c0_i32_1 = arith.constant 0 : i32
    return %arg0, %c0_i32, %c0_i32_0 : i32, i32, i32
  }
}

module attributes {stable_mosaic.version = 11 : i64} {
  func.func @_linear_kernel(%arg0: i32, %arg1: memref<256x48xbf16, #tpu.memory_space<vmem>>, %arg2: memref<48x128xbf16, #tpu.memory_space<vmem>>, %arg3: memref<1x128xf32, #tpu.memory_space<vmem>>, %arg4: memref<256x128xbf16, #tpu.memory_space<vmem>>) attributes {dimension_semantics = [#tpu.dimension_semantics<parallel>], iteration_bounds = array<i64: 2>, scalar_prefetch = 0 : i64, scratch_operands = 0 : i64, tpu.core_type = #tpu.core_type<tc>, window_params = [{transform_indices = @transform_0, window_bounds = array<i64: 256, 48>}, {pipeline_mode = #tpu.pipeline_mode<synchronous>, transform_indices = @transform_1, window_bounds = array<i64: 48, 128>}, {pipeline_mode = #tpu.pipeline_mode<synchronous>, transform_indices = @transform_2, window_bounds = array<i64: 1, 128>}, {transform_indices = @transform_3, window_bounds = array<i64: 256, 128>}]} {
    %c0 = arith.constant 0 : index
    %c0_0 = arith.constant 0 : index
    %0 = vector.load %arg1[%c0, %c0_0] : memref<256x48xbf16, #tpu.memory_space<vmem>>, vector<256x48xbf16>
    %c0_1 = arith.constant 0 : index
    %c0_2 = arith.constant 0 : index
    %1 = vector.load %arg2[%c0_1, %c0_2] : memref<48x128xbf16, #tpu.memory_space<vmem>>, vector<48x128xbf16>
    %cst = arith.constant dense<0.000000e+00> : vector<256x128xf32>
    %2 = tpu.matmul %0, %1, %cst {dimension_numbers = #tpu.dot_dimension_numbers<[1], [0], [0], [1], [0, 0, 1, 1], [], []>} : vector<256x48xbf16>, vector<48x128xbf16>, vector<256x128xf32> -> vector<256x128xf32>
    %c0_3 = arith.constant 0 : index
    %c0_4 = arith.constant 0 : index
    %3 = vector.load %arg3[%c0_3, %c0_4] : memref<1x128xf32, #tpu.memory_space<vmem>>, vector<1x128xf32>
    %4 = vector.broadcast %3 : vector<1x128xf32> to vector<256x128xf32>
    %5 = arith.addf %2, %4 : vector<256x128xf32>
    %6 = arith.truncf %5 : vector<256x128xf32> to vector<256x128xbf16>
    %c0_5 = arith.constant 0 : index
    %c0_6 = arith.constant 0 : index
    %7 = vector.load %arg4[%c0_5, %c0_6] : memref<256x128xbf16, #tpu.memory_space<vmem>>, vector<256x128xbf16>
    tpu.vector_store %arg4[%c0_5, %c0_6], %6 {strides = array<i32>} : memref<256x128xbf16, #tpu.memory_space<vmem>>, vector<256x128xbf16>,
    return
  }
  func.func @transform_0(%arg0: i32) -> (i32, i32) {
    %c0_i32 = arith.constant 0 : i32
    %c0_i32_0 = arith.constant 0 : i32
    return %arg0, %c0_i32 : i32, i32
  }
  func.func @transform_1(%arg0: i32) -> (i32, i32) {
    %c0_i32 = arith.constant 0 : i32
    %c0_i32_0 = arith.constant 0 : i32
    %c0_i32_1 = arith.constant 0 : i32
    return %c0_i32, %c0_i32_0 : i32, i32
  }
  func.func @transform_2(%arg0: i32) -> (i32, i32) {
    %c0_i32 = arith.constant 0 : i32
    %c0_i32_0 = arith.constant 0 : i32
    %c0_i32_1 = arith.constant 0 : i32
    return %c0_i32, %c0_i32_0 : i32, i32
  }
  func.func @transform_3(%arg0: i32) -> (i32, i32) {
    %c0_i32 = arith.constant 0 : i32
    %c0_i32_0 = arith.constant 0 : i32
    return %arg0, %c0_i32 : i32, i32
  }
}

module attributes {stable_mosaic.version = 11 : i64} {
  func.func @_head_t_kernel(%arg0: i32, %arg1: memref<1x256x128xbf16, #tpu.memory_space<vmem>>, %arg2: memref<2x128xbf16, #tpu.memory_space<vmem>>, %arg3: memref<2x1xf32, #tpu.memory_space<vmem>>, %arg4: memref<1x2x256xf32, #tpu.memory_space<vmem>>) attributes {dimension_semantics = [#tpu.dimension_semantics<parallel>], iteration_bounds = array<i64: 2>, scalar_prefetch = 0 : i64, scratch_operands = 0 : i64, tpu.core_type = #tpu.core_type<tc>, window_params = [{transform_indices = @transform_0, window_bounds = array<i64: 1, 256, 128>}, {pipeline_mode = #tpu.pipeline_mode<synchronous>, transform_indices = @transform_1, window_bounds = array<i64: 2, 128>}, {pipeline_mode = #tpu.pipeline_mode<synchronous>, transform_indices = @transform_2, window_bounds = array<i64: 2, 1>}, {transform_indices = @transform_3, window_bounds = array<i64: 1, 2, 256>}]} {
    %c0 = arith.constant 0 : index
    %c0_0 = arith.constant 0 : index
    %0 = vector.load %arg2[%c0, %c0_0] : memref<2x128xbf16, #tpu.memory_space<vmem>>, vector<2x128xbf16>
    %c0_1 = arith.constant 0 : index
    %c0_2 = arith.constant 0 : index
    %c0_3 = arith.constant 0 : index
    %1 = vector.load %arg1[%c0_1, %c0_2, %c0_3] : memref<1x256x128xbf16, #tpu.memory_space<vmem>>, vector<1x256x128xbf16>
    %2 = vector.shape_cast %1 : vector<1x256x128xbf16> to vector<256x128xbf16>
    %cst = arith.constant dense<0.000000e+00> : vector<2x256xf32>
    %3 = tpu.matmul %0, %2, %cst {dimension_numbers = #tpu.dot_dimension_numbers<[1], [1], [0], [0], [0, 0, 1, 0], [], []>} : vector<2x128xbf16>, vector<256x128xbf16>, vector<2x256xf32> -> vector<2x256xf32>
    %c0_4 = arith.constant 0 : index
    %c0_5 = arith.constant 0 : index
    %4 = vector.load %arg3[%c0_4, %c0_5] : memref<2x1xf32, #tpu.memory_space<vmem>>, vector<2x1xf32>
    %5 = vector.broadcast %4 : vector<2x1xf32> to vector<2x256xf32>
    %6 = arith.addf %3, %5 : vector<2x256xf32>
    %c0_6 = arith.constant 0 : index
    %c0_7 = arith.constant 0 : index
    %c0_8 = arith.constant 0 : index
    %7 = vector.load %arg4[%c0_6, %c0_7, %c0_8] : memref<1x2x256xf32, #tpu.memory_space<vmem>>, vector<1x2x256xf32>
    %8 = vector.shape_cast %7 : vector<1x2x256xf32> to vector<2x256xf32>
    %9 = vector.shape_cast %6 : vector<2x256xf32> to vector<1x2x256xf32>
    tpu.vector_store %arg4[%c0_6, %c0_7, %c0_8], %9 {strides = array<i32>} : memref<1x2x256xf32, #tpu.memory_space<vmem>>, vector<1x2x256xf32>,
    return
  }
  func.func @transform_0(%arg0: i32) -> (i32, i32, i32) {
    %c0_i32 = arith.constant 0 : i32
    %c0_i32_0 = arith.constant 0 : i32
    %c0_i32_1 = arith.constant 0 : i32
    return %arg0, %c0_i32, %c0_i32_0 : i32, i32, i32
  }
  func.func @transform_1(%arg0: i32) -> (i32, i32) {
    %c0_i32 = arith.constant 0 : i32
    %c0_i32_0 = arith.constant 0 : i32
    %c0_i32_1 = arith.constant 0 : i32
    return %c0_i32, %c0_i32_0 : i32, i32
  }
  func.func @transform_2(%arg0: i32) -> (i32, i32) {
    %c0_i32 = arith.constant 0 : i32
    %c0_i32_0 = arith.constant 0 : i32
    %c0_i32_1 = arith.constant 0 : i32
    return %c0_i32, %c0_i32_0 : i32, i32
  }
  func.func @transform_3(%arg0: i32) -> (i32, i32, i32) {
    %c0_i32 = arith.constant 0 : i32
    %c0_i32_0 = arith.constant 0 : i32
    %c0_i32_1 = arith.constant 0 : i32
    return %arg0, %c0_i32, %c0_i32_0 : i32, i32, i32
  }
}

</mosaic_0001>

<bundles_post_ra>
// kernel: _lambda_.6
= control target key start
LH: loop header
LB: loop body
LE: loop exit
PB: predicated region body
PF: predicated region fallthrough
CT: control target
= control target key end

     0   :  { %11 = vsyncpa [#allocation3], 0  ;;  %s931_s0 = inlined_call_operand.vmem [shape: f32[2,1,512], index: 0, kind: input, shape index: {}]   ;;  %s932_s1 = inlined_call_operand.vmem [shape: bf16[2,4,512], index: 1, kind: input, shape index: {}]   ;;  %s933_s2 = inlined_call_operand.vmem [shape: bf16[2,512], index: 2, kind: input, shape index: {}]   ;;  %s934_s3 = inlined_call_operand.vmem [shape: f32[2,1], index: 3, kind: input, shape index: {}]   ;;  %s935_s4 = inlined_call_operand.vmem [shape: f32[2,2,4], index: 4, kind: output, shape index: {0}]   ;;  %s936_s5 = inlined_call_operand.hbm [shape: f32[2,1,4], index: 5, kind: output, shape index: {1}]  }
   0x1   :  { %13 = vsyncpa [#allocation3 + $0x1], 0  ;;  %s797_s18 = smov 0   ;;  %s799_s19 = smov 0  }
   0x2   :  { %s801_s20 = smov 0   ;;  %s803_s21 = smov 0  }
   0x3 LB: > { %s818_s22 = sadd.s32 4294967295, %s761_s21   ;;  %s629_s23 = sadd.s32 4294967294, %s761_s21   ;;  %s761_s21 = sphi %s803_s21, %s942_s21   ;;  %s757_s20 = sphi %s801_s20, %s941_s20   ;;  %s753_s19 = sphi %s799_s19, %s940_s19   ;;  %s749_s18 = sphi %s797_s18, %s939_s18  }
   0x4   : > { %s822_s24 = sadd.s32 1, %s761_s21   ;;  %s146_s25 = sadd.s32 1, %s757_s20 }
   0x5   : > { %s143_s26 = ssub.s32 %s761_s21, %s822_s24  ;;  %p156_p0 = scmp.ne.s32.totalorder %s757_s20, %s753_s19 }
   0x6   : > { %p144_p1 = scmp.eq.s32.totalorder %s143_s26, 0  ;;  %p157_p2 = scmp.eq.s32.totalorder %s818_s22, 1 }
   0x7   : > { %p162_p3 = scmp.ne.s32.totalorder %s753_s19, %s749_s18  ;;  %p163_p4 = scmp.eq.s32.totalorder %s629_s23, 1 }
   0x8   : > { %s833_s27 = scalar_select %p144_p1, %s757_s20, %s146_s25  }
   0x9   : > { %p835_p5 = por %p157_p2, %p156_p0  ;;  %p839_p6 = por %p163_p4, %p162_p3 }
   0xa   : > { %p632_p7 = scmp.ge.s32.totalorder %s761_s21, 1  ;;  %p202_p8 = scmp.lt.s32.totalorder %s761_s21, 3 }
   0xc   : > { %p203_p9 = pnand %p632_p7, %p202_p8 }
   0xd   : > { %p237_p10 = scmp.lt.s32.totalorder (!%p203_p9), %s818_s22, 1  ;;  %v254_v0 = vlaneseq (!%p203_p9)  ;;  %v763_v1 = vmov (!%p203_p9), 1983009808   ;;  %v764_v26 = vmov (!%p203_p9), 1966171168   ;;  %vm381_vm0 = vcmask (!%p203_p9), 24576  }
   0xe   : > { %206 = sbr.rel (%p203_p9) target bundleno = 596 (0x254), region = 36  ;;  %v281_v2 = vunpack.c.l.s4 (!%p203_p9), %v763_v1  ;;  %v637_v25 = vld.sshfl [vmem:[%s933_s2] sm:$0x33 pattern:$0x75316420] (!%p203_p9)  ;;  %v405_v27 = vunpack.c.l.s4 (!%p203_p9), %v764_v26  ;;  %v765_v42 = vmov (!%p203_p9), 0  }
   0xf   : > { %v849_v3 = vshrl.u32 (!%p203_p9), %v254_v0, 7  ;;  %v403_v28 = vcombine.high (!%p203_p9), %v637_v25, %v637_v25  ;;  %v509_v41 = vld [vmem:[%s934_s3] sm:$0x3] (!%p203_p9)  ;;  %692 = vset.pattern.permute.xlu1 (!%p203_p9), %v765_v42  ;;  %693 = vset.pattern.permute.xlu0 (!%p203_p9), %v765_v42  ;;  %s235_s23 = sand.u32 (!%p203_p9), 1, %s753_s19   ;;  %s638_s25 = sshll.u32 (!%p203_p9), %s818_s22, 4 }
  0x10   : > { %v282_v4 = vunpack.c.0.s8 (!%p203_p9), %v281_v2  ;;  %v406_v29 = vunpack.c.0.s8 (!%p203_p9), %v405_v27  ;;  %512 = vperm.xlu1 (!%p203_p9), %692, %v509_v41   ;;  %s236_s26 = scalar_lea.vmem (!%p203_p9), [#allocation2], %s235_s23  ;;  %s880_s9 = scalar_lea.hbm (!%p203_p9), %s936_s5, %s638_s25 }
  0x11   : > { %v260_v5 = vsub.s32 (!%p203_p9), 1, %v849_v3  ;;  %v256_v12 = vsub.s32 (!%p203_p9), 0, %v849_v3  ;;  %v268_v13 = vsub.s32 (!%p203_p9), 3, %v849_v3  ;;  %v264_v22 = vsub.s32 (!%p203_p9), 2, %v849_v3  ;;  %s766_s12 = smov (!%p203_p9), [#allocation2]  }
  0x12   : > { %v285_v6 = vsub.s32 (!%p203_p9), %v282_v4, %v849_v3  ;;  %v409_v30 = vsub.s32 (!%p203_p9), %v406_v29, %v849_v3 }
  0x14   : > { %v417_v31 = vrot.slane (!%p203_p9), %v403_v28, %v409_v30  ;;  %v410_v32 = vrot.slane (!%p203_p9), %v637_v25, %v409_v30 }
  0x15   : > { %s847_s30 = scalar_select %p237_p10, %s818_s22, 1 }
  0x16   : > { %v419_v33 = vcombine.high %v417_v31, %v417_v31  ;;  %456 = vmatprep.mubr.bf16.mxu1 %v417_v31  ;;  %v418_v34 = vcombine.high %v410_v32, %v410_v32  ;;  %s523_s22 = scalar_lea.sflag [#allocation3], %s235_s23 }
  0x17   : > { %s641_s6 = sshll.u32 %s847_s30, 3  ;;  %s633_s7 = sshll.u32 %s847_s30, 2 }
  0x18   : > { %s245_s10 = scalar_lea.vmem %s932_s1, %s641_s6  ;;  %s240_s13 = scalar_lea.vmem %s931_s0, %s633_s7 }
  0x19   : > { %v251_v7 = vld [vmem:[%s245_s10] sm:$0xff]  ;;  %s538_s6 = sshll.u32 %s236_s26, 4  ;;  %s636_s10 = sshll.u32 %s847_s30, 1  ;;  %s882_s6 = int_to_ptr.vmem [resolvable:$true] %s538_s6 }
  0x1a   : > { %v252_v8 = vld [vmem:[%s240_s13] sm:$0xf]  ;;  %v279_v9 = vcombine.high %v251_v7, %v251_v7  ;;  %v286_v10 = vrot.slane %v251_v7, %v285_v6  ;;  %s699_s11 = scalar_lea.vmem %s882_s6, 16  ;;  %s703_s13 = sshll.u32 %s766_s12, 4  ;;  %s704_s13 = int_to_ptr.vmem [resolvable:$false] %s703_s13 }
  0x1b   : > { %v261_v11 = vrot.slane %v252_v8, %v260_v5  ;;  %v257_v17 = vrot.slane %v252_v8, %v256_v12  ;;  %v269_v19 = vrot.slane %v252_v8, %v268_v13  ;;  %v265_v23 = vrot.slane %v252_v8, %v264_v22  ;;  %p700_p11 = scmp.ne.s32.totalorder %s882_s6, %s699_s11  ;;  %s705_s14 = scalar_lea.vmem %s704_s13, 32 }
  0x1c   : > { %v294_v14 = vcombine.high %v286_v10, %v286_v10  ;;  %v293_v16 = vrot.slane %v279_v9, %v285_v6  ;;  %p706_p0 = scmp.lt.s32.totalorder %s882_s6, %s704_s13  ;;  %p707_p1 = scmp.lt.s32.totalorder %s705_s14, %s699_s11 }
  0x1d   : > { %v275_v15 = vpack.c.bf16 %v261_v11, %v261_v11  ;;  %v274_v20 = vpack.c.bf16 %v257_v17, %v257_v17  ;;  %v277_v21 = vpack.c.bf16 %v269_v19, %v269_v19  ;;  %v276_v24 = vpack.c.bf16 %v265_v23, %v265_v23  ;;  %p701_p12 = pnand %p700_p11, %p835_p5 }
  0x1e   : > { %300 = vmatprep.subr.bf16.mxu0 %v294_v14  ;;  %v295_v18 = vcombine.high %v293_v16, %v293_v16  ;;  %424 = vmatprep.subr.bf16.mxu1 %v294_v14  ;;  %p708_p2 = por %p707_p1, %p706_p0 }
  0x1f   : > { %332 = vmatprep.mubr.bf16.mxu0 %v275_v15  ;;  %301 = vmatpush1.bf16.xpose.msra.mxu0 %v286_v10  ;;  %p702_p13 = pneg %p701_p12 }
  0x20   : > { %340 = vmatprep.subr.bf16.mxu0 %v295_v18  ;;  %425 = vmatpush1.bf16.xpose.msra.mxu1 %v286_v10 }
  0x21   : > { %464 = vmatprep.subr.bf16.mxu1 %v295_v18  ;;  %p709_p3 = pnand %p708_p2, %p702_p13 }
  0x26   : > { %333 = vmatmul.mubr.bf16.vlgmr.msra.gmra.mrb[0].mxu0 %v274_v20 }
  0x27   : > { %341 = vmatpush1.bf16.xpose.msra.mxu0 %v293_v16  ;;  %372 = vmatprep.mubr.bf16.mxu0 %v277_v21 }
  0x28   : > { %457 = vmatmul.mubr.bf16.vlgmr.msra.gmra.mrb[0].mxu1 %v410_v32 }
  0x29   : > { %465 = vmatpush1.bf16.xpose.msra.mxu1 %v293_v16  ;;  %496 = vmatprep.mubr.bf16.mxu1 %v419_v33 }
  0x32   : > { %373 = vmatmul.mubr.bf16.vlgmr.msra.gmra.mrb[0].mxu0 %v276_v24 }
  0x34   : > { %497 = vmatmul.mubr.bf16.vlgmr.msra.gmra.mrb[0].mxu1 %v418_v34 }
  0x8f   : > { %v513_v56 = vpop.permute.xlu1 %512 }
 0x105   : > { %v374_v35 = vpop.f32.mrb[0].mxu0 }
 0x106   : > { %v380_v36 = vmul.f32 0.044194173, %v374_v35  ;;  %v376_v37 = vpop.f32.mrb[1].mxu0 }
 0x107   : > { %v377_v38 = vpop.f32.mrb[2].mxu0  ;;  %v498_v48 = vpop.f32.mrb[0].mxu1 }
 0x108   : > { %v378_v39 = vpop.f32.mrb[3].mxu0  ;;  %v382_v40 = vsel %vm381_vm0, %v380_v36, -inf  ;;  %v500_v49 = vpop.f32.mrb[1].mxu1 }
 0x109   : > { %383 = vmax.xlane.f32.xlu0 %v382_v40  ;;  %v501_v50 = vpop.f32.mrb[2].mxu1 }
 0x10a   : > { %v502_v51 = vpop.f32.mrb[3].mxu1 }
 0x196   : > { %v384_v43 = vpop.xlane.xlu0 %383 }
 0x197   : > { %v385_v44 = vsub.f32 %v380_v36, %v384_v43 }
 0x199   : > { %v386_v45 = vmul.f32 1.442695, %v385_v44 }
 0x19b   : > { %695 = vpow2.f32 %v386_v45 }
 0x1a5   : > { %v696_v46 = vpop.eup %695 }
 0x1a6   : > { %v388_v47 = vsel %vm381_vm0, %v696_v46, 0.0 }
 0x1a7   : > { %389 = vadd.xlane.f32.xlu0 %v388_v47 }
 0x234   : > { %v390_v52 = vpop.xlane.xlu0 %389 }
 0x235   : > { %697 = vrcp.f32 %v390_v52 }
 0x23f   : > { %v698_v53 = vpop.eup %697 }
 0x240   : > { %v392_v54 = vmul.f32 %v698_v53, %v696_v46 }
 0x242   : > { %v507_v55 = vrot.slane %v392_v54, %v256_v12  ;;  %393 = vst.msk [vmem:[%s236_s26] sm:$0x1] %vm381_vm0, %v392_v54 }
 0x243   : > { %712 = shalt.err (!%p709_p3)
}
 0x244   : > { %s713_s15 = scalar_lea.hbm %s880_s9, 16  ;;  %s717_s23 = scalar_lea.hbm %s936_s5, 32 }
 0x245   : > { %p714_p4 = scmp.ne.s32.totalorder %s880_s9, %s713_s15  ;;  %p718_p9 = scmp.lt.u32.totalorder %s880_s9, %s936_s5 }
 0x246   : > { %p719_p10 = scmp.lt.u32.totalorder %s717_s23, %s713_s15  ;;  %p721_p12 = scmp.lt.u32.totalorder %s713_s15, %s880_s9 }
 0x247   : > { %p715_p7 = pnand %p714_p4, %p835_p5 }
 0x248   : > { %p720_p11 = por %p719_p10, %p718_p9 }
 0x249   : > { %p716_p8 = pneg %p715_p7 }
 0x24a   : > { %p722_p13 = por %p721_p12, %p720_p11 }
 0x24c   : > { %p723_p0 = pnand %p722_p13, %p716_p8 }
 0x24e   : > { %726 = shalt.err (!%p723_p0)
}
 0x24f   : > { %650 = dma.vmem_to_hbm [thread:$0]  (%p835_p5), %s882_s6, 16, %s880_s9, %s523_s22   ;;  %v508_v57 = vmul.f32 %v507_v55, %v498_v48  ;;  %vm516_vm1 = vcmask 25600  }
 0x250   : > { %s249_s11 = scalar_lea.vmem %s935_s4, %s636_s10 }
 0x251   : > { %v515_v58 = vadd.f32 %v513_v56, %v508_v57 }
 0x253   : > { %517 = vst.msk [vmem:[%s249_s11] sm:$0x3] %vm516_vm1, %v515_v58 }
 0x254 PF: > { %p656_p1 = scmp.ge.s32.totalorder %s761_s21, 2  ;;  %s557_s12 = sand.u32 1, %s749_s18  }
 0x255   : > { %s558_s28 = scalar_lea.sflag [#allocation3], %s557_s12 }
 0x256   : > { %p653_p2 = pnand %p656_p1, %p839_p6 }
 0x258   : > { %744 = dma.done.wait (!%p653_p2), %s558_s28, 16  }
 0x259   : > { %746 = vsyncadd (!%p653_p2), %s558_s28, 4294967280  ;;  %p16_p5 = scmp.ge.s32.totalorder %s822_s24, 4   ;;  %s939_s18 = smov %s753_s19 }
 0x25a   : > { %s940_s19 = smov %s757_s20  ;;  %s941_s20 = smov %s833_s27 }
 0x25b   : > { %s942_s21 = smov %s822_s24  ;;  %18 = sbr.rel (!%p16_p5) target bundleno = 3 (0x3), region = 86 }
 0x262   :  { %562 = vsyncpa [#allocation3], 1 }
 0x263   :  { %564 = vsyncpa [#allocation3 + $0x1], 1 }

// kernel: _lambda_.5
= control target key start
LH: loop header
LB: loop body
LE: loop exit
PB: predicated region body
PF: predicated region fallthrough
CT: control target
= control target key end

     0   :  { %8 = vsyncpa [#allocation3], 0  ;;  %s8046_s0 = inlined_call_operand.vmem [shape: bf16[8,3072], index: 0, kind: input, shape index: {}]   ;;  %s8047_s1 = inlined_call_operand.hbm [shape: bf16[3072,512], index: 1, kind: input, shape index: {}]   ;;  %s8048_s2 = inlined_call_operand.hbm [shape: f32[1,512], index: 2, kind: input, shape index: {}]   ;;  %s8049_s3 = inlined_call_operand.vmem [shape: bf16[8,512], index: 3, kind: output, shape index: {}]  }
   0x1   :  { %9 = vsyncpa [#allocation5], 0  ;;  %s7890_s12 = smov [#allocation2]   ;;  %s7842_s16 = scalar_lea.hbm %s8047_s1, 98304 }
   0x2   :  { %s17_s13 = sshll.u32 %s7890_s12, 4  ;;  %p7843_p0 = scmp.ne.s32.totalorder %s8047_s1, %s7842_s16  ;;  %s18_s13 = int_to_ptr.vmem [resolvable:$true] %s17_s13 }
   0x3   :  { %p7846_p1 = scmp.lt.u32.totalorder %s7842_s16, %s8047_s1 }
   0x5   :  { %p7848_p2 = pnand %p7846_p1, %p7843_p0 }
   0x7   :  { %7851 = shalt.err (!%p7848_p2)
}
   0x8   :  { %s7852_s21 = scalar_lea.vmem %s18_s13, 98304  ;;  %p7857_p4 = scmp.lt.s32.totalorder %s18_s13, %s18_s13 }
   0x9   :  { %p7853_p3 = scmp.ne.s32.totalorder %s18_s13, %s7852_s21  ;;  %p7858_p5 = scmp.lt.s32.totalorder %s7852_s21, %s7852_s21 }
   0xb   :  { %p7859_p6 = por %p7858_p5, %p7857_p4 }
   0xd   :  { %p7860_p7 = pnand %p7859_p6, %p7853_p3 }
   0xf   :  { %7863 = shalt.err (!%p7860_p7)
}
  0x10   :  { %s7891_s22 = smov 256   ;;  %s7892_s23 = smov 16  }
  0x11   :  { %23 = dma.hbm_to_vmem [thread:$0]  %s8047_s1, 98304, %s18_s13, [#allocation3], %s7891_s22, %s7891_s22, %s7892_s23  }
  0x12   :  { %s7893_s26 = smov [#allocation4]   ;;  %s7864_s30 = scalar_lea.hbm %s8048_s2, 64 }
  0x13   :  { %s30_s27 = sshll.u32 %s7893_s26, 4  ;;  %p7865_p8 = scmp.ne.s32.totalorder %s8048_s2, %s7864_s30  ;;  %s31_s27 = int_to_ptr.vmem [resolvable:$true] %s30_s27 }
  0x14   :  { %p7868_p9 = scmp.lt.u32.totalorder %s7864_s30, %s8048_s2 }
  0x16   :  { %p7870_p10 = pnand %p7868_p9, %p7865_p8 }
  0x18   :  { %7873 = shalt.err (!%p7870_p10)
}
  0x19   :  { %s7874_s8 = scalar_lea.vmem %s31_s27, 64  ;;  %p7879_p12 = scmp.lt.s32.totalorder %s31_s27, %s31_s27 }
  0x1a   :  { %p7875_p11 = scmp.ne.s32.totalorder %s31_s27, %s7874_s8  ;;  %p7880_p13 = scmp.lt.s32.totalorder %s7874_s8, %s7874_s8 }
  0x1c   :  { %p7881_p0 = por %p7880_p13, %p7879_p12 }
  0x1e   :  { %p7882_p1 = pnand %p7881_p0, %p7875_p11 }
  0x20   :  { %7885 = shalt.err (!%p7882_p1)
}
  0x21   :  { %33 = dma.hbm_to_vmem [thread:$0]  %s8048_s2, 64, %s31_s27, [#allocation5]  }
  0x22   :  { %7886 = dma.done.wait [#allocation3], 98304  }
  0x23   :  { %7887 = vsyncadd [#allocation3], 4294868992 }
  0x24   :  { %7888 = dma.done.wait [#allocation5], 64  }
  0x25   :  { %7889 = vsyncadd [#allocation5], 4294967232  ;;  %v6666_v0 = vld [vmem:[#allocation2 + $0x4] ss:$16 sps:$4 sm:$0xff]   ;;  %v6668_v1 = vld [vmem:[#allocation2 + $0xc] ss:$16 sps:$4 sm:$0xff]  }
  0x26   :  { %4766 = vmatprep.subr.bf16.mxu0 %v6666_v0  ;;  %v6670_v2 = vld [vmem:[#allocation2] ss:$16 sps:$4 sm:$0xff]   ;;  %v6671_v3 = vld [vmem:[#allocation2 + $0x8] ss:$16 sps:$4 sm:$0xff]   ;;  %5258 = vmatprep.subr.bf16.mxu1 %v6668_v1  ;;  %v6672_v4 = vld [vmem:[#allocation2 + $0x24] ss:$16 sps:$4 sm:$0xff]  }
  0x27   :  { %4767 = vmatpush1.bf16.msra.mxu0 %v6670_v2  ;;  %5259 = vmatpush1.bf16.msra.mxu1 %v6671_v3  ;;  %v6674_v5 = vld [vmem:[#allocation2 + $0x2c] ss:$16 sps:$4 sm:$0xff]   ;;  %v6676_v6 = vld [vmem:[#allocation2 + $0x20] ss:$16 sps:$4 sm:$0xff]   ;;  %v6677_v7 = vld [vmem:[#allocation2 + $0x28] ss:$16 sps:$4 sm:$0xff]  }
  0x28   :  { %4768 = vmatprep.subr.bf16.mxu0 %v6672_v4  ;;  %5260 = vmatprep.subr.bf16.mxu1 %v6674_v5  ;;  %v6678_v8 = vld [vmem:[#allocation2 + $0x44] ss:$16 sps:$4 sm:$0xff]   ;;  %v6680_v9 = vld [vmem:[#allocation2 + $0x4c] ss:$16 sps:$4 sm:$0xff]   ;;  %v6682_v10 = vld [vmem:[#allocation2 + $0x40] ss:$16 sps:$4 sm:$0xff]  }
  0x29   :  { %v6683_v11 = vld [vmem:[#allocation2 + $0x48] ss:$16 sps:$4 sm:$0xff]   ;;  %v6684_v12 = vld [vmem:[#allocation2 + $0x64] ss:$16 sps:$4 sm:$0xff]   ;;  %v6686_v13 = vld [vmem:[#allocation2 + $0x6c] ss:$16 sps:$4 sm:$0xff]  }
  0x2a   :  { %v6688_v14 = vld [vmem:[#allocation2 + $0x60] ss:$16 sps:$4 sm:$0xff]   ;;  %v6689_v15 = vld [vmem:[#allocation2 + $0x68] ss:$16 sps:$4 sm:$0xff]   ;;  %v6690_v16 = vld [vmem:[#allocation2 + $0x84] ss:$16 sps:$4 sm:$0xff]  }
  0x2b   :  { %4769 = vmatpush1.bf16.msra.mxu0 %v6676_v6  ;;  %5261 = vmatpush1.bf16.msra.mxu1 %v6677_v7  ;;  %v6692_v17 = vld [vmem:[#allocation2 + $0x8c] ss:$16 sps:$4 sm:$0xff]   ;;  %v6694_v18 = vld [vmem:[#allocation2 + $0x80] ss:$16 sps:$4 sm:$0xff]   ;;  %v6695_v19 = vld [vmem:[#allocation2 + $0x88] ss:$16 sps:$4 sm:$0xff]  }
  0x2c   :  { %4770 = vmatprep.subr.bf16.mxu0 %v6678_v8  ;;  %5262 = vmatprep.subr.bf16.mxu1 %v6680_v9  ;;  %v6696_v20 = vld [vmem:[#allocation2 + $0xa4] ss:$16 sps:$4 sm:$0xff]   ;;  %v6698_v21 = vld [vmem:[#allocation2 + $0xac] ss:$16 sps:$4 sm:$0xff]   ;;  %v6700_v22 = vld [vmem:[#allocation2 + $0xa0] ss:$16 sps:$4 sm:$0xff]  }
  0x2d   :  { %v6701_v23 = vld [vmem:[#allocation2 + $0xa8] ss:$16 sps:$4 sm:$0xff]   ;;  %v6702_v24 = vld [vmem:[#allocation2 + $0xc4] ss:$16 sps:$4 sm:$0xff]   ;;  %v6704_v25 = vld [vmem:[#allocation2 + $0xcc] ss:$16 sps:$4 sm:$0xff]  }
  0x2e   :  { %v6706_v26 = vld [vmem:[#allocation2 + $0xc0] ss:$16 sps:$4 sm:$0xff]   ;;  %v6707_v27 = vld [vmem:[#allocation2 + $0xc8] ss:$16 sps:$4 sm:$0xff]   ;;  %v6708_v28 = vld [vmem:[#allocation2 + $0xe4] ss:$16 sps:$4 sm:$0xff]  }
  0x2f   :  { %4771 = vmatpush1.bf16.msra.mxu0 %v6682_v10  ;;  %5263 = vmatpush1.bf16.msra.mxu1 %v6683_v11  ;;  %v6710_v29 = vld [vmem:[#allocation2 + $0xec] ss:$16 sps:$4 sm:$0xff]   ;;  %v6712_v30 = vld [vmem:[#allocation2 + $0xe0] ss:$16 sps:$4 sm:$0xff]   ;;  %v6713_v31 = vld [vmem:[#allocation2 + $0xe8] ss:$16 sps:$4 sm:$0xff]  }
  0x30   :  { %4772 = vmatprep.subr.bf16.mxu0 %v6684_v12  ;;  %5264 = vmatprep.subr.bf16.mxu1 %v6686_v13  ;;  %v6714_v32 = vld [vmem:[#allocation2 + $0x104] ss:$16 sps:$4 sm:$0xff]   ;;  %v6716_v33 = vld [vmem:[#allocation2 + $0x10c] ss:$16 sps:$4 sm:$0xff]   ;;  %v6718_v34 = vld [vmem:[#allocation2 + $0x100] ss:$16 sps:$4 sm:$0xff]  }
  0x31   :  { %v6719_v35 = vld [vmem:[#allocation2 + $0x108] ss:$16 sps:$4 sm:$0xff]   ;;  %v6720_v36 = vld [vmem:[#allocation2 + $0x124] ss:$16 sps:$4 sm:$0xff]   ;;  %v6722_v37 = vld [vmem:[#allocation2 + $0x12c] ss:$16 sps:$4 sm:$0xff]  }
  0x32   :  { %v6724_v38 = vld [vmem:[#allocation2 + $0x120] ss:$16 sps:$4 sm:$0xff]   ;;  %v6725_v39 = vld [vmem:[#allocation2 + $0x128] ss:$16 sps:$4 sm:$0xff]   ;;  %v6726_v40 = vld [vmem:[#allocation2 + $0x144] ss:$16 sps:$4 sm:$0xff]  }
  0x33   :  { %4773 = vmatpush1.bf16.msra.mxu0 %v6688_v14  ;;  %5265 = vmatpush1.bf16.msra.mxu1 %v6689_v15  ;;  %v6728_v41 = vld [vmem:[#allocation2 + $0x14c] ss:$16 sps:$4 sm:$0xff]   ;;  %v6730_v42 = vld [vmem:[#allocation2 + $0x140] ss:$16 sps:$4 sm:$0xff]   ;;  %v6731_v43 = vld [vmem:[#allocation2 + $0x148] ss:$16 sps:$4 sm:$0xff]  }
  0x34   :  { %4774 = vmatprep.subr.bf16.mxu0 %v6690_v16  ;;  %5266 = vmatprep.subr.bf16.mxu1 %v6692_v17  ;;  %v6732_v44 = vld [vmem:[#allocation2 + $0x164] ss:$16 sps:$4 sm:$0xff]   ;;  %v6734_v45 = vld [vmem:[#allocation2 + $0x16c] ss:$16 sps:$4 sm:$0xff]   ;;  %v6736_v47 = vld [vmem:[#allocation2 + $0x160] ss:$16 sps:$4 sm:$0xff]  }
  0x35   :  { %v40_v46 = vld [vmem:[%s8046_s0] sm:$0xff]  ;;  %v6737_v49 = vld [vmem:[#allocation2 + $0x168] ss:$16 sps:$4 sm:$0xff]   ;;  %v6740_v51 = vld [vmem:[#allocation2 + $0x18c] ss:$16 sps:$4 sm:$0xff]  }
  0x36   :  { %v5775_v48 = vcombine.high %v40_v46, %v40_v46  ;;  %v6738_v50 = vld [vmem:[#allocation2 + $0x184] ss:$16 sps:$4 sm:$0xff]   ;;  %v6742_v52 = vld [vmem:[#allocation2 + $0x180] ss:$16 sps:$4 sm:$0xff]   ;;  %v6743_v53 = vld [vmem:[#allocation2 + $0x188] ss:$16 sps:$4 sm:$0xff]   ;;  %v5774_v4 = vcombine.low %v40_v46, %v40_v46 }
  0x37   :  { %4775 = vmatpush1.bf16.msra.mxu0 %v6694_v18  ;;  %5267 = vmatpush1.bf16.msra.mxu1 %v6695_v19  ;;  %v6744_v54 = vld [vmem:[#allocation2 + $0x1a4] ss:$16 sps:$4 sm:$0xff]   ;;  %v6746_v55 = vld [vmem:[#allocation2 + $0x1ac] ss:$16 sps:$4 sm:$0xff]   ;;  %v6748_v56 = vld [vmem:[#allocation2 + $0x1a0] ss:$16 sps:$4 sm:$0xff]  }
  0x38   :  { %4776 = vmatprep.subr.bf16.mxu0 %v6696_v20  ;;  %5268 = vmatprep.subr.bf16.mxu1 %v6698_v21  ;;  %v6749_v57 = vld [vmem:[#allocation2 + $0x1a8] ss:$16 sps:$4 sm:$0xff]   ;;  %v6750_v58 = vld [vmem:[#allocation2 + $0x1c4] ss:$16 sps:$4 sm:$0xff]   ;;  %v6752_v59 = vld [vmem:[#allocation2 + $0x1cc] ss:$16 sps:$4 sm:$0xff]  }
  0x39   :  { %4798 = vmatprep.mubr.bf16.mxu0 %v5775_v48  ;;  %5290 = vmatprep.mubr.bf16.mxu1 %v5775_v48  ;;  %v6754_v60 = vld [vmem:[#allocation2 + $0x1c0] ss:$16 sps:$4 sm:$0xff]   ;;  %v6755_v61 = vld [vmem:[#allocation2 + $0x1c8] ss:$16 sps:$4 sm:$0xff]   ;;  %v6756_v62 = vld [vmem:[#allocation2 + $0x1e4] ss:$16 sps:$4 sm:$0xff]  }
  0x3a   :  { %v6758_v63 = vld [vmem:[#allocation2 + $0x1ec] ss:$16 sps:$4 sm:$0xff]   ;;  %v6760_v0 = vld [vmem:[#allocation2 + $0x1e0] ss:$16 sps:$4 sm:$0xff]   ;;  %v6761_v1 = vld [vmem:[#allocation2 + $0x1e8] ss:$16 sps:$4 sm:$0xff]  }
  0x3b   :  { %4777 = vmatpush1.bf16.msra.mxu0 %v6700_v22  ;;  %5269 = vmatpush1.bf16.msra.mxu1 %v6701_v23  ;;  %v6766_v2 = vld [vmem:[#allocation2 + $0x204] ss:$16 sps:$4 sm:$0xff]   ;;  %v6769_v3 = vld [vmem:[#allocation2 + $0x20c] ss:$16 sps:$4 sm:$0xff]   ;;  %v6764_v5 = vld [vmem:[#allocation2 + $0x200] ss:$16 sps:$4 sm:$0xff]  }
  0x3c   :  { %4778 = vmatprep.subr.bf16.mxu0 %v6702_v24  ;;  %5270 = vmatprep.subr.bf16.mxu1 %v6704_v25  ;;  %v6767_v6 = vld [vmem:[#allocation2 + $0x208] ss:$16 sps:$4 sm:$0xff]   ;;  %v6772_v7 = vld [vmem:[#allocation2 + $0x224] ss:$16 sps:$4 sm:$0xff]   ;;  %v6775_v8 = vld [vmem:[#allocation2 + $0x22c] ss:$16 sps:$4 sm:$0xff]  }
  0x3d   :  { %v6770_v9 = vld [vmem:[#allocation2 + $0x220] ss:$16 sps:$4 sm:$0xff]   ;;  %v6773_v10 = vld [vmem:[#allocation2 + $0x228] ss:$16 sps:$4 sm:$0xff]   ;;  %v6778_v11 = vld [vmem:[#allocation2 + $0x244] ss:$16 sps:$4 sm:$0xff]  }
  0x3e   :  { %v6781_v12 = vld [vmem:[#allocation2 + $0x24c] ss:$16 sps:$4 sm:$0xff]   ;;  %v6776_v13 = vld [vmem:[#allocation2 + $0x240] ss:$16 sps:$4 sm:$0xff]   ;;  %v6779_v14 = vld [vmem:[#allocation2 + $0x248] ss:$16 sps:$4 sm:$0xff]  }
  0x3f   :  { %4779 = vmatpush1.bf16.msra.mxu0 %v6706_v26  ;;  %5271 = vmatpush1.bf16.msra.mxu1 %v6707_v27  ;;  %v6784_v15 = vld [vmem:[#allocation2 + $0x264] ss:$16 sps:$4 sm:$0xff]   ;;  %v6787_v16 = vld [vmem:[#allocation2 + $0x26c] ss:$16 sps:$4 sm:$0xff]   ;;  %v6782_v17 = vld [vmem:[#allocation2 + $0x260] ss:$16 sps:$4 sm:$0xff]  }
  0x40   :  { %4780 = vmatprep.subr.bf16.mxu0 %v6708_v28  ;;  %5272 = vmatprep.subr.bf16.mxu1 %v6710_v29  ;;  %v6785_v18 = vld [vmem:[#allocation2 + $0x268] ss:$16 sps:$4 sm:$0xff]   ;;  %v6790_v19 = vld [vmem:[#allocation2 + $0x284] ss:$16 sps:$4 sm:$0xff]   ;;  %v6793_v20 = vld [vmem:[#allocation2 + $0x28c] ss:$16 sps:$4 sm:$0xff]  }
  0x41   :  { %v6788_v21 = vld [vmem:[#allocation2 + $0x280] ss:$16 sps:$4 sm:$0xff]   ;;  %v6791_v22 = vld [vmem:[#allocation2 + $0x288] ss:$16 sps:$4 sm:$0xff]   ;;  %v6796_v23 = vld [vmem:[#allocation2 + $0x2a4] ss:$16 sps:$4 sm:$0xff]  }
  0x42   :  { %v6799_v24 = vld [vmem:[#allocation2 + $0x2ac] ss:$16 sps:$4 sm:$0xff]   ;;  %v6794_v25 = vld [vmem:[#allocation2 + $0x2a0] ss:$16 sps:$4 sm:$0xff]   ;;  %v6797_v26 = vld [vmem:[#allocation2 + $0x2a8] ss:$16 sps:$4 sm:$0xff]  }
  0x43   :  { %4781 = vmatpush1.bf16.msra.mxu0 %v6712_v30  ;;  %5273 = vmatpush1.bf16.msra.mxu1 %v6713_v31  ;;  %v6802_v27 = vld [vmem:[#allocation2 + $0x2c4] ss:$16 sps:$4 sm:$0xff]   ;;  %v6805_v28 = vld [vmem:[#allocation2 + $0x2cc] ss:$16 sps:$4 sm:$0xff]   ;;  %v6800_v31 = vld [vmem:[#allocation2 + $0x2c0] ss:$16 sps:$4 sm:$0xff]  }
  0x44   :  { %4782 = vmatprep.subr.bf16.mxu0 %v6714_v32  ;;  %5274 = vmatprep.subr.bf16.mxu1 %v6716_v33  ;;  %v7944_v29 = vld [vmem:[%s8046_s0 + $0x8] sm:$0xff]  ;;  %v6808_v33 = vld [vmem:[#allocation2 + $0x2e4] ss:$16 sps:$4 sm:$0xff]  }
  0x45   :  { %v5777_v30 = vcombine.high %v7944_v29, %v7944_v29  ;;  %v6803_v32 = vld [vmem:[#allocation2 + $0x2c8] ss:$16 sps:$4 sm:$0xff]   ;;  %v6829_v46 = vld [vmem:[#allocation2 + $0x34c] ss:$16 sps:$4 sm:$0xff]  }
  0x46   :  { %v6827_v48 = vld [vmem:[#allocation2 + $0x348] ss:$16 sps:$4 sm:$0xff]  }
  0x47   :  { %4783 = vmatpush1.bf16.msra.mxu0 %v6718_v34  ;;  %5275 = vmatpush1.bf16.msra.mxu1 %v6719_v35  ;;  %v6811_v34 = vld [vmem:[#allocation2 + $0x2ec] ss:$16 sps:$4 sm:$0xff]   ;;  %v6806_v35 = vld [vmem:[#allocation2 + $0x2e0] ss:$16 sps:$4 sm:$0xff]  }
  0x48   :  { %4784 = vmatprep.subr.bf16.mxu0 %v6720_v36  ;;  %5276 = vmatprep.subr.bf16.mxu1 %v6722_v37  ;;  %v6809_v36 = vld [vmem:[#allocation2 + $0x2e8] ss:$16 sps:$4 sm:$0xff]   ;;  %v6814_v37 = vld [vmem:[#allocation2 + $0x304] ss:$16 sps:$4 sm:$0xff]  }
  0x4b   :  { %4785 = vmatpush1.bf16.msra.mxu0 %v6724_v38  ;;  %5277 = vmatpush1.bf16.msra.mxu1 %v6725_v39  ;;  %v6817_v38 = vld [vmem:[#allocation2 + $0x30c] ss:$16 sps:$4 sm:$0xff]   ;;  %v6812_v39 = vld [vmem:[#allocation2 + $0x300] ss:$16 sps:$4 sm:$0xff]  }
  0x4c   :  { %4786 = vmatprep.subr.bf16.mxu0 %v6726_v40  ;;  %5278 = vmatprep.subr.bf16.mxu1 %v6728_v41  ;;  %v6815_v40 = vld [vmem:[#allocation2 + $0x308] ss:$16 sps:$4 sm:$0xff]   ;;  %v6820_v41 = vld [vmem:[#allocation2 + $0x324] ss:$16 sps:$4 sm:$0xff]  }
  0x4f   :  { %4787 = vmatpush1.bf16.msra.mxu0 %v6730_v42  ;;  %5279 = vmatpush1.bf16.msra.mxu1 %v6731_v43  ;;  %v6823_v42 = vld [vmem:[#allocation2 + $0x32c] ss:$16 sps:$4 sm:$0xff]   ;;  %v6818_v43 = vld [vmem:[#allocation2 + $0x320] ss:$16 sps:$4 sm:$0xff]  }
  0x50   :  { %4788 = vmatprep.subr.bf16.mxu0 %v6732_v44  ;;  %5280 = vmatprep.subr.bf16.mxu1 %v6734_v45  ;;  %v6821_v44 = vld [vmem:[#allocation2 + $0x328] ss:$16 sps:$4 sm:$0xff]   ;;  %v6826_v45 = vld [vmem:[#allocation2 + $0x344] ss:$16 sps:$4 sm:$0xff]  }
  0x53   :  { %4789 = vmatpush1.bf16.msra.mxu0 %v6736_v47  ;;  %5281 = vmatpush1.bf16.msra.mxu1 %v6737_v49  ;;  %v6824_v47 = vld [vmem:[#allocation2 + $0x340] ss:$16 sps:$4 sm:$0xff]   ;;  %v6832_v49 = vld [vmem:[#allocation2 + $0x364] ss:$16 sps:$4 sm:$0xff]  }
  0x54   :  { %4790 = vmatprep.subr.bf16.mxu0 %v6738_v50  ;;  %5282 = vmatprep.subr.bf16.mxu1 %v6740_v51  ;;  %v6835_v50 = vld [vmem:[#allocation2 + $0x36c] ss:$16 sps:$4 sm:$0xff]   ;;  %v6830_v51 = vld [vmem:[#allocation2 + $0x360] ss:$16 sps:$4 sm:$0xff]  }
  0x57   :  { %4791 = vmatpush1.bf16.msra.mxu0 %v6742_v52  ;;  %5283 = vmatpush1.bf16.msra.mxu1 %v6743_v53  ;;  %v6833_v52 = vld [vmem:[#allocation2 + $0x368] ss:$16 sps:$4 sm:$0xff]   ;;  %v6838_v53 = vld [vmem:[#allocation2 + $0x384] ss:$16 sps:$4 sm:$0xff]  }
  0x58   :  { %4792 = vmatprep.subr.bf16.mxu0 %v6744_v54  ;;  %5284 = vmatprep.subr.bf16.mxu1 %v6746_v55  ;;  %v6841_v54 = vld [vmem:[#allocation2 + $0x38c] ss:$16 sps:$4 sm:$0xff]   ;;  %v6836_v55 = vld [vmem:[#allocation2 + $0x380] ss:$16 sps:$4 sm:$0xff]  }
  0x5b   :  { %4793 = vmatpush1.bf16.msra.mxu0 %v6748_v56  ;;  %5285 = vmatpush1.bf16.msra.mxu1 %v6749_v57  ;;  %v6839_v56 = vld [vmem:[#allocation2 + $0x388] ss:$16 sps:$4 sm:$0xff]   ;;  %v6844_v57 = vld [vmem:[#allocation2 + $0x3a4] ss:$16 sps:$4 sm:$0xff]  }
  0x5c   :  { %4794 = vmatprep.subr.bf16.mxu0 %v6750_v58  ;;  %5286 = vmatprep.subr.bf16.mxu1 %v6752_v59  ;;  %v6847_v58 = vld [vmem:[#allocation2 + $0x3ac] ss:$16 sps:$4 sm:$0xff]   ;;  %v6842_v59 = vld [vmem:[#allocation2 + $0x3a0] ss:$16 sps:$4 sm:$0xff]  }
  0x5f   :  { %4795 = vmatpush1.bf16.msra.mxu0 %v6754_v60  ;;  %5287 = vmatpush1.bf16.msra.mxu1 %v6755_v61  ;;  %v6845_v60 = vld [vmem:[#allocation2 + $0x3a8] ss:$16 sps:$4 sm:$0xff]   ;;  %v6850_v61 = vld [vmem:[#allocation2 + $0x3c4] ss:$16 sps:$4 sm:$0xff]  }
  0x60   :  { %4796 = vmatprep.subr.bf16.mxu0 %v6756_v62  ;;  %5288 = vmatprep.subr.bf16.mxu1 %v6758_v63  ;;  %v6853_v62 = vld [vmem:[#allocation2 + $0x3cc] ss:$16 sps:$4 sm:$0xff]   ;;  %v6848_v63 = vld [vmem:[#allocation2 + $0x3c0] ss:$16 sps:$4 sm:$0xff]  }
  0x63   :  { %4797 = vmatpush1.bf16.msra.mxu0 %v6760_v0  ;;  %5289 = vmatpush1.bf16.msra.mxu1 %v6761_v1  ;;  %v6851_v0 = vld [vmem:[#allocation2 + $0x3c8] ss:$16 sps:$4 sm:$0xff]   ;;  %v6856_v1 = vld [vmem:[#allocation2 + $0x3e4] ss:$16 sps:$4 sm:$0xff]  }
  0x64   :  { %4807 = vmatprep.subr.bf16.mxu0 %v6766_v2  ;;  %5299 = vmatprep.subr.bf16.mxu1 %v6769_v3  ;;  %v6859_v2 = vld [vmem:[#allocation2 + $0x3ec] ss:$16 sps:$4 sm:$0xff]   ;;  %v6854_v3 = vld [vmem:[#allocation2 + $0x3e0] ss:$16 sps:$4 sm:$0xff]  }
  0x66   :  { %4799 = vmatmul.mubr.bf16.vlgmr.msra.gmra.mrb[0].mxu0 %v5774_v4  ;;  %5291 = vmatmul.mubr.bf16.vlgmr.msra.gmra.mrb[0].mxu1 %v5774_v4  ;;  %v6857_v4 = vld [vmem:[#allocation2 + $0x3e8] ss:$16 sps:$4 sm:$0xff]  }
  0x67   :  { %4808 = vmatpush1.bf16.msra.mxu0 %v6764_v5  ;;  %5300 = vmatpush1.bf16.msra.mxu1 %v6767_v6  ;;  %v6864_v5 = vld [vmem:[#allocation2 + $0x404] ss:$16 sps:$4 sm:$0xff]   ;;  %v6867_v6 = vld [vmem:[#allocation2 + $0x40c] ss:$16 sps:$4 sm:$0xff]  }
  0x68   :  { %4809 = vmatprep.subr.bf16.mxu0 %v6772_v7  ;;  %5301 = vmatprep.subr.bf16.mxu1 %v6775_v8  ;;  %v5776_v7 = vcombine.low %v7944_v29, %v7944_v29  ;;  %v6862_v8 = vld [vmem:[#allocation2 + $0x400] ss:$16 sps:$4 sm:$0xff]   ;;  %v6897_v29 = vld [vmem:[#allocation2 + $0x4ac] ss:$16 sps:$4 sm:$0xff]  }
  0x69   :  { %4839 = vmatprep.mubr.bf16.mxu0 %v5777_v30  ;;  %5331 = vmatprep.mubr.bf16.mxu1 %v5777_v30  ;;  %v6892_v30 = vld [vmem:[#allocation2 + $0x4a0] ss:$16 sps:$4 sm:$0xff]  }
  0x6b   :  { %4810 = vmatpush1.bf16.msra.mxu0 %v6770_v9  ;;  %5302 = vmatpush1.bf16.msra.mxu1 %v6773_v10  ;;  %v6865_v9 = vld [vmem:[#allocation2 + $0x408] ss:$16 sps:$4 sm:$0xff]   ;;  %v6870_v10 = vld [vmem:[#allocation2 + $0x424] ss:$16 sps:$4 sm:$0xff]  }
  0x6c   :  { %4811 = vmatprep.subr.bf16.mxu0 %v6778_v11  ;;  %5303 = vmatprep.subr.bf16.mxu1 %v6781_v12  ;;  %v7953_v11 = vld [vmem:[%s8046_s0 + $0x10] sm:$0xff]  ;;  %v6873_v12 = vld [vmem:[#allocation2 + $0x42c] ss:$16 sps:$4 sm:$0xff]  }
  0x6f   :  { %4812 = vmatpush1.bf16.msra.mxu0 %v6776_v13  ;;  %5304 = vmatpush1.bf16.msra.mxu1 %v6779_v14  ;;  %v5779_v13 = vcombine.high %v7953_v11, %v7953_v11  ;;  %v6868_v14 = vld [vmem:[#allocation2 + $0x420] ss:$16 sps:$4 sm:$0xff]  }
  0x70   :  { %4813 = vmatprep.subr.bf16.mxu0 %v6784_v15  ;;  %5305 = vmatprep.subr.bf16.mxu1 %v6787_v16  ;;  %v6871_v15 = vld [vmem:[#allocation2 + $0x428] ss:$16 sps:$4 sm:$0xff]   ;;  %v6876_v16 = vld [vmem:[#allocation2 + $0x444] ss:$16 sps:$4 sm:$0xff]  }
  0x73   :  { %4814 = vmatpush1.bf16.msra.mxu0 %v6782_v17  ;;  %5306 = vmatpush1.bf16.msra.mxu1 %v6785_v18  ;;  %v6879_v17 = vld [vmem:[#allocation2 + $0x44c] ss:$16 sps:$4 sm:$0xff]   ;;  %v6874_v18 = vld [vmem:[#allocation2 + $0x440] ss:$16 sps:$4 sm:$0xff]  }
  0x74   :  { %4815 = vmatprep.subr.bf16.mxu0 %v6790_v19  ;;  %5307 = vmatprep.subr.bf16.mxu1 %v6793_v20  ;;  %v6877_v19 = vld [vmem:[#allocation2 + $0x448] ss:$16 sps:$4 sm:$0xff]   ;;  %v6882_v20 = vld [vmem:[#allocation2 + $0x464] ss:$16 sps:$4 sm:$0xff]  }
  0x77   :  { %4816 = vmatpush1.bf16.msra.mxu0 %v6788_v21  ;;  %5308 = vmatpush1.bf16.msra.mxu1 %v6791_v22  ;;  %v6885_v21 = vld [vmem:[#allocation2 + $0x46c] ss:$16 sps:$4 sm:$0xff]   ;;  %v6880_v22 = vld [vmem:[#allocation2 + $0x460] ss:$16 sps:$4 sm:$0xff]  }
  0x78   :  { %4817 = vmatprep.subr.bf16.mxu0 %v6796_v23  ;;  %5309 = vmatprep.subr.bf16.mxu1 %v6799_v24  ;;  %v6883_v23 = vld [vmem:[#allocation2 + $0x468] ss:$16 sps:$4 sm:$0xff]   ;;  %v6888_v24 = vld [vmem:[#allocation2 + $0x484] ss:$16 sps:$4 sm:$0xff]  }
  0x7b   :  { %4818 = vmatpush1.bf16.msra.mxu0 %v6794_v25  ;;  %5310 = vmatpush1.bf16.msra.mxu1 %v6797_v26  ;;  %v6891_v25 = vld [vmem:[#allocation2 + $0x48c] ss:$16 sps:$4 sm:$0xff]   ;;  %v6886_v26 = vld [vmem:[#allocation2 + $0x480] ss:$16 sps:$4 sm:$0xff]  }
  0x7c   :  { %4819 = vmatprep.subr.bf16.mxu0 %v6802_v27  ;;  %5311 = vmatprep.subr.bf16.mxu1 %v6805_v28  ;;  %v6889_v27 = vld [vmem:[#allocation2 + $0x488] ss:$16 sps:$4 sm:$0xff]   ;;  %v6894_v28 = vld [vmem:[#allocation2 + $0x4a4] ss:$16 sps:$4 sm:$0xff]  }
  0x7f   :  { %4820 = vmatpush1.bf16.msra.mxu0 %v6800_v31  ;;  %5312 = vmatpush1.bf16.msra.mxu1 %v6803_v32  ;;  %v6895_v31 = vld [vmem:[#allocation2 + $0x4a8] ss:$16 sps:$4 sm:$0xff]   ;;  %v6900_v32 = vld [vmem:[#allocation2 + $0x4c4] ss:$16 sps:$4 sm:$0xff]  }
  0x80   :  { %4821 = vmatprep.subr.bf16.mxu0 %v6808_v33  ;;  %5313 = vmatprep.subr.bf16.mxu1 %v6811_v34  ;;  %v6903_v33 = vld [vmem:[#allocation2 + $0x4cc] ss:$16 sps:$4 sm:$0xff]   ;;  %v6898_v34 = vld [vmem:[#allocation2 + $0x4c0] ss:$16 sps:$4 sm:$0xff]  }
  0x83   :  { %4822 = vmatpush1.bf16.msra.mxu0 %v6806_v35  ;;  %5314 = vmatpush1.bf16.msra.mxu1 %v6809_v36  ;;  %v6901_v35 = vld [vmem:[#allocation2 + $0x4c8] ss:$16 sps:$4 sm:$0xff]   ;;  %v6906_v36 = vld [vmem:[#allocation2 + $0x4e4] ss:$16 sps:$4 sm:$0xff]  }
  0x84   :  { %4823 = vmatprep.subr.bf16.mxu0 %v6814_v37  ;;  %5315 = vmatprep.subr.bf16.mxu1 %v6817_v38  ;;  %v6909_v37 = vld [vmem:[#allocation2 + $0x4ec] ss:$16 sps:$4 sm:$0xff]   ;;  %v6904_v38 = vld [vmem:[#allocation2 + $0x4e0] ss:$16 sps:$4 sm:$0xff]  }
  0x87   :  { %4824 = vmatpush1.bf16.msra.mxu0 %v6812_v39  ;;  %5316 = vmatpush1.bf16.msra.mxu1 %v6815_v40  ;;  %v6907_v39 = vld [vmem:[#allocation2 + $0x4e8] ss:$16 sps:$4 sm:$0xff]   ;;  %v6912_v40 = vld [vmem:[#allocation2 + $0x504] ss:$16 sps:$4 sm:$0xff]  }
  0x88   :  { %4825 = vmatprep.subr.bf16.mxu0 %v6820_v41  ;;  %5317 = vmatprep.subr.bf16.mxu1 %v6823_v42  ;;  %v6915_v41 = vld [vmem:[#allocation2 + $0x50c] ss:$16 sps:$4 sm:$0xff]   ;;  %v6910_v42 = vld [vmem:[#allocation2 + $0x500] ss:$16 sps:$4 sm:$0xff]  }
  0x8b   :  { %4826 = vmatpush1.bf16.msra.mxu0 %v6818_v43  ;;  %5318 = vmatpush1.bf16.msra.mxu1 %v6821_v44  ;;  %v6913_v43 = vld [vmem:[#allocation2 + $0x508] ss:$16 sps:$4 sm:$0xff]   ;;  %v6918_v44 = vld [vmem:[#allocation2 + $0x524] ss:$16 sps:$4 sm:$0xff]  }
  0x8c   :  { %4827 = vmatprep.subr.bf16.mxu0 %v6826_v45  ;;  %5319 = vmatprep.subr.bf16.mxu1 %v6829_v46  ;;  %v6921_v45 = vld [vmem:[#allocation2 + $0x52c] ss:$16 sps:$4 sm:$0xff]   ;;  %v6916_v46 = vld [vmem:[#allocation2 + $0x520] ss:$16 sps:$4 sm:$0xff]  }
  0x8f   :  { %4828 = vmatpush1.bf16.msra.mxu0 %v6824_v47  ;;  %5320 = vmatpush1.bf16.msra.mxu1 %v6827_v48  ;;  %v6919_v47 = vld [vmem:[#allocation2 + $0x528] ss:$16 sps:$4 sm:$0xff]   ;;  %v6924_v48 = vld [vmem:[#allocation2 + $0x544] ss:$16 sps:$4 sm:$0xff]  }
  0x90   :  { %4829 = vmatprep.subr.bf16.mxu0 %v6832_v49  ;;  %5321 = vmatprep.subr.bf16.mxu1 %v6835_v50  ;;  %v6927_v49 = vld [vmem:[#allocation2 + $0x54c] ss:$16 sps:$4 sm:$0xff]   ;;  %v6922_v50 = vld [vmem:[#allocation2 + $0x540] ss:$16 sps:$4 sm:$0xff]  }
  0x93   :  { %4830 = vmatpush1.bf16.msra.mxu0 %v6830_v51  ;;  %5322 = vmatpush1.bf16.msra.mxu1 %v6833_v52  ;;  %v6925_v51 = vld [vmem:[#allocation2 + $0x548] ss:$16 sps:$4 sm:$0xff]   ;;  %v6930_v52 = vld [vmem:[#allocation2 + $0x564] ss:$16 sps:$4 sm:$0xff]  }
  0x94   :  { %4831 = vmatprep.subr.bf16.mxu0 %v6838_v53  ;;  %5323 = vmatprep.subr.bf16.mxu1 %v6841_v54  ;;  %v6933_v53 = vld [vmem:[#allocation2 + $0x56c] ss:$16 sps:$4 sm:$0xff]   ;;  %v6928_v54 = vld [vmem:[#allocation2 + $0x560] ss:$16 sps:$4 sm:$0xff]  }
  0x97   :  { %4832 = vmatpush1.bf16.msra.mxu0 %v6836_v55  ;;  %5324 = vmatpush1.bf16.msra.mxu1 %v6839_v56  ;;  %v6931_v55 = vld [vmem:[#allocation2 + $0x568] ss:$16 sps:$4 sm:$0xff]   ;;  %v6936_v56 = vld [vmem:[#allocation2 + $0x584] ss:$16 sps:$4 sm:$0xff]  }
  0x98   :  { %4833 = vmatprep.subr.bf16.mxu0 %v6844_v57  ;;  %5325 = vmatprep.subr.bf16.mxu1 %v6847_v58  ;;  %v6939_v57 = vld [vmem:[#allocation2 + $0x58c] ss:$16 sps:$4 sm:$0xff]   ;;  %v6934_v58 = vld [vmem:[#allocation2 + $0x580] ss:$16 sps:$4 sm:$0xff]  }
  0x9b   :  { %4834 = vmatpush1.bf16.msra.mxu0 %v6842_v59  ;;  %5326 = vmatpush1.bf16.msra.mxu1 %v6845_v60  ;;  %v6937_v59 = vld [vmem:[#allocation2 + $0x588] ss:$16 sps:$4 sm:$0xff]   ;;  %v6942_v60 = vld [vmem:[#allocation2 + $0x5a4] ss:$16 sps:$4 sm:$0xff]  }
  0x9c   :  { %4835 = vmatprep.subr.bf16.mxu0 %v6850_v61  ;;  %5327 = vmatprep.subr.bf16.mxu1 %v6853_v62  ;;  %v6945_v61 = vld [vmem:[#allocation2 + $0x5ac] ss:$16 sps:$4 sm:$0xff]   ;;  %v6940_v62 = vld [vmem:[#allocation2 + $0x5a0] ss:$16 sps:$4 sm:$0xff]  }
  0x9f   :  { %4836 = vmatpush1.bf16.msra.mxu0 %v6848_v63  ;;  %5328 = vmatpush1.bf16.msra.mxu1 %v6851_v0  ;;  %v6943_v63 = vld [vmem:[#allocation2 + $0x5a8] ss:$16 sps:$4 sm:$0xff]   ;;  %v6948_v0 = vld [vmem:[#allocation2 + $0x5c4] ss:$16 sps:$4 sm:$0xff]  }
  0xa0   :  { %4837 = vmatprep.subr.bf16.mxu0 %v6856_v1  ;;  %5329 = vmatprep.subr.bf16.mxu1 %v6859_v2  ;;  %v6951_v1 = vld [vmem:[#allocation2 + $0x5cc] ss:$16 sps:$4 sm:$0xff]   ;;  %v6946_v2 = vld [vmem:[#allocation2 + $0x5c0] ss:$16 sps:$4 sm:$0xff]  }
  0xa3   :  { %4838 = vmatpush1.bf16.msra.mxu0 %v6854_v3  ;;  %5330 = vmatpush1.bf16.msra.mxu1 %v6857_v4  ;;  %v6949_v3 = vld [vmem:[#allocation2 + $0x5c8] ss:$16 sps:$4 sm:$0xff]   ;;  %v6954_v4 = vld [vmem:[#allocation2 + $0x5e4] ss:$16 sps:$4 sm:$0xff]  }
  0xa4   :  { %4848 = vmatprep.subr.bf16.mxu0 %v6864_v5  ;;  %5340 = vmatprep.subr.bf16.mxu1 %v6867_v6  ;;  %v6957_v5 = vld [vmem:[#allocation2 + $0x5ec] ss:$16 sps:$4 sm:$0xff]   ;;  %v6952_v6 = vld [vmem:[#allocation2 + $0x5e0] ss:$16 sps:$4 sm:$0xff]  }
  0xa6   :  { %4840 = vmatmul.mubr.bf16.vlgmr.msra.gmra.mrb[0].mxu0 %v5776_v7  ;;  %5332 = vmatmul.mubr.bf16.vlgmr.msra.gmra.mrb[0].mxu1 %v5776_v7  ;;  %v6955_v7 = vld [vmem:[#allocation2 + $0x5e8] ss:$16 sps:$4 sm:$0xff]  }
  0xa7   :  { %4849 = vmatpush1.bf16.msra.mxu0 %v6862_v8  ;;  %5341 = vmatpush1.bf16.msra.mxu1 %v6865_v9  ;;  %v6962_v8 = vld [vmem:[#allocation2 + $0x604] ss:$16 sps:$4 sm:$0xff]   ;;  %v6965_v9 = vld [vmem:[#allocation2 + $0x60c] ss:$16 sps:$4 sm:$0xff]  }
  0xa8   :  { %4850 = vmatprep.subr.bf16.mxu0 %v6870_v10  ;;  %5342 = vmatprep.subr.bf16.mxu1 %v6873_v12  ;;  %v6960_v10 = vld [vmem:[#allocation2 + $0x600] ss:$16 sps:$4 sm:$0xff]   ;;  %v5778_v12 = vcombine.low %v7953_v11, %v7953_v11  ;;  %v6974_v11 = vld [vmem:[#allocation2 + $0x644] ss:$16 sps:$4 sm:$0xff]  }
  0xa9   :  { %4880 = vmatprep.mubr.bf16.mxu0 %v5779_v13  ;;  %5372 = vmatprep.mubr.bf16.mxu1 %v5779_v13  ;;  %v6963_v13 = vld [vmem:[#allocation2 + $0x608] ss:$16 sps:$4 sm:$0xff]  }
  0xab   :  { %4851 = vmatpush1.bf16.msra.mxu0 %v6868_v14  ;;  %5343 = vmatpush1.bf16.msra.mxu1 %v6871_v15  ;;  %v7962_v14 = vld [vmem:[%s8046_s0 + $0x18] sm:$0xff]  ;;  %v6968_v15 = vld [vmem:[#allocation2 + $0x624] ss:$16 sps:$4 sm:$0xff]  }
  0xac   :  { %4852 = vmatprep.subr.bf16.mxu0 %v6876_v16  ;;  %5344 = vmatprep.subr.bf16.mxu1 %v6879_v17  ;;  %v6971_v16 = vld [vmem:[#allocation2 + $0x62c] ss:$16 sps:$4 sm:$0xff]   ;;  %v5781_v17 = vcombine.high %v7962_v14, %v7962_v14 }
  0xaf   :  { %4853 = vmatpush1.bf16.msra.mxu0 %v6874_v18  ;;  %5345 = vmatpush1.bf16.msra.mxu1 %v6877_v19  ;;  %v6966_v18 = vld [vmem:[#allocation2 + $0x620] ss:$16 sps:$4 sm:$0xff]   ;;  %v6969_v19 = vld [vmem:[#allocation2 + $0x628] ss:$16 sps:$4 sm:$0xff]  }
  0xb0   :  { %4854 = vmatprep.subr.bf16.mxu0 %v6882_v20  ;;  %5346 = vmatprep.subr.bf16.mxu1 %v6885_v21  ;;  %v6977_v20 = vld [vmem:[#allocation2 + $0x64c] ss:$16 sps:$4 sm:$0xff]   ;;  %v6972_v21 = vld [vmem:[#allocation2 + $0x640] ss:$16 sps:$4 sm:$0xff]  }
  0xb3   :  { %4855 = vmatpush1.bf16.msra.mxu0 %v6880_v22  ;;  %5347 = vmatpush1.bf16.msra.mxu1 %v6883_v23  ;;  %v6975_v22 = vld [vmem:[#allocation2 + $0x648] ss:$16 sps:$4 sm:$0xff]   ;;  %v6980_v23 = vld [vmem:[#allocation2 + $0x664] ss:$16 sps:$4 sm:$0xff]  }
  0xb4   :  { %4856 = vmatprep.subr.bf16.mxu0 %v6888_v24  ;;  %5348 = vmatprep.subr.bf16.mxu1 %v6891_v25  ;;  %v6983_v24 = vld [vmem:[#allocation2 + $0x66c] ss:$16 sps:$4 sm:$0xff]   ;;  %v6978_v25 = vld [vmem:[#allocation2 + $0x660] ss:$16 sps:$4 sm:$0xff]  }
  0xb7   :  { %4857 = vmatpush1.bf16.msra.mxu0 %v6886_v26  ;;  %5349 = vmatpush1.bf16.msra.mxu1 %v6889_v27  ;;  %v6981_v26 = vld [vmem:[#allocation2 + $0x668] ss:$16 sps:$4 sm:$0xff]   ;;  %v6986_v27 = vld [vmem:[#allocation2 + $0x684] ss:$16 sps:$4 sm:$0xff]  }
  0xb8   :  { %4858 = vmatprep.subr.bf16.mxu0 %v6894_v28  ;;  %5350 = vmatprep.subr.bf16.mxu1 %v6897_v29  ;;  %v6989_v28 = vld [vmem:[#allocation2 + $0x68c] ss:$16 sps:$4 sm:$0xff]   ;;  %v6984_v29 = vld [vmem:[#allocation2 + $0x680] ss:$16 sps:$4 sm:$0xff]  }
  0xbb   :  { %4859 = vmatpush1.bf16.msra.mxu0 %v6892_v30  ;;  %5351 = vmatpush1.bf16.msra.mxu1 %v6895_v31  ;;  %v6987_v30 = vld [vmem:[#allocation2 + $0x688] ss:$16 sps:$4 sm:$0xff]   ;;  %v6992_v31 = vld [vmem:[#allocation2 + $0x6a4] ss:$16 sps:$4 sm:$0xff]  }
  0xbc   :  { %4860 = vmatprep.subr.bf16.mxu0 %v6900_v32  ;;  %5352 = vmatprep.subr.bf16.mxu1 %v6903_v33  ;;  %v6995_v32 = vld [vmem:[#allocation2 + $0x6ac] ss:$16 sps:$4 sm:$0xff]   ;;  %v6990_v33 = vld [vmem:[#allocation2 + $0x6a0] ss:$16 sps:$4 sm:$0xff]  }
  0xbf   :  { %4861 = vmatpush1.bf16.msra.mxu0 %v6898_v34  ;;  %5353 = vmatpush1.bf16.msra.mxu1 %v6901_v35  ;;  %v6993_v34 = vld [vmem:[#allocation2 + $0x6a8] ss:$16 sps:$4 sm:$0xff]   ;;  %v6998_v35 = vld [vmem:[#allocation2 + $0x6c4] ss:$16 sps:$4 sm:$0xff]  }
  0xc0   :  { %4862 = vmatprep.subr.bf16.mxu0 %v6906_v36  ;;  %5354 = vmatprep.subr.bf16.mxu1 %v6909_v37  ;;  %v7001_v36 = vld [vmem:[#allocation2 + $0x6cc] ss:$16 sps:$4 sm:$0xff]   ;;  %v6996_v37 = vld [vmem:[#allocation2 + $0x6c0] ss:$16 sps:$4 sm:$0xff]  }
  0xc3   :  { %4863 = vmatpush1.bf16.msra.mxu0 %v6904_v38  ;;  %5355 = vmatpush1.bf16.msra.mxu1 %v6907_v39  ;;  %v6999_v38 = vld [vmem:[#allocation2 + $0x6c8] ss:$16 sps:$4 sm:$0xff]   ;;  %v7004_v39 = vld [vmem:[#allocation2 + $0x6e4] ss:$16 sps:$4 sm:$0xff]  }
  0xc4   :  { %4864 = vmatprep.subr.bf16.mxu0 %v6912_v40  ;;  %5356 = vmatprep.subr.bf16.mxu1 %v6915_v41  ;;  %v7007_v40 = vld [vmem:[#allocation2 + $0x6ec] ss:$16 sps:$4 sm:$0xff]   ;;  %v7002_v41 = vld [vmem:[#allocation2 + $0x6e0] ss:$16 sps:$4 sm:$0xff]  }
  0xc7   :  { %4865 = vmatpush1.bf16.msra.mxu0 %v6910_v42  ;;  %5357 = vmatpush1.bf16.msra.mxu1 %v6913_v43  ;;  %v7005_v42 = vld [vmem:[#allocation2 + $0x6e8] ss:$16 sps:$4 sm:$0xff]   ;;  %v7010_v43 = vld [vmem:[#allocation2 + $0x704] ss:$16 sps:$4 sm:$0xff]  }
  0xc8   :  { %4866 = vmatprep.subr.bf16.mxu0 %v6918_v44  ;;  %5358 = vmatprep.subr.bf16.mxu1 %v6921_v45  ;;  %v7013_v44 = vld [vmem:[#allocation2 + $0x70c] ss:$16 sps:$4 sm:$0xff]   ;;  %v7008_v45 = vld [vmem:[#allocation2 + $0x700] ss:$16 sps:$4 sm:$0xff]  }
  0xcb   :  { %4867 = vmatpush1.bf16.msra.mxu0 %v6916_v46  ;;  %5359 = vmatpush1.bf16.msra.mxu1 %v6919_v47  ;;  %v7011_v46 = vld [vmem:[#allocation2 + $0x708] ss:$16 sps:$4 sm:$0xff]   ;;  %v7016_v47 = vld [vmem:[#allocation2 + $0x724] ss:$16 sps:$4 sm:$0xff]  }
  0xcc   :  { %4868 = vmatprep.subr.bf16.mxu0 %v6924_v48  ;;  %5360 = vmatprep.subr.bf16.mxu1 %v6927_v49  ;;  %v7019_v48 = vld [vmem:[#allocation2 + $0x72c] ss:$16 sps:$4 sm:$0xff]   ;;  %v7014_v49 = vld [vmem:[#allocation2 + $0x720] ss:$16 sps:$4 sm:$0xff]  }
  0xcf   :  { %4869 = vmatpush1.bf16.msra.mxu0 %v6922_v50  ;;  %5361 = vmatpush1.bf16.msra.mxu1 %v6925_v51  ;;  %v7017_v50 = vld [vmem:[#allocation2 + $0x728] ss:$16 sps:$4 sm:$0xff]   ;;  %v7022_v51 = vld [vmem:[#allocation2 + $0x744] ss:$16 sps:$4 sm:$0xff]  }
  0xd0   :  { %4870 = vmatprep.subr.bf16.mxu0 %v6930_v52  ;;  %5362 = vmatprep.subr.bf16.mxu1 %v6933_v53  ;;  %v7025_v52 = vld [vmem:[#allocation2 + $0x74c] ss:$16 sps:$4 sm:$0xff]   ;;  %v7020_v53 = vld [vmem:[#allocation2 + $0x740] ss:$16 sps:$4 sm:$0xff]  }
  0xd3   :  { %4871 = vmatpush1.bf16.msra.mxu0 %v6928_v54  ;;  %5363 = vmatpush1.bf16.msra.mxu1 %v6931_v55  ;;  %v7023_v54 = vld [vmem:[#allocation2 + $0x748] ss:$16 sps:$4 sm:$0xff]   ;;  %v7028_v55 = vld [vmem:[#allocation2 + $0x764] ss:$16 sps:$4 sm:$0xff]  }
  0xd4   :  { %4872 = vmatprep.subr.bf16.mxu0 %v6936_v56  ;;  %5364 = vmatprep.subr.bf16.mxu1 %v6939_v57  ;;  %v7031_v56 = vld [vmem:[#allocation2 + $0x76c] ss:$16 sps:$4 sm:$0xff]   ;;  %v7026_v57 = vld [vmem:[#allocation2 + $0x760] ss:$16 sps:$4 sm:$0xff]  }
  0xd7   :  { %4873 = vmatpush1.bf16.msra.mxu0 %v6934_v58  ;;  %5365 = vmatpush1.bf16.msra.mxu1 %v6937_v59  ;;  %v7029_v58 = vld [vmem:[#allocation2 + $0x768] ss:$16 sps:$4 sm:$0xff]   ;;  %v7034_v59 = vld [vmem:[#allocation2 + $0x784] ss:$16 sps:$4 sm:$0xff]  }
  0xd8   :  { %4874 = vmatprep.subr.bf16.mxu0 %v6942_v60  ;;  %5366 = vmatprep.subr.bf16.mxu1 %v6945_v61  ;;  %v7037_v60 = vld [vmem:[#allocation2 + $0x78c] ss:$16 sps:$4 sm:$0xff]   ;;  %v7032_v61 = vld [vmem:[#allocation2 + $0x780] ss:$16 sps:$4 sm:$0xff]  }
  0xdb   :  { %4875 = vmatpush1.bf16.msra.mxu0 %v6940_v62  ;;  %5367 = vmatpush1.bf16.msra.mxu1 %v6943_v63  ;;  %v7035_v62 = vld [vmem:[#allocation2 + $0x788] ss:$16 sps:$4 sm:$0xff]   ;;  %v7040_v63 = vld [vmem:[#allocation2 + $0x7a4] ss:$16 sps:$4 sm:$0xff]  }
  0xdc   :  { %4876 = vmatprep.subr.bf16.mxu0 %v6948_v0  ;;  %5368 = vmatprep.subr.bf16.mxu1 %v6951_v1  ;;  %v7043_v0 = vld [vmem:[#allocation2 + $0x7ac] ss:$16 sps:$4 sm:$0xff]   ;;  %v7038_v1 = vld [vmem:[#allocation2 + $0x7a0] ss:$16 sps:$4 sm:$0xff]  }
  0xdf   :  { %4877 = vmatpush1.bf16.msra.mxu0 %v6946_v2  ;;  %5369 = vmatpush1.bf16.msra.mxu1 %v6949_v3  ;;  %v7041_v2 = vld [vmem:[#allocation2 + $0x7a8] ss:$16 sps:$4 sm:$0xff]   ;;  %v7046_v3 = vld [vmem:[#allocation2 + $0x7c4] ss:$16 sps:$4 sm:$0xff]  }
  0xe0   :  { %4878 = vmatprep.subr.bf16.mxu0 %v6954_v4  ;;  %5370 = vmatprep.subr.bf16.mxu1 %v6957_v5  ;;  %v7049_v4 = vld [vmem:[#allocation2 + $0x7cc] ss:$16 sps:$4 sm:$0xff]   ;;  %v7044_v5 = vld [vmem:[#allocation2 + $0x7c0] ss:$16 sps:$4 sm:$0xff]  }
  0xe3   :  { %4879 = vmatpush1.bf16.msra.mxu0 %v6952_v6  ;;  %5371 = vmatpush1.bf16.msra.mxu1 %v6955_v7  ;;  %v7047_v6 = vld [vmem:[#allocation2 + $0x7c8] ss:$16 sps:$4 sm:$0xff]   ;;  %v7052_v7 = vld [vmem:[#allocation2 + $0x7e4] ss:$16 sps:$4 sm:$0xff]  }
  0xe4   :  { %4889 = vmatprep.subr.bf16.mxu0 %v6962_v8  ;;  %5381 = vmatprep.subr.bf16.mxu1 %v6965_v9  ;;  %v7055_v8 = vld [vmem:[#allocation2 + $0x7ec] ss:$16 sps:$4 sm:$0xff]   ;;  %v7050_v9 = vld [vmem:[#allocation2 + $0x7e0] ss:$16 sps:$4 sm:$0xff]  }
  0xe6   :  { %4881 = vmatmul.mubr.bf16.vlgmr.msra.gmra.mrb[0].mxu0 %v5778_v12  ;;  %5373 = vmatmul.mubr.bf16.vlgmr.msra.gmra.mrb[0].mxu1 %v5778_v12  ;;  %v7060_v12 = vld [vmem:[#allocation2 + $0x804] ss:$16 sps:$4 sm:$0xff]  }
  0xe7   :  { %4890 = vmatpush1.bf16.msra.mxu0 %v6960_v10  ;;  %5382 = vmatpush1.bf16.msra.mxu1 %v6963_v13  ;;  %v7053_v10 = vld [vmem:[#allocation2 + $0x7e8] ss:$16 sps:$4 sm:$0xff]   ;;  %v7063_v13 = vld [vmem:[#allocation2 + $0x80c] ss:$16 sps:$4 sm:$0xff]  }
  0xe8   :  { %4891 = vmatprep.subr.bf16.mxu0 %v6968_v15  ;;  %5383 = vmatprep.subr.bf16.mxu1 %v6971_v16  ;;  %v7058_v15 = vld [vmem:[#allocation2 + $0x800] ss:$16 sps:$4 sm:$0xff]   ;;  %v5780_v16 = vcombine.low %v7962_v14, %v7962_v14 }
  0xe9   :  { %4921 = vmatprep.mubr.bf16.mxu0 %v5781_v17  ;;  %5413 = vmatprep.mubr.bf16.mxu1 %v5781_v17  ;;  %v7971_v17 = vld [vmem:[%s8046_s0 + $0x20] sm:$0xff] }
  0xea   :  { %v7064_v14 = vld [vmem:[#allocation2 + $0x820] ss:$16 sps:$4 sm:$0xff]  }
  0xeb   :  { %4892 = vmatpush1.bf16.msra.mxu0 %v6966_v18  ;;  %5384 = vmatpush1.bf16.msra.mxu1 %v6969_v19  ;;  %v7061_v18 = vld [vmem:[#allocation2 + $0x808] ss:$16 sps:$4 sm:$0xff]   ;;  %v7066_v19 = vld [vmem:[#allocation2 + $0x824] ss:$16 sps:$4 sm:$0xff]  }
  0xec   :  { %4893 = vmatprep.subr.bf16.mxu0 %v6974_v11  ;;  %5385 = vmatprep.subr.bf16.mxu1 %v6977_v20  ;;  %v7069_v11 = vld [vmem:[#allocation2 + $0x82c] ss:$16 sps:$4 sm:$0xff]   ;;  %v5783_v20 = vcombine.high %v7971_v17, %v7971_v17 }
  0xef   :  { %4894 = vmatpush1.bf16.msra.mxu0 %v6972_v21  ;;  %5386 = vmatpush1.bf16.msra.mxu1 %v6975_v22  ;;  %v7067_v21 = vld [vmem:[#allocation2 + $0x828] ss:$16 sps:$4 sm:$0xff]   ;;  %v7072_v22 = vld [vmem:[#allocation2 + $0x844] ss:$16 sps:$4 sm:$0xff]  }
  0xf0   :  { %4895 = vmatprep.subr.bf16.mxu0 %v6980_v23  ;;  %5387 = vmatprep.subr.bf16.mxu1 %v6983_v24  ;;  %v7075_v23 = vld [vmem:[#allocation2 + $0x84c] ss:$16 sps:$4 sm:$0xff]   ;;  %v7070_v24 = vld [vmem:[#allocation2 + $0x840] ss:$16 sps:$4 sm:$0xff]  }
  0xf3   :  { %4896 = vmatpush1.bf16.msra.mxu0 %v6978_v25  ;;  %5388 = vmatpush1.bf16.msra.mxu1 %v6981_v26  ;;  %v7073_v25 = vld [vmem:[#allocation2 + $0x848] ss:$16 sps:$4 sm:$0xff]   ;;  %v7078_v26 = vld [vmem:[#allocation2 + $0x864] ss:$16 sps:$4 sm:$0xff]  }
  0xf4   :  { %4897 = vmatprep.subr.bf16.mxu0 %v6986_v27  ;;  %5389 = vmatprep.subr.bf16.mxu1 %v6989_v28  ;;  %v7081_v27 = vld [vmem:[#allocation2 + $0x86c] ss:$16 sps:$4 sm:$0xff]   ;;  %v7076_v28 = vld [vmem:[#allocation2 + $0x860] ss:$16 sps:$4 sm:$0xff]  }
  0xf7   :  { %4898 = vmatpush1.bf16.msra.mxu0 %v6984_v29  ;;  %5390 = vmatpush1.bf16.msra.mxu1 %v6987_v30  ;;  %v7079_v29 = vld [vmem:[#allocation2 + $0x868] ss:$16 sps:$4 sm:$0xff]   ;;  %v7084_v30 = vld [vmem:[#allocation2 + $0x884] ss:$16 sps:$4 sm:$0xff]  }
  0xf8   :  { %4899 = vmatprep.subr.bf16.mxu0 %v6992_v31  ;;  %5391 = vmatprep.subr.bf16.mxu1 %v6995_v32  ;;  %v7087_v31 = vld [vmem:[#allocation2 + $0x88c] ss:$16 sps:$4 sm:$0xff]   ;;  %v7082_v32 = vld [vmem:[#allocation2 + $0x880] ss:$16 sps:$4 sm:$0xff]  }
  0xfb   :  { %4900 = vmatpush1.bf16.msra.mxu0 %v6990_v33  ;;  %5392 = vmatpush1.bf16.msra.mxu1 %v6993_v34  ;;  %v7085_v33 = vld [vmem:[#allocation2 + $0x888] ss:$16 sps:$4 sm:$0xff]   ;;  %v7090_v34 = vld [vmem:[#allocation2 + $0x8a4] ss:$16 sps:$4 sm:$0xff]  }
  0xfc   :  { %4901 = vmatprep.subr.bf16.mxu0 %v6998_v35  ;;  %5393 = vmatprep.subr.bf16.mxu1 %v7001_v36  ;;  %v7093_v35 = vld [vmem:[#allocation2 + $0x8ac] ss:$16 sps:$4 sm:$0xff]   ;;  %v7088_v36 = vld [vmem:[#allocation2 + $0x8a0] ss:$16 sps:$4 sm:$0xff]  }
  0xff   :  { %4902 = vmatpush1.bf16.msra.mxu0 %v6996_v37  ;;  %5394 = vmatpush1.bf16.msra.mxu1 %v6999_v38  ;;  %v7091_v37 = vld [vmem:[#allocation2 + $0x8a8] ss:$16 sps:$4 sm:$0xff]   ;;  %v7096_v38 = vld [vmem:[#allocation2 + $0x8c4] ss:$16 sps:$4 sm:$0xff]  }
 0x100   :  { %4903 = vmatprep.subr.bf16.mxu0 %v7004_v39  ;;  %5395 = vmatprep.subr.bf16.mxu1 %v7007_v40  ;;  %v7099_v39 = vld [vmem:[#allocation2 + $0x8cc] ss:$16 sps:$4 sm:$0xff]   ;;  %v7094_v40 = vld [vmem:[#allocation2 + $0x8c0] ss:$16 sps:$4 sm:$0xff]  }
 0x103   :  { %4904 = vmatpush1.bf16.msra.mxu0 %v7002_v41  ;;  %5396 = vmatpush1.bf16.msra.mxu1 %v7005_v42  ;;  %v7097_v41 = vld [vmem:[#allocation2 + $0x8c8] ss:$16 sps:$4 sm:$0xff]   ;;  %v7102_v42 = vld [vmem:[#allocation2 + $0x8e4] ss:$16 sps:$4 sm:$0xff]  }
 0x104   :  { %4905 = vmatprep.subr.bf16.mxu0 %v7010_v43  ;;  %5397 = vmatprep.subr.bf16.mxu1 %v7013_v44  ;;  %v7105_v43 = vld [vmem:[#allocation2 + $0x8ec] ss:$16 sps:$4 sm:$0xff]   ;;  %v7100_v44 = vld [vmem:[#allocation2 + $0x8e0] ss:$16 sps:$4 sm:$0xff]  }
 0x107   :  { %4906 = vmatpush1.bf16.msra.mxu0 %v7008_v45  ;;  %5398 = vmatpush1.bf16.msra.mxu1 %v7011_v46  ;;  %v7103_v45 = vld [vmem:[#allocation2 + $0x8e8] ss:$16 sps:$4 sm:$0xff]   ;;  %v7108_v46 = vld [vmem:[#allocation2 + $0x904] ss:$16 sps:$4 sm:$0xff]  }
 0x108   :  { %4907 = vmatprep.subr.bf16.mxu0 %v7016_v47  ;;  %5399 = vmatprep.subr.bf16.mxu1 %v7019_v48  ;;  %v7111_v47 = vld [vmem:[#allocation2 + $0x90c] ss:$16 sps:$4 sm:$0xff]   ;;  %v7106_v48 = vld [vmem:[#allocation2 + $0x900] ss:$16 sps:$4 sm:$0xff]  }
 0x10b   :  { %4908 = vmatpush1.bf16.msra.mxu0 %v7014_v49  ;;  %5400 = vmatpush1.bf16.msra.mxu1 %v7017_v50  ;;  %v7109_v49 = vld [vmem:[#allocation2 + $0x908] ss:$16 sps:$4 sm:$0xff]   ;;  %v7114_v50 = vld [vmem:[#allocation2 + $0x924] ss:$16 sps:$4 sm:$0xff]  }
 0x10c   :  { %4909 = vmatprep.subr.bf16.mxu0 %v7022_v51  ;;  %5401 = vmatprep.subr.bf16.mxu1 %v7025_v52  ;;  %v7117_v51 = vld [vmem:[#allocation2 + $0x92c] ss:$16 sps:$4 sm:$0xff]   ;;  %v7112_v52 = vld [vmem:[#allocation2 + $0x920] ss:$16 sps:$4 sm:$0xff]  }
 0x10f   :  { %4910 = vmatpush1.bf16.msra.mxu0 %v7020_v53  ;;  %5402 = vmatpush1.bf16.msra.mxu1 %v7023_v54  ;;  %v7115_v53 = vld [vmem:[#allocation2 + $0x928] ss:$16 sps:$4 sm:$0xff]   ;;  %v7120_v54 = vld [vmem:[#allocation2 + $0x944] ss:$16 sps:$4 sm:$0xff]  }
 0x110   :  { %4911 = vmatprep.subr.bf16.mxu0 %v7028_v55  ;;  %5403 = vmatprep.subr.bf16.mxu1 %v7031_v56  ;;  %v7123_v55 = vld [vmem:[#allocation2 + $0x94c] ss:$16 sps:$4 sm:$0xff]   ;;  %v7118_v56 = vld [vmem:[#allocation2 + $0x940] ss:$16 sps:$4 sm:$0xff]  }
 0x113   :  { %4912 = vmatpush1.bf16.msra.mxu0 %v7026_v57  ;;  %5404 = vmatpush1.bf16.msra.mxu1 %v7029_v58  ;;  %v7121_v57 = vld [vmem:[#allocation2 + $0x948] ss:$16 sps:$4 sm:$0xff]   ;;  %v7126_v58 = vld [vmem:[#allocation2 + $0x964] ss:$16 sps:$4 sm:$0xff]  }
 0x114   :  { %4913 = vmatprep.subr.bf16.mxu0 %v7034_v59  ;;  %5405 = vmatprep.subr.bf16.mxu1 %v7037_v60  ;;  %v7129_v59 = vld [vmem:[#allocation2 + $0x96c] ss:$16 sps:$4 sm:$0xff]   ;;  %v7124_v60 = vld [vmem:[#allocation2 + $0x960] ss:$16 sps:$4 sm:$0xff]  }
 0x117   :  { %4914 = vmatpush1.bf16.msra.mxu0 %v7032_v61  ;;  %5406 = vmatpush1.bf16.msra.mxu1 %v7035_v62  ;;  %v7127_v61 = vld [vmem:[#allocation2 + $0x968] ss:$16 sps:$4 sm:$0xff]   ;;  %v7132_v62 = vld [vmem:[#allocation2 + $0x984] ss:$16 sps:$4 sm:$0xff]  }
 0x118   :  { %4915 = vmatprep.subr.bf16.mxu0 %v7040_v63  ;;  %5407 = vmatprep.subr.bf16.mxu1 %v7043_v0  ;;  %v7135_v63 = vld [vmem:[#allocation2 + $0x98c] ss:$16 sps:$4 sm:$0xff]   ;;  %v7130_v0 = vld [vmem:[#allocation2 + $0x980] ss:$16 sps:$4 sm:$0xff]  }
 0x11b   :  { %4916 = vmatpush1.bf16.msra.mxu0 %v7038_v1  ;;  %5408 = vmatpush1.bf16.msra.mxu1 %v7041_v2  ;;  %v7133_v1 = vld [vmem:[#allocation2 + $0x988] ss:$16 sps:$4 sm:$0xff]   ;;  %v7138_v2 = vld [vmem:[#allocation2 + $0x9a4] ss:$16 sps:$4 sm:$0xff]  }
 0x11c   :  { %4917 = vmatprep.subr.bf16.mxu0 %v7046_v3  ;;  %5409 = vmatprep.subr.bf16.mxu1 %v7049_v4  ;;  %v7141_v3 = vld [vmem:[#allocation2 + $0x9ac] ss:$16 sps:$4 sm:$0xff]   ;;  %v7136_v4 = vld [vmem:[#allocation2 + $0x9a0] ss:$16 sps:$4 sm:$0xff]  }
 0x11f   :  { %4918 = vmatpush1.bf16.msra.mxu0 %v7044_v5  ;;  %5410 = vmatpush1.bf16.msra.mxu1 %v7047_v6  ;;  %v7139_v5 = vld [vmem:[#allocation2 + $0x9a8] ss:$16 sps:$4 sm:$0xff]   ;;  %v7144_v6 = vld [vmem:[#allocation2 + $0x9c4] ss:$16 sps:$4 sm:$0xff]  }
 0x120   :  { %4919 = vmatprep.subr.bf16.mxu0 %v7052_v7  ;;  %5411 = vmatprep.subr.bf16.mxu1 %v7055_v8  ;;  %v7147_v7 = vld [vmem:[#allocation2 + $0x9cc] ss:$16 sps:$4 sm:$0xff]   ;;  %v7142_v8 = vld [vmem:[#allocation2 + $0x9c0] ss:$16 sps:$4 sm:$0xff]  }
 0x123   :  { %4920 = vmatpush1.bf16.msra.mxu0 %v7050_v9  ;;  %5412 = vmatpush1.bf16.msra.mxu1 %v7053_v10  ;;  %v7145_v9 = vld [vmem:[#allocation2 + $0x9c8] ss:$16 sps:$4 sm:$0xff]   ;;  %v7150_v10 = vld [vmem:[#allocation2 + $0x9e4] ss:$16 sps:$4 sm:$0xff]  }
 0x124   :  { %4930 = vmatprep.subr.bf16.mxu0 %v7060_v12  ;;  %5422 = vmatprep.subr.bf16.mxu1 %v7063_v13  ;;  %v7153_v12 = vld [vmem:[#allocation2 + $0x9ec] ss:$16 sps:$4 sm:$0xff]   ;;  %v7148_v13 = vld [vmem:[#allocation2 + $0x9e0] ss:$16 sps:$4 sm:$0xff]  }
 0x126   :  { %4922 = vmatmul.mubr.bf16.vlgmr.msra.gmra.mrb[0].mxu0 %v5780_v16  ;;  %5414 = vmatmul.mubr.bf16.vlgmr.msra.gmra.mrb[0].mxu1 %v5780_v16  ;;  %v7158_v16 = vld [vmem:[#allocation2 + $0xa04] ss:$16 sps:$4 sm:$0xff]  }
 0x127   :  { %4931 = vmatpush1.bf16.msra.mxu0 %v7058_v15  ;;  %5423 = vmatpush1.bf16.msra.mxu1 %v7061_v18  ;;  %v7151_v15 = vld [vmem:[#allocation2 + $0x9e8] ss:$16 sps:$4 sm:$0xff]   ;;  %v7161_v18 = vld [vmem:[#allocation2 + $0xa0c] ss:$16 sps:$4 sm:$0xff]  }
 0x128   :  { %4932 = vmatprep.subr.bf16.mxu0 %v7066_v19  ;;  %5424 = vmatprep.subr.bf16.mxu1 %v7069_v11  ;;  %v7978_v19 = vld [vmem:[%s8046_s0 + $0x28] sm:$0xff]  ;;  %v5782_v11 = vcombine.low %v7971_v17, %v7971_v17  ;;  %v7170_v17 = vld [vmem:[#allocation2 + $0xa44] ss:$16 sps:$4 sm:$0xff]  }
 0x129   :  { %4962 = vmatprep.mubr.bf16.mxu0 %v5783_v20  ;;  %5454 = vmatprep.mubr.bf16.mxu1 %v5783_v20  ;;  %v7156_v20 = vld [vmem:[#allocation2 + $0xa00] ss:$16 sps:$4 sm:$0xff]  }
 0x12b   :  { %4933 = vmatpush1.bf16.msra.mxu0 %v7064_v14  ;;  %5425 = vmatpush1.bf16.msra.mxu1 %v7067_v21  ;;  %v7159_v14 = vld [vmem:[#allocation2 + $0xa08] ss:$16 sps:$4 sm:$0xff]   ;;  %v7164_v21 = vld [vmem:[#allocation2 + $0xa24] ss:$16 sps:$4 sm:$0xff]  }
 0x12c   :  { %4934 = vmatprep.subr.bf16.mxu0 %v7072_v22  ;;  %5426 = vmatprep.subr.bf16.mxu1 %v7075_v23  ;;  %v7167_v22 = vld [vmem:[#allocation2 + $0xa2c] ss:$16 sps:$4 sm:$0xff]   ;;  %v5785_v23 = vcombine.high %v7978_v19, %v7978_v19 }
 0x12f   :  { %4935 = vmatpush1.bf16.msra.mxu0 %v7070_v24  ;;  %5427 = vmatpush1.bf16.msra.mxu1 %v7073_v25  ;;  %v7162_v24 = vld [vmem:[#allocation2 + $0xa20] ss:$16 sps:$4 sm:$0xff]   ;;  %v7165_v25 = vld [vmem:[#allocation2 + $0xa28] ss:$16 sps:$4 sm:$0xff]  }
 0x130   :  { %4936 = vmatprep.subr.bf16.mxu0 %v7078_v26  ;;  %5428 = vmatprep.subr.bf16.mxu1 %v7081_v27  ;;  %v7173_v26 = vld [vmem:[#allocation2 + $0xa4c] ss:$16 sps:$4 sm:$0xff]   ;;  %v7168_v27 = vld [vmem:[#allocation2 + $0xa40] ss:$16 sps:$4 sm:$0xff]  }
 0x133   :  { %4937 = vmatpush1.bf16.msra.mxu0 %v7076_v28  ;;  %5429 = vmatpush1.bf16.msra.mxu1 %v7079_v29  ;;  %v7171_v28 = vld [vmem:[#allocation2 + $0xa48] ss:$16 sps:$4 sm:$0xff]   ;;  %v7176_v29 = vld [vmem:[#allocation2 + $0xa64] ss:$16 sps:$4 sm:$0xff]  }
 0x134   :  { %4938 = vmatprep.subr.bf16.mxu0 %v7084_v30  ;;  %5430 = vmatprep.subr.bf16.mxu1 %v7087_v31  ;;  %v7179_v30 = vld [vmem:[#allocation2 + $0xa6c] ss:$16 sps:$4 sm:$0xff]   ;;  %v7174_v31 = vld [vmem:[#allocation2 + $0xa60] ss:$16 sps:$4 sm:$0xff]  }
 0x137   :  { %4939 = vmatpush1.bf16.msra.mxu0 %v7082_v32  ;;  %5431 = vmatpush1.bf16.msra.mxu1 %v7085_v33  ;;  %v7177_v32 = vld [vmem:[#allocation2 + $0xa68] ss:$16 sps:$4 sm:$0xff]   ;;  %v7182_v33 = vld [vmem:[#allocation2 + $0xa84] ss:$16 sps:$4 sm:$0xff]  }
 0x138   :  { %4940 = vmatprep.subr.bf16.mxu0 %v7090_v34  ;;  %5432 = vmatprep.subr.bf16.mxu1 %v7093_v35  ;;  %v7185_v34 = vld [vmem:[#allocation2 + $0xa8c] ss:$16 sps:$4 sm:$0xff]   ;;  %v7180_v35 = vld [vmem:[#allocation2 + $0xa80] ss:$16 sps:$4 sm:$0xff]  }
 0x13b   :  { %4941 = vmatpush1.bf16.msra.mxu0 %v7088_v36  ;;  %5433 = vmatpush1.bf16.msra.mxu1 %v7091_v37  ;;  %v7183_v36 = vld [vmem:[#allocation2 + $0xa88] ss:$16 sps:$4 sm:$0xff]   ;;  %v7188_v37 = vld [vmem:[#allocation2 + $0xaa4] ss:$16 sps:$4 sm:$0xff]  }
 0x13c   :  { %4942 = vmatprep.subr.bf16.mxu0 %v7096_v38  ;;  %5434 = vmatprep.subr.bf16.mxu1 %v7099_v39  ;;  %v7191_v38 = vld [vmem:[#allocation2 + $0xaac] ss:$16 sps:$4 sm:$0xff]   ;;  %v7186_v39 = vld [vmem:[#allocation2 + $0xaa0] ss:$16 sps:$4 sm:$0xff]  }
 0x13f   :  { %4943 = vmatpush1.bf16.msra.mxu0 %v7094_v40  ;;  %5435 = vmatpush1.bf16.msra.mxu1 %v7097_v41  ;;  %v7189_v40 = vld [vmem:[#allocation2 + $0xaa8] ss:$16 sps:$4 sm:$0xff]   ;;  %v7194_v41 = vld [vmem:[#allocation2 + $0xac4] ss:$16 sps:$4 sm:$0xff]  }
 0x140   :  { %4944 = vmatprep.subr.bf16.mxu0 %v7102_v42  ;;  %5436 = vmatprep.subr.bf16.mxu1 %v7105_v43  ;;  %v7197_v42 = vld [vmem:[#allocation2 + $0xacc] ss:$16 sps:$4 sm:$0xff]   ;;  %v7192_v43 = vld [vmem:[#allocation2 + $0xac0] ss:$16 sps:$4 sm:$0xff]  }
 0x143   :  { %4945 = vmatpush1.bf16.msra.mxu0 %v7100_v44  ;;  %5437 = vmatpush1.bf16.msra.mxu1 %v7103_v45  ;;  %v7195_v44 = vld [vmem:[#allocation2 + $0xac8] ss:$16 sps:$4 sm:$0xff]   ;;  %v7200_v45 = vld [vmem:[#allocation2 + $0xae4] ss:$16 sps:$4 sm:$0xff]  }
 0x144   :  { %4946 = vmatprep.subr.bf16.mxu0 %v7108_v46  ;;  %5438 = vmatprep.subr.bf16.mxu1 %v7111_v47  ;;  %v7203_v46 = vld [vmem:[#allocation2 + $0xaec] ss:$16 sps:$4 sm:$0xff]   ;;  %v7198_v47 = vld [vmem:[#allocation2 + $0xae0] ss:$16 sps:$4 sm:$0xff]  }
 0x147   :  { %4947 = vmatpush1.bf16.msra.mxu0 %v7106_v48  ;;  %5439 = vmatpush1.bf16.msra.mxu1 %v7109_v49  ;;  %v7201_v48 = vld [vmem:[#allocation2 + $0xae8] ss:$16 sps:$4 sm:$0xff]   ;;  %v7206_v49 = vld [vmem:[#allocation2 + $0xb04] ss:$16 sps:$4 sm:$0xff]  }
 0x148   :  { %4948 = vmatprep.subr.bf16.mxu0 %v7114_v50  ;;  %5440 = vmatprep.subr.bf16.mxu1 %v7117_v51  ;;  %v7209_v50 = vld [vmem:[#allocation2 + $0xb0c] ss:$16 sps:$4 sm:$0xff]   ;;  %v7204_v51 = vld [vmem:[#allocation2 + $0xb00] ss:$16 sps:$4 sm:$0xff]  }
 0x14b   :  { %4949 = vmatpush1.bf16.msra.mxu0 %v7112_v52  ;;  %5441 = vmatpush1.bf16.msra.mxu1 %v7115_v53  ;;  %v7207_v52 = vld [vmem:[#allocation2 + $0xb08] ss:$16 sps:$4 sm:$0xff]   ;;  %v7212_v53 = vld [vmem:[#allocation2 + $0xb24] ss:$16 sps:$4 sm:$0xff]  }
 0x14c   :  { %4950 = vmatprep.subr.bf16.mxu0 %v7120_v54  ;;  %5442 = vmatprep.subr.bf16.mxu1 %v7123_v55  ;;  %v7215_v54 = vld [vmem:[#allocation2 + $0xb2c] ss:$16 sps:$4 sm:$0xff]   ;;  %v7210_v55 = vld [vmem:[#allocation2 + $0xb20] ss:$16 sps:$4 sm:$0xff]  }
 0x14f   :  { %4951 = vmatpush1.bf16.msra.mxu0 %v7118_v56  ;;  %5443 = vmatpush1.bf16.msra.mxu1 %v7121_v57  ;;  %v7213_v56 = vld [vmem:[#allocation2 + $0xb28] ss:$16 sps:$4 sm:$0xff]   ;;  %v7218_v57 = vld [vmem:[#allocation2 + $0xb44] ss:$16 sps:$4 sm:$0xff]  }
 0x150   :  { %4952 = vmatprep.subr.bf16.mxu0 %v7126_v58  ;;  %5444 = vmatprep.subr.bf16.mxu1 %v7129_v59  ;;  %v7221_v58 = vld [vmem:[#allocation2 + $0xb4c] ss:$16 sps:$4 sm:$0xff]   ;;  %v7216_v59 = vld [vmem:[#allocation2 + $0xb40] ss:$16 sps:$4 sm:$0xff]  }
 0x153   :  { %4953 = vmatpush1.bf16.msra.mxu0 %v7124_v60  ;;  %5445 = vmatpush1.bf16.msra.mxu1 %v7127_v61  ;;  %v7219_v60 = vld [vmem:[#allocation2 + $0xb48] ss:$16 sps:$4 sm:$0xff]   ;;  %v7224_v61 = vld [vmem:[#allocation2 + $0xb64] ss:$16 sps:$4 sm:$0xff]  }
 0x154   :  { %4954 = vmatprep.subr.bf16.mxu0 %v7132_v62  ;;  %5446 = vmatprep.subr.bf16.mxu1 %v7135_v63  ;;  %v7227_v62 = vld [vmem:[#allocation2 + $0xb6c] ss:$16 sps:$4 sm:$0xff]   ;;  %v7222_v63 = vld [vmem:[#allocation2 + $0xb60] ss:$16 sps:$4 sm:$0xff]  }
 0x157   :  { %4955 = vmatpush1.bf16.msra.mxu0 %v7130_v0  ;;  %5447 = vmatpush1.bf16.msra.mxu1 %v7133_v1  ;;  %v7225_v0 = vld [vmem:[#allocation2 + $0xb68] ss:$16 sps:$4 sm:$0xff]   ;;  %v7230_v1 = vld [vmem:[#allocation2 + $0xb84] ss:$16 sps:$4 sm:$0xff]  }
 0x158   :  { %4956 = vmatprep.subr.bf16.mxu0 %v7138_v2  ;;  %5448 = vmatprep.subr.bf16.mxu1 %v7141_v3  ;;  %v7233_v2 = vld [vmem:[#allocation2 + $0xb8c] ss:$16 sps:$4 sm:$0xff]   ;;  %v7228_v3 = vld [vmem:[#allocation2 + $0xb80] ss:$16 sps:$4 sm:$0xff]  }
 0x15b   :  { %4957 = vmatpush1.bf16.msra.mxu0 %v7136_v4  ;;  %5449 = vmatpush1.bf16.msra.mxu1 %v7139_v5  ;;  %v7231_v4 = vld [vmem:[#allocation2 + $0xb88] ss:$16 sps:$4 sm:$0xff]   ;;  %v7236_v5 = vld [vmem:[#allocation2 + $0xba4] ss:$16 sps:$4 sm:$0xff]  }
 0x15c   :  { %4958 = vmatprep.subr.bf16.mxu0 %v7144_v6  ;;  %5450 = vmatprep.subr.bf16.mxu1 %v7147_v7  ;;  %v7239_v6 = vld [vmem:[#allocation2 + $0xbac] ss:$16 sps:$4 sm:$0xff]   ;;  %v7234_v7 = vld [vmem:[#allocation2 + $0xba0] ss:$16 sps:$4 sm:$0xff]  }
 0x15f   :  { %4959 = vmatpush1.bf16.msra.mxu0 %v7142_v8  ;;  %5451 = vmatpush1.bf16.msra.mxu1 %v7145_v9  ;;  %v7237_v8 = vld [vmem:[#allocation2 + $0xba8] ss:$16 sps:$4 sm:$0xff]   ;;  %v7242_v9 = vld [vmem:[#allocation2 + $0xbc4] ss:$16 sps:$4 sm:$0xff]  }
 0x160   :  { %4960 = vmatprep.subr.bf16.mxu0 %v7150_v10  ;;  %5452 = vmatprep.subr.bf16.mxu1 %v7153_v12  ;;  %v7245_v10 = vld [vmem:[#allocation2 + $0xbcc] ss:$16 sps:$4 sm:$0xff]   ;;  %v7240_v12 = vld [vmem:[#allocation2 + $0xbc0] ss:$16 sps:$4 sm:$0xff]  }
 0x163   :  { %4961 = vmatpush1.bf16.msra.mxu0 %v7148_v13  ;;  %5453 = vmatpush1.bf16.msra.mxu1 %v7151_v15  ;;  %v7243_v13 = vld [vmem:[#allocation2 + $0xbc8] ss:$16 sps:$4 sm:$0xff]   ;;  %v7248_v15 = vld [vmem:[#allocation2 + $0xbe4] ss:$16 sps:$4 sm:$0xff]  }
 0x164   :  { %4971 = vmatprep.subr.bf16.mxu0 %v7158_v16  ;;  %5463 = vmatprep.subr.bf16.mxu1 %v7161_v18  ;;  %v7251_v16 = vld [vmem:[#allocation2 + $0xbec] ss:$16 sps:$4 sm:$0xff]   ;;  %v7246_v18 = vld [vmem:[#allocation2 + $0xbe0] ss:$16 sps:$4 sm:$0xff]  }
 0x166   :  { %4963 = vmatmul.mubr.bf16.vlgmr.msra.gmra.mrb[0].mxu0 %v5782_v11  ;;  %5455 = vmatmul.mubr.bf16.vlgmr.msra.gmra.mrb[0].mxu1 %v5782_v11  ;;  %v7249_v11 = vld [vmem:[#allocation2 + $0xbe8] ss:$16 sps:$4 sm:$0xff]  }
 0x167   :  { %4972 = vmatpush1.bf16.msra.mxu0 %v7156_v20  ;;  %5464 = vmatpush1.bf16.msra.mxu1 %v7159_v14  ;;  %v7256_v20 = vld [vmem:[#allocation2 + $0xc04] ss:$16 sps:$4 sm:$0xff]   ;;  %v7259_v14 = vld [vmem:[#allocation2 + $0xc0c] ss:$16 sps:$4 sm:$0xff]  }
 0x168   :  { %4973 = vmatprep.subr.bf16.mxu0 %v7164_v21  ;;  %5465 = vmatprep.subr.bf16.mxu1 %v7167_v22  ;;  %v7987_v21 = vld [vmem:[%s8046_s0 + $0x30] sm:$0xff]  ;;  %v5784_v22 = vcombine.low %v7978_v19, %v7978_v19 }
 0x169   :  { %5003 = vmatprep.mubr.bf16.mxu0 %v5785_v23  ;;  %5495 = vmatprep.mubr.bf16.mxu1 %v5785_v23  ;;  %v7254_v23 = vld [vmem:[#allocation2 + $0xc00] ss:$16 sps:$4 sm:$0xff]   ;;  %v7268_v19 = vld [vmem:[#allocation2 + $0xc44] ss:$16 sps:$4 sm:$0xff]  }
 0x16b   :  { %4974 = vmatpush1.bf16.msra.mxu0 %v7162_v24  ;;  %5466 = vmatpush1.bf16.msra.mxu1 %v7165_v25  ;;  %v7257_v24 = vld [vmem:[#allocation2 + $0xc08] ss:$16 sps:$4 sm:$0xff]   ;;  %v7262_v25 = vld [vmem:[#allocation2 + $0xc24] ss:$16 sps:$4 sm:$0xff]  }
 0x16c   :  { %4975 = vmatprep.subr.bf16.mxu0 %v7170_v17  ;;  %5467 = vmatprep.subr.bf16.mxu1 %v7173_v26  ;;  %v7265_v17 = vld [vmem:[#allocation2 + $0xc2c] ss:$16 sps:$4 sm:$0xff]   ;;  %v5787_v26 = vcombine.high %v7987_v21, %v7987_v21 }
 0x16f   :  { %4976 = vmatpush1.bf16.msra.mxu0 %v7168_v27  ;;  %5468 = vmatpush1.bf16.msra.mxu1 %v7171_v28  ;;  %v7260_v27 = vld [vmem:[#allocation2 + $0xc20] ss:$16 sps:$4 sm:$0xff]   ;;  %v7263_v28 = vld [vmem:[#allocation2 + $0xc28] ss:$16 sps:$4 sm:$0xff]  }
 0x170   :  { %4977 = vmatprep.subr.bf16.mxu0 %v7176_v29  ;;  %5469 = vmatprep.subr.bf16.mxu1 %v7179_v30  ;;  %v7271_v29 = vld [vmem:[#allocation2 + $0xc4c] ss:$16 sps:$4 sm:$0xff]   ;;  %v7266_v30 = vld [vmem:[#allocation2 + $0xc40] ss:$16 sps:$4 sm:$0xff]  }
 0x173   :  { %4978 = vmatpush1.bf16.msra.mxu0 %v7174_v31  ;;  %5470 = vmatpush1.bf16.msra.mxu1 %v7177_v32  ;;  %v7269_v31 = vld [vmem:[#allocation2 + $0xc48] ss:$16 sps:$4 sm:$0xff]   ;;  %v7274_v32 = vld [vmem:[#allocation2 + $0xc64] ss:$16 sps:$4 sm:$0xff]  }
 0x174   :  { %4979 = vmatprep.subr.bf16.mxu0 %v7182_v33  ;;  %5471 = vmatprep.subr.bf16.mxu1 %v7185_v34  ;;  %v7277_v33 = vld [vmem:[#allocation2 + $0xc6c] ss:$16 sps:$4 sm:$0xff]   ;;  %v7272_v34 = vld [vmem:[#allocation2 + $0xc60] ss:$16 sps:$4 sm:$0xff]  }
 0x177   :  { %4980 = vmatpush1.bf16.msra.mxu0 %v7180_v35  ;;  %5472 = vmatpush1.bf16.msra.mxu1 %v7183_v36  ;;  %v7275_v35 = vld [vmem:[#allocation2 + $0xc68] ss:$16 sps:$4 sm:$0xff]   ;;  %v7280_v36 = vld [vmem:[#allocation2 + $0xc84] ss:$16 sps:$4 sm:$0xff]  }
 0x178   :  { %4981 = vmatprep.subr.bf16.mxu0 %v7188_v37  ;;  %5473 = vmatprep.subr.bf16.mxu1 %v7191_v38  ;;  %v7283_v37 = vld [vmem:[#allocation2 + $0xc8c] ss:$16 sps:$4 sm:$0xff]   ;;  %v7278_v38 = vld [vmem:[#allocation2 + $0xc80] ss:$16 sps:$4 sm:$0xff]  }
 0x17b   :  { %4982 = vmatpush1.bf16.msra.mxu0 %v7186_v39  ;;  %5474 = vmatpush1.bf16.msra.mxu1 %v7189_v40  ;;  %v7281_v39 = vld [vmem:[#allocation2 + $0xc88] ss:$16 sps:$4 sm:$0xff]   ;;  %v7286_v40 = vld [vmem:[#allocation2 + $0xca4] ss:$16 sps:$4 sm:$0xff]  }
 0x17c   :  { %4983 = vmatprep.subr.bf16.mxu0 %v7194_v41  ;;  %5475 = vmatprep.subr.bf16.mxu1 %v7197_v42  ;;  %v7289_v41 = vld [vmem:[#allocation2 + $0xcac] ss:$16 sps:$4 sm:$0xff]   ;;  %v7284_v42 = vld [vmem:[#allocation2 + $0xca0] ss:$16 sps:$4 sm:$0xff]  }
 0x17f   :  { %4984 = vmatpush1.bf16.msra.mxu0 %v7192_v43  ;;  %5476 = vmatpush1.bf16.msra.mxu1 %v7195_v44  ;;  %v7287_v43 = vld [vmem:[#allocation2 + $0xca8] ss:$16 sps:$4 sm:$0xff]   ;;  %v7292_v44 = vld [vmem:[#allocation2 + $0xcc4] ss:$16 sps:$4 sm:$0xff]  }
 0x180   :  { %4985 = vmatprep.subr.bf16.mxu0 %v7200_v45  ;;  %5477 = vmatprep.subr.bf16.mxu1 %v7203_v46  ;;  %v7295_v45 = vld [vmem:[#allocation2 + $0xccc] ss:$16 sps:$4 sm:$0xff]   ;;  %v7290_v46 = vld [vmem:[#allocation2 + $0xcc0] ss:$16 sps:$4 sm:$0xff]  }
 0x183   :  { %4986 = vmatpush1.bf16.msra.mxu0 %v7198_v47  ;;  %5478 = vmatpush1.bf16.msra.mxu1 %v7201_v48  ;;  %v7293_v47 = vld [vmem:[#allocation2 + $0xcc8] ss:$16 sps:$4 sm:$0xff]   ;;  %v7298_v48 = vld [vmem:[#allocation2 + $0xce4] ss:$16 sps:$4 sm:$0xff]  }
 0x184   :  { %4987 = vmatprep.subr.bf16.mxu0 %v7206_v49  ;;  %5479 = vmatprep.subr.bf16.mxu1 %v7209_v50  ;;  %v7301_v49 = vld [vmem:[#allocation2 + $0xcec] ss:$16 sps:$4 sm:$0xff]   ;;  %v7296_v50 = vld [vmem:[#allocation2 + $0xce0] ss:$16 sps:$4 sm:$0xff]  }
 0x187   :  { %4988 = vmatpush1.bf16.msra.mxu0 %v7204_v51  ;;  %5480 = vmatpush1.bf16.msra.mxu1 %v7207_v52  ;;  %v7299_v51 = vld [vmem:[#allocation2 + $0xce8] ss:$16 sps:$4 sm:$0xff]   ;;  %v7304_v52 = vld [vmem:[#allocation2 + $0xd04] ss:$16 sps:$4 sm:$0xff]  }
 0x188   :  { %4989 = vmatprep.subr.bf16.mxu0 %v7212_v53  ;;  %5481 = vmatprep.subr.bf16.mxu1 %v7215_v54  ;;  %v7307_v53 = vld [vmem:[#allocation2 + $0xd0c] ss:$16 sps:$4 sm:$0xff]   ;;  %v7302_v54 = vld [vmem:[#allocation2 + $0xd00] ss:$16 sps:$4 sm:$0xff]  }
 0x18b   :  { %4990 = vmatpush1.bf16.msra.mxu0 %v7210_v55  ;;  %5482 = vmatpush1.bf16.msra.mxu1 %v7213_v56  ;;  %v7305_v55 = vld [vmem:[#allocation2 + $0xd08] ss:$16 sps:$4 sm:$0xff]   ;;  %v7310_v56 = vld [vmem:[#allocation2 + $0xd24] ss:$16 sps:$4 sm:$0xff]  }
 0x18c   :  { %4991 = vmatprep.subr.bf16.mxu0 %v7218_v57  ;;  %5483 = vmatprep.subr.bf16.mxu1 %v7221_v58  ;;  %v7313_v57 = vld [vmem:[#allocation2 + $0xd2c] ss:$16 sps:$4 sm:$0xff]   ;;  %v7308_v58 = vld [vmem:[#allocation2 + $0xd20] ss:$16 sps:$4 sm:$0xff]  }
 0x18f   :  { %4992 = vmatpush1.bf16.msra.mxu0 %v7216_v59  ;;  %5484 = vmatpush1.bf16.msra.mxu1 %v7219_v60  ;;  %v7311_v59 = vld [vmem:[#allocation2 + $0xd28] ss:$16 sps:$4 sm:$0xff]   ;;  %v7316_v60 = vld [vmem:[#allocation2 + $0xd44] ss:$16 sps:$4 sm:$0xff]  }
 0x190   :  { %4993 = vmatprep.subr.bf16.mxu0 %v7224_v61  ;;  %5485 = vmatprep.subr.bf16.mxu1 %v7227_v62  ;;  %v7319_v61 = vld [vmem:[#allocation2 + $0xd4c] ss:$16 sps:$4 sm:$0xff]   ;;  %v7314_v62 = vld [vmem:[#allocation2 + $0xd40] ss:$16 sps:$4 sm:$0xff]  }
 0x193   :  { %4994 = vmatpush1.bf16.msra.mxu0 %v7222_v63  ;;  %5486 = vmatpush1.bf16.msra.mxu1 %v7225_v0  ;;  %v7317_v63 = vld [vmem:[#allocation2 + $0xd48] ss:$16 sps:$4 sm:$0xff]   ;;  %v7322_v0 = vld [vmem:[#allocation2 + $0xd64] ss:$16 sps:$4 sm:$0xff]  }
 0x194   :  { %4995 = vmatprep.subr.bf16.mxu0 %v7230_v1  ;;  %5487 = vmatprep.subr.bf16.mxu1 %v7233_v2  ;;  %v7325_v1 = vld [vmem:[#allocation2 + $0xd6c] ss:$16 sps:$4 sm:$0xff]   ;;  %v7320_v2 = vld [vmem:[#allocation2 + $0xd60] ss:$16 sps:$4 sm:$0xff]  }
 0x197   :  { %4996 = vmatpush1.bf16.msra.mxu0 %v7228_v3  ;;  %5488 = vmatpush1.bf16.msra.mxu1 %v7231_v4  ;;  %v7323_v3 = vld [vmem:[#allocation2 + $0xd68] ss:$16 sps:$4 sm:$0xff]   ;;  %v7328_v4 = vld [vmem:[#allocation2 + $0xd84] ss:$16 sps:$4 sm:$0xff]  }
 0x198   :  { %4997 = vmatprep.subr.bf16.mxu0 %v7236_v5  ;;  %5489 = vmatprep.subr.bf16.mxu1 %v7239_v6  ;;  %v7331_v5 = vld [vmem:[#allocation2 + $0xd8c] ss:$16 sps:$4 sm:$0xff]   ;;  %v7326_v6 = vld [vmem:[#allocation2 + $0xd80] ss:$16 sps:$4 sm:$0xff]  }
 0x19b   :  { %4998 = vmatpush1.bf16.msra.mxu0 %v7234_v7  ;;  %5490 = vmatpush1.bf16.msra.mxu1 %v7237_v8  ;;  %v7329_v7 = vld [vmem:[#allocation2 + $0xd88] ss:$16 sps:$4 sm:$0xff]   ;;  %v7334_v8 = vld [vmem:[#allocation2 + $0xda4] ss:$16 sps:$4 sm:$0xff]  }
 0x19c   :  { %4999 = vmatprep.subr.bf16.mxu0 %v7242_v9  ;;  %5491 = vmatprep.subr.bf16.mxu1 %v7245_v10  ;;  %v7337_v9 = vld [vmem:[#allocation2 + $0xdac] ss:$16 sps:$4 sm:$0xff]   ;;  %v7332_v10 = vld [vmem:[#allocation2 + $0xda0] ss:$16 sps:$4 sm:$0xff]  }
 0x19f   :  { %5000 = vmatpush1.bf16.msra.mxu0 %v7240_v12  ;;  %5492 = vmatpush1.bf16.msra.mxu1 %v7243_v13  ;;  %v7335_v12 = vld [vmem:[#allocation2 + $0xda8] ss:$16 sps:$4 sm:$0xff]   ;;  %v7340_v13 = vld [vmem:[#allocation2 + $0xdc4] ss:$16 sps:$4 sm:$0xff]  }
 0x1a0   :  { %5001 = vmatprep.subr.bf16.mxu0 %v7248_v15  ;;  %5493 = vmatprep.subr.bf16.mxu1 %v7251_v16  ;;  %v7343_v15 = vld [vmem:[#allocation2 + $0xdcc] ss:$16 sps:$4 sm:$0xff]   ;;  %v7338_v16 = vld [vmem:[#allocation2 + $0xdc0] ss:$16 sps:$4 sm:$0xff]  }
 0x1a3   :  { %5002 = vmatpush1.bf16.msra.mxu0 %v7246_v18  ;;  %5494 = vmatpush1.bf16.msra.mxu1 %v7249_v11  ;;  %v7341_v18 = vld [vmem:[#allocation2 + $0xdc8] ss:$16 sps:$4 sm:$0xff]   ;;  %v7346_v11 = vld [vmem:[#allocation2 + $0xde4] ss:$16 sps:$4 sm:$0xff]  }
 0x1a4   :  { %5012 = vmatprep.subr.bf16.mxu0 %v7256_v20  ;;  %5504 = vmatprep.subr.bf16.mxu1 %v7259_v14  ;;  %v7349_v20 = vld [vmem:[#allocation2 + $0xdec] ss:$16 sps:$4 sm:$0xff]   ;;  %v7344_v14 = vld [vmem:[#allocation2 + $0xde0] ss:$16 sps:$4 sm:$0xff]  }
 0x1a6   :  { %5004 = vmatmul.mubr.bf16.vlgmr.msra.gmra.mrb[0].mxu0 %v5784_v22  ;;  %5496 = vmatmul.mubr.bf16.vlgmr.msra.gmra.mrb[0].mxu1 %v5784_v22  ;;  %v7347_v22 = vld [vmem:[#allocation2 + $0xde8] ss:$16 sps:$4 sm:$0xff]  }
 0x1a7   :  { %5013 = vmatpush1.bf16.msra.mxu0 %v7254_v23  ;;  %5505 = vmatpush1.bf16.msra.mxu1 %v7257_v24  ;;  %v7354_v23 = vld [vmem:[#allocation2 + $0xe04] ss:$16 sps:$4 sm:$0xff]   ;;  %v7357_v24 = vld [vmem:[#allocation2 + $0xe0c] ss:$16 sps:$4 sm:$0xff]  }
 0x1a8   :  { %5014 = vmatprep.subr.bf16.mxu0 %v7262_v25  ;;  %5506 = vmatprep.subr.bf16.mxu1 %v7265_v17  ;;  %v7996_v25 = vld [vmem:[%s8046_s0 + $0x38] sm:$0xff]  ;;  %v5786_v17 = vcombine.low %v7987_v21, %v7987_v21  ;;  %v7366_v21 = vld [vmem:[#allocation2 + $0xe44] ss:$16 sps:$4 sm:$0xff]  }
 0x1a9   :  { %5044 = vmatprep.mubr.bf16.mxu0 %v5787_v26  ;;  %5536 = vmatprep.mubr.bf16.mxu1 %v5787_v26  ;;  %v7352_v26 = vld [vmem:[#allocation2 + $0xe00] ss:$16 sps:$4 sm:$0xff]  }
 0x1ab   :  { %5015 = vmatpush1.bf16.msra.mxu0 %v7260_v27  ;;  %5507 = vmatpush1.bf16.msra.mxu1 %v7263_v28  ;;  %v7355_v27 = vld [vmem:[#allocation2 + $0xe08] ss:$16 sps:$4 sm:$0xff]   ;;  %v7360_v28 = vld [vmem:[#allocation2 + $0xe24] ss:$16 sps:$4 sm:$0xff]  }
 0x1ac   :  { %5016 = vmatprep.subr.bf16.mxu0 %v7268_v19  ;;  %5508 = vmatprep.subr.bf16.mxu1 %v7271_v29  ;;  %v7363_v19 = vld [vmem:[#allocation2 + $0xe2c] ss:$16 sps:$4 sm:$0xff]   ;;  %v5789_v29 = vcombine.high %v7996_v25, %v7996_v25 }
 0x1af   :  { %5017 = vmatpush1.bf16.msra.mxu0 %v7266_v30  ;;  %5509 = vmatpush1.bf16.msra.mxu1 %v7269_v31  ;;  %v7358_v30 = vld [vmem:[#allocation2 + $0xe20] ss:$16 sps:$4 sm:$0xff]   ;;  %v7361_v31 = vld [vmem:[#allocation2 + $0xe28] ss:$16 sps:$4 sm:$0xff]  }
 0x1b0   :  { %5018 = vmatprep.subr.bf16.mxu0 %v7274_v32  ;;  %5510 = vmatprep.subr.bf16.mxu1 %v7277_v33  ;;  %v7369_v32 = vld [vmem:[#allocation2 + $0xe4c] ss:$16 sps:$4 sm:$0xff]   ;;  %v7364_v33 = vld [vmem:[#allocation2 + $0xe40] ss:$16 sps:$4 sm:$0xff]  }
 0x1b3   :  { %5019 = vmatpush1.bf16.msra.mxu0 %v7272_v34  ;;  %5511 = vmatpush1.bf16.msra.mxu1 %v7275_v35  ;;  %v7367_v34 = vld [vmem:[#allocation2 + $0xe48] ss:$16 sps:$4 sm:$0xff]   ;;  %v7372_v35 = vld [vmem:[#allocation2 + $0xe64] ss:$16 sps:$4 sm:$0xff]  }
 0x1b4   :  { %5020 = vmatprep.subr.bf16.mxu0 %v7280_v36  ;;  %5512 = vmatprep.subr.bf16.mxu1 %v7283_v37  ;;  %v7375_v36 = vld [vmem:[#allocation2 + $0xe6c] ss:$16 sps:$4 sm:$0xff]   ;;  %v7370_v37 = vld [vmem:[#allocation2 + $0xe60] ss:$16 sps:$4 sm:$0xff]  }
 0x1b7   :  { %5021 = vmatpush1.bf16.msra.mxu0 %v7278_v38  ;;  %5513 = vmatpush1.bf16.msra.mxu1 %v7281_v39  ;;  %v7373_v38 = vld [vmem:[#allocation2 + $0xe68] ss:$16 sps:$4 sm:$0xff]   ;;  %v7378_v39 = vld [vmem:[#allocation2 + $0xe84] ss:$16 sps:$4 sm:$0xff]  }
 0x1b8   :  { %5022 = vmatprep.subr.bf16.mxu0 %v7286_v40  ;;  %5514 = vmatprep.subr.bf16.mxu1 %v7289_v41  ;;  %v7381_v40 = vld [vmem:[#allocation2 + $0xe8c] ss:$16 sps:$4 sm:$0xff]   ;;  %v7376_v41 = vld [vmem:[#allocation2 + $0xe80] ss:$16 sps:$4 sm:$0xff]  }
 0x1bb   :  { %5023 = vmatpush1.bf16.msra.mxu0 %v7284_v42  ;;  %5515 = vmatpush1.bf16.msra.mxu1 %v7287_v43  ;;  %v7379_v42 = vld [vmem:[#allocation2 + $0xe88] ss:$16 sps:$4 sm:$0xff]   ;;  %v7384_v43 = vld [vmem:[#allocation2 + $0xea4] ss:$16 sps:$4 sm:$0xff]  }
 0x1bc   :  { %5024 = vmatprep.subr.bf16.mxu0 %v7292_v44  ;;  %5516 = vmatprep.subr.bf16.mxu1 %v7295_v45  ;;  %v7387_v44 = vld [vmem:[#allocation2 + $0xeac] ss:$16 sps:$4 sm:$0xff]   ;;  %v7382_v45 = vld [vmem:[#allocation2 + $0xea0] ss:$16 sps:$4 sm:$0xff]  }
 0x1bf   :  { %5025 = vmatpush1.bf16.msra.mxu0 %v7290_v46  ;;  %5517 = vmatpush1.bf16.msra.mxu1 %v7293_v47  ;;  %v7385_v46 = vld [vmem:[#allocation2 + $0xea8] ss:$16 sps:$4 sm:$0xff]   ;;  %v7390_v47 = vld [vmem:[#allocation2 + $0xec4] ss:$16 sps:$4 sm:$0xff]  }
 0x1c0   :  { %5026 = vmatprep.subr.bf16.mxu0 %v7298_v48  ;;  %5518 = vmatprep.subr.bf16.mxu1 %v7301_v49  ;;  %v7393_v48 = vld [vmem:[#allocation2 + $0xecc] ss:$16 sps:$4 sm:$0xff]   ;;  %v7388_v49 = vld [vmem:[#allocation2 + $0xec0] ss:$16 sps:$4 sm:$0xff]  }
 0x1c3   :  { %5027 = vmatpush1.bf16.msra.mxu0 %v7296_v50  ;;  %5519 = vmatpush1.bf16.msra.mxu1 %v7299_v51  ;;  %v7391_v50 = vld [vmem:[#allocation2 + $0xec8] ss:$16 sps:$4 sm:$0xff]   ;;  %v7396_v51 = vld [vmem:[#allocation2 + $0xee4] ss:$16 sps:$4 sm:$0xff]  }
 0x1c4   :  { %5028 = vmatprep.subr.bf16.mxu0 %v7304_v52  ;;  %5520 = vmatprep.subr.bf16.mxu1 %v7307_v53  ;;  %v7399_v52 = vld [vmem:[#allocation2 + $0xeec] ss:$16 sps:$4 sm:$0xff]   ;;  %v7394_v53 = vld [vmem:[#allocation2 + $0xee0] ss:$16 sps:$4 sm:$0xff]  }
 0x1c7   :  { %5029 = vmatpush1.bf16.msra.mxu0 %v7302_v54  ;;  %5521 = vmatpush1.bf16.msra.mxu1 %v7305_v55  ;;  %v7397_v54 = vld [vmem:[#allocation2 + $0xee8] ss:$16 sps:$4 sm:$0xff]   ;;  %v7402_v55 = vld [vmem:[#allocation2 + $0xf04] ss:$16 sps:$4 sm:$0xff]  }
 0x1c8   :  { %5030 = vmatprep.subr.bf16.mxu0 %v7310_v56  ;;  %5522 = vmatprep.subr.bf16.mxu1 %v7313_v57  ;;  %v7405_v56 = vld [vmem:[#allocation2 + $0xf0c] ss:$16 sps:$4 sm:$0xff]   ;;  %v7400_v57 = vld [vmem:[#allocation2 + $0xf00] ss:$16 sps:$4 sm:$0xff]  }
 0x1cb   :  { %5031 = vmatpush1.bf16.msra.mxu0 %v7308_v58  ;;  %5523 = vmatpush1.bf16.msra.mxu1 %v7311_v59  ;;  %v7403_v58 = vld [vmem:[#allocation2 + $0xf08] ss:$16 sps:$4 sm:$0xff]   ;;  %v7408_v59 = vld [vmem:[#allocation2 + $0xf24] ss:$16 sps:$4 sm:$0xff]  }
 0x1cc   :  { %5032 = vmatprep.subr.bf16.mxu0 %v7316_v60  ;;  %5524 = vmatprep.subr.bf16.mxu1 %v7319_v61  ;;  %v7411_v60 = vld [vmem:[#allocation2 + $0xf2c] ss:$16 sps:$4 sm:$0xff]   ;;  %v7406_v61 = vld [vmem:[#allocation2 + $0xf20] ss:$16 sps:$4 sm:$0xff]  }
 0x1cf   :  { %5033 = vmatpush1.bf16.msra.mxu0 %v7314_v62  ;;  %5525 = vmatpush1.bf16.msra.mxu1 %v7317_v63  ;;  %v7409_v62 = vld [vmem:[#allocation2 + $0xf28] ss:$16 sps:$4 sm:$0xff]   ;;  %v7414_v63 = vld [vmem:[#allocation2 + $0xf44] ss:$16 sps:$4 sm:$0xff]  }
 0x1d0   :  { %5034 = vmatprep.subr.bf16.mxu0 %v7322_v0  ;;  %5526 = vmatprep.subr.bf16.mxu1 %v7325_v1  ;;  %v7417_v0 = vld [vmem:[#allocation2 + $0xf4c] ss:$16 sps:$4 sm:$0xff]   ;;  %v7412_v1 = vld [vmem:[#allocation2 + $0xf40] ss:$16 sps:$4 sm:$0xff]  }
 0x1d3   :  { %5035 = vmatpush1.bf16.msra.mxu0 %v7320_v2  ;;  %5527 = vmatpush1.bf16.msra.mxu1 %v7323_v3  ;;  %v7415_v2 = vld [vmem:[#allocation2 + $0xf48] ss:$16 sps:$4 sm:$0xff]   ;;  %v7420_v3 = vld [vmem:[#allocation2 + $0xf64] ss:$16 sps:$4 sm:$0xff]  }
 0x1d4   :  { %5036 = vmatprep.subr.bf16.mxu0 %v7328_v4  ;;  %5528 = vmatprep.subr.bf16.mxu1 %v7331_v5  ;;  %v7423_v4 = vld [vmem:[#allocation2 + $0xf6c] ss:$16 sps:$4 sm:$0xff]   ;;  %v7418_v5 = vld [vmem:[#allocation2 + $0xf60] ss:$16 sps:$4 sm:$0xff]  }
 0x1d7   :  { %5037 = vmatpush1.bf16.msra.mxu0 %v7326_v6  ;;  %5529 = vmatpush1.bf16.msra.mxu1 %v7329_v7  ;;  %v7421_v6 = vld [vmem:[#allocation2 + $0xf68] ss:$16 sps:$4 sm:$0xff]   ;;  %v7426_v7 = vld [vmem:[#allocation2 + $0xf84] ss:$16 sps:$4 sm:$0xff]  }
 0x1d8   :  { %5038 = vmatprep.subr.bf16.mxu0 %v7334_v8  ;;  %5530 = vmatprep.subr.bf16.mxu1 %v7337_v9  ;;  %v7429_v8 = vld [vmem:[#allocation2 + $0xf8c] ss:$16 sps:$4 sm:$0xff]   ;;  %v7424_v9 = vld [vmem:[#allocation2 + $0xf80] ss:$16 sps:$4 sm:$0xff]  }
 0x1db   :  { %5039 = vmatpush1.bf16.msra.mxu0 %v7332_v10  ;;  %5531 = vmatpush1.bf16.msra.mxu1 %v7335_v12  ;;  %v7427_v10 = vld [vmem:[#allocation2 + $0xf88] ss:$16 sps:$4 sm:$0xff]   ;;  %v7432_v12 = vld [vmem:[#allocation2 + $0xfa4] ss:$16 sps:$4 sm:$0xff]  }
 0x1dc   :  { %5040 = vmatprep.subr.bf16.mxu0 %v7340_v13  ;;  %5532 = vmatprep.subr.bf16.mxu1 %v7343_v15  ;;  %v7435_v13 = vld [vmem:[#allocation2 + $0xfac] ss:$16 sps:$4 sm:$0xff]   ;;  %v7430_v15 = vld [vmem:[#allocation2 + $0xfa0] ss:$16 sps:$4 sm:$0xff]  }
 0x1df   :  { %5041 = vmatpush1.bf16.msra.mxu0 %v7338_v16  ;;  %5533 = vmatpush1.bf16.msra.mxu1 %v7341_v18  ;;  %v7433_v16 = vld [vmem:[#allocation2 + $0xfa8] ss:$16 sps:$4 sm:$0xff]   ;;  %v7438_v18 = vld [vmem:[#allocation2 + $0xfc4] ss:$16 sps:$4 sm:$0xff]  }
 0x1e0   :  { %5042 = vmatprep.subr.bf16.mxu0 %v7346_v11  ;;  %5534 = vmatprep.subr.bf16.mxu1 %v7349_v20  ;;  %v7441_v11 = vld [vmem:[#allocation2 + $0xfcc] ss:$16 sps:$4 sm:$0xff]   ;;  %v7436_v20 = vld [vmem:[#allocation2 + $0xfc0] ss:$16 sps:$4 sm:$0xff]  }
 0x1e3   :  { %5043 = vmatpush1.bf16.msra.mxu0 %v7344_v14  ;;  %5535 = vmatpush1.bf16.msra.mxu1 %v7347_v22  ;;  %v7439_v14 = vld [vmem:[#allocation2 + $0xfc8] ss:$16 sps:$4 sm:$0xff]   ;;  %v7444_v22 = vld [vmem:[#allocation2 + $0xfe4] ss:$16 sps:$4 sm:$0xff]  }
 0x1e4   :  { %5053 = vmatprep.subr.bf16.mxu0 %v7354_v23  ;;  %5545 = vmatprep.subr.bf16.mxu1 %v7357_v24  ;;  %v7447_v23 = vld [vmem:[#allocation2 + $0xfec] ss:$16 sps:$4 sm:$0xff]   ;;  %v7442_v24 = vld [vmem:[#allocation2 + $0xfe0] ss:$16 sps:$4 sm:$0xff]  }
 0x1e6   :  { %5045 = vmatmul.mubr.bf16.vlgmr.msra.gmra.mrb[0].mxu0 %v5786_v17  ;;  %5537 = vmatmul.mubr.bf16.vlgmr.msra.gmra.mrb[0].mxu1 %v5786_v17  ;;  %v7445_v17 = vld [vmem:[#allocation2 + $0xfe8] ss:$16 sps:$4 sm:$0xff]  }
 0x1e7   :  { %5054 = vmatpush1.bf16.msra.mxu0 %v7352_v26  ;;  %5546 = vmatpush1.bf16.msra.mxu1 %v7355_v27  ;;  %v7452_v26 = vld [vmem:[#allocation2 + $0x1004] ss:$16 sps:$4 sm:$0xff]   ;;  %v7455_v27 = vld [vmem:[#allocation2 + $0x100c] ss:$16 sps:$4 sm:$0xff]  }
 0x1e8   :  { %5055 = vmatprep.subr.bf16.mxu0 %v7360_v28  ;;  %5547 = vmatprep.subr.bf16.mxu1 %v7363_v19  ;;  %v5788_v28 = vcombine.low %v7996_v25, %v7996_v25  ;;  %v8007_v19 = vld [vmem:[%s8046_s0 + $0x40] sm:$0xff] }
 0x1e9   :  { %5085 = vmatprep.mubr.bf16.mxu0 %v5789_v29  ;;  %5577 = vmatprep.mubr.bf16.mxu1 %v5789_v29  ;;  %v7450_v29 = vld [vmem:[#allocation2 + $0x1000] ss:$16 sps:$4 sm:$0xff]  }
 0x1ea   :  { %v7456_v25 = vld [vmem:[#allocation2 + $0x1020] ss:$16 sps:$4 sm:$0xff]  }
 0x1eb   :  { %5056 = vmatpush1.bf16.msra.mxu0 %v7358_v30  ;;  %5548 = vmatpush1.bf16.msra.mxu1 %v7361_v31  ;;  %v7453_v30 = vld [vmem:[#allocation2 + $0x1008] ss:$16 sps:$4 sm:$0xff]   ;;  %v7458_v31 = vld [vmem:[#allocation2 + $0x1024] ss:$16 sps:$4 sm:$0xff]  }
 0x1ec   :  { %5057 = vmatprep.subr.bf16.mxu0 %v7366_v21  ;;  %5549 = vmatprep.subr.bf16.mxu1 %v7369_v32  ;;  %v7461_v21 = vld [vmem:[#allocation2 + $0x102c] ss:$16 sps:$4 sm:$0xff]   ;;  %v5791_v32 = vcombine.high %v8007_v19, %v8007_v19 }
 0x1ef   :  { %5058 = vmatpush1.bf16.msra.mxu0 %v7364_v33  ;;  %5550 = vmatpush1.bf16.msra.mxu1 %v7367_v34  ;;  %v7459_v33 = vld [vmem:[#allocation2 + $0x1028] ss:$16 sps:$4 sm:$0xff]   ;;  %v7464_v34 = vld [vmem:[#allocation2 + $0x1044] ss:$16 sps:$4 sm:$0xff]  }
 0x1f0   :  { %5059 = vmatprep.subr.bf16.mxu0 %v7372_v35  ;;  %5551 = vmatprep.subr.bf16.mxu1 %v7375_v36  ;;  %v7467_v35 = vld [vmem:[#allocation2 + $0x104c] ss:$16 sps:$4 sm:$0xff]   ;;  %v7462_v36 = vld [vmem:[#allocation2 + $0x1040] ss:$16 sps:$4 sm:$0xff]  }
 0x1f3   :  { %5060 = vmatpush1.bf16.msra.mxu0 %v7370_v37  ;;  %5552 = vmatpush1.bf16.msra.mxu1 %v7373_v38  ;;  %v7465_v37 = vld [vmem:[#allocation2 + $0x1048] ss:$16 sps:$4 sm:$0xff]   ;;  %v7470_v38 = vld [vmem:[#allocation2 + $0x1064] ss:$16 sps:$4 sm:$0xff]  }
 0x1f4   :  { %5061 = vmatprep.subr.bf16.mxu0 %v7378_v39  ;;  %5553 = vmatprep.subr.bf16.mxu1 %v7381_v40  ;;  %v7473_v39 = vld [vmem:[#allocation2 + $0x106c] ss:$16 sps:$4 sm:$0xff]   ;;  %v7468_v40 = vld [vmem:[#allocation2 + $0x1060] ss:$16 sps:$4 sm:$0xff]  }
 0x1f7   :  { %5062 = vmatpush1.bf16.msra.mxu0 %v7376_v41  ;;  %5554 = vmatpush1.bf16.msra.mxu1 %v7379_v42  ;;  %v7471_v41 = vld [vmem:[#allocation2 + $0x1068] ss:$16 sps:$4 sm:$0xff]   ;;  %v7476_v42 = vld [vmem:[#allocation2 + $0x1084] ss:$16 sps:$4 sm:$0xff]  }
 0x1f8   :  { %5063 = vmatprep.subr.bf16.mxu0 %v7384_v43  ;;  %5555 = vmatprep.subr.bf16.mxu1 %v7387_v44  ;;  %v7479_v43 = vld [vmem:[#allocation2 + $0x108c] ss:$16 sps:$4 sm:$0xff]   ;;  %v7474_v44 = vld [vmem:[#allocation2 + $0x1080] ss:$16 sps:$4 sm:$0xff]  }
 0x1fb   :  { %5064 = vmatpush1.bf16.msra.mxu0 %v7382_v45  ;;  %5556 = vmatpush1.bf16.msra.mxu1 %v7385_v46  ;;  %v7477_v45 = vld [vmem:[#allocation2 + $0x1088] ss:$16 sps:$4 sm:$0xff]   ;;  %v7482_v46 = vld [vmem:[#allocation2 + $0x10a4] ss:$16 sps:$4 sm:$0xff]  }
 0x1fc   :  { %5065 = vmatprep.subr.bf16.mxu0 %v7390_v47  ;;  %5557 = vmatprep.subr.bf16.mxu1 %v7393_v48  ;;  %v7485_v47 = vld [vmem:[#allocation2 + $0x10ac] ss:$16 sps:$4 sm:$0xff]   ;;  %v7480_v48 = vld [vmem:[#allocation2 + $0x10a0] ss:$16 sps:$4 sm:$0xff]  }
 0x1ff   :  { %5066 = vmatpush1.bf16.msra.mxu0 %v7388_v49  ;;  %5558 = vmatpush1.bf16.msra.mxu1 %v7391_v50  ;;  %v7483_v49 = vld [vmem:[#allocation2 + $0x10a8] ss:$16 sps:$4 sm:$0xff]   ;;  %v7488_v50 = vld [vmem:[#allocation2 + $0x10c4] ss:$16 sps:$4 sm:$0xff]  }
 0x200   :  { %5067 = vmatprep.subr.bf16.mxu0 %v7396_v51  ;;  %5559 = vmatprep.subr.bf16.mxu1 %v7399_v52  ;;  %v7491_v51 = vld [vmem:[#allocation2 + $0x10cc] ss:$16 sps:$4 sm:$0xff]   ;;  %v7486_v52 = vld [vmem:[#allocation2 + $0x10c0] ss:$16 sps:$4 sm:$0xff]  }
 0x203   :  { %5068 = vmatpush1.bf16.msra.mxu0 %v7394_v53  ;;  %5560 = vmatpush1.bf16.msra.mxu1 %v7397_v54  ;;  %v7489_v53 = vld [vmem:[#allocation2 + $0x10c8] ss:$16 sps:$4 sm:$0xff]   ;;  %v7494_v54 = vld [vmem:[#allocation2 + $0x10e4] ss:$16 sps:$4 sm:$0xff]  }
 0x204   :  { %5069 = vmatprep.subr.bf16.mxu0 %v7402_v55  ;;  %5561 = vmatprep.subr.bf16.mxu1 %v7405_v56  ;;  %v7497_v55 = vld [vmem:[#allocation2 + $0x10ec] ss:$16 sps:$4 sm:$0xff]   ;;  %v7492_v56 = vld [vmem:[#allocation2 + $0x10e0] ss:$16 sps:$4 sm:$0xff]  }
 0x207   :  { %5070 = vmatpush1.bf16.msra.mxu0 %v7400_v57  ;;  %5562 = vmatpush1.bf16.msra.mxu1 %v7403_v58  ;;  %v7495_v57 = vld [vmem:[#allocation2 + $0x10e8] ss:$16 sps:$4 sm:$0xff]   ;;  %v7500_v58 = vld [vmem:[#allocation2 + $0x1104] ss:$16 sps:$4 sm:$0xff]  }
 0x208   :  { %5071 = vmatprep.subr.bf16.mxu0 %v7408_v59  ;;  %5563 = vmatprep.subr.bf16.mxu1 %v7411_v60  ;;  %v7503_v59 = vld [vmem:[#allocation2 + $0x110c] ss:$16 sps:$4 sm:$0xff]   ;;  %v7498_v60 = vld [vmem:[#allocation2 + $0x1100] ss:$16 sps:$4 sm:$0xff]  }
 0x20b   :  { %5072 = vmatpush1.bf16.msra.mxu0 %v7406_v61  ;;  %5564 = vmatpush1.bf16.msra.mxu1 %v7409_v62  ;;  %v7501_v61 = vld [vmem:[#allocation2 + $0x1108] ss:$16 sps:$4 sm:$0xff]   ;;  %v7506_v62 = vld [vmem:[#allocation2 + $0x1124] ss:$16 sps:$4 sm:$0xff]  }
 0x20c   :  { %5073 = vmatprep.subr.bf16.mxu0 %v7414_v63  ;;  %5565 = vmatprep.subr.bf16.mxu1 %v7417_v0  ;;  %v7509_v63 = vld [vmem:[#allocation2 + $0x112c] ss:$16 sps:$4 sm:$0xff]   ;;  %v7504_v0 = vld [vmem:[#allocation2 + $0x1120] ss:$16 sps:$4 sm:$0xff]  }
 0x20f   :  { %5074 = vmatpush1.bf16.msra.mxu0 %v7412_v1  ;;  %5566 = vmatpush1.bf16.msra.mxu1 %v7415_v2  ;;  %v7507_v1 = vld [vmem:[#allocation2 + $0x1128] ss:$16 sps:$4 sm:$0xff]   ;;  %v7512_v2 = vld [vmem:[#allocation2 + $0x1144] ss:$16 sps:$4 sm:$0xff]  }
 0x210   :  { %5075 = vmatprep.subr.bf16.mxu0 %v7420_v3  ;;  %5567 = vmatprep.subr.bf16.mxu1 %v7423_v4  ;;  %v7515_v3 = vld [vmem:[#allocation2 + $0x114c] ss:$16 sps:$4 sm:$0xff]   ;;  %v7510_v4 = vld [vmem:[#allocation2 + $0x1140] ss:$16 sps:$4 sm:$0xff]  }
 0x213   :  { %5076 = vmatpush1.bf16.msra.mxu0 %v7418_v5  ;;  %5568 = vmatpush1.bf16.msra.mxu1 %v7421_v6  ;;  %v7513_v5 = vld [vmem:[#allocation2 + $0x1148] ss:$16 sps:$4 sm:$0xff]   ;;  %v7518_v6 = vld [vmem:[#allocation2 + $0x1164] ss:$16 sps:$4 sm:$0xff]  }
 0x214   :  { %5077 = vmatprep.subr.bf16.mxu0 %v7426_v7  ;;  %5569 = vmatprep.subr.bf16.mxu1 %v7429_v8  ;;  %v7521_v7 = vld [vmem:[#allocation2 + $0x116c] ss:$16 sps:$4 sm:$0xff]   ;;  %v7516_v8 = vld [vmem:[#allocation2 + $0x1160] ss:$16 sps:$4 sm:$0xff]  }
 0x217   :  { %5078 = vmatpush1.bf16.msra.mxu0 %v7424_v9  ;;  %5570 = vmatpush1.bf16.msra.mxu1 %v7427_v10  ;;  %v7519_v9 = vld [vmem:[#allocation2 + $0x1168] ss:$16 sps:$4 sm:$0xff]   ;;  %v7524_v10 = vld [vmem:[#allocation2 + $0x1184] ss:$16 sps:$4 sm:$0xff]  }
 0x218   :  { %5079 = vmatprep.subr.bf16.mxu0 %v7432_v12  ;;  %5571 = vmatprep.subr.bf16.mxu1 %v7435_v13  ;;  %v7527_v12 = vld [vmem:[#allocation2 + $0x118c] ss:$16 sps:$4 sm:$0xff]   ;;  %v7522_v13 = vld [vmem:[#allocation2 + $0x1180] ss:$16 sps:$4 sm:$0xff]  }
 0x21b   :  { %5080 = vmatpush1.bf16.msra.mxu0 %v7430_v15  ;;  %5572 = vmatpush1.bf16.msra.mxu1 %v7433_v16  ;;  %v7525_v15 = vld [vmem:[#allocation2 + $0x1188] ss:$16 sps:$4 sm:$0xff]   ;;  %v7530_v16 = vld [vmem:[#allocation2 + $0x11a4] ss:$16 sps:$4 sm:$0xff]  }
 0x21c   :  { %5081 = vmatprep.subr.bf16.mxu0 %v7438_v18  ;;  %5573 = vmatprep.subr.bf16.mxu1 %v7441_v11  ;;  %v7533_v18 = vld [vmem:[#allocation2 + $0x11ac] ss:$16 sps:$4 sm:$0xff]   ;;  %v7528_v11 = vld [vmem:[#allocation2 + $0x11a0] ss:$16 sps:$4 sm:$0xff]  }
 0x21f   :  { %5082 = vmatpush1.bf16.msra.mxu0 %v7436_v20  ;;  %5574 = vmatpush1.bf16.msra.mxu1 %v7439_v14  ;;  %v7531_v20 = vld [vmem:[#allocation2 + $0x11a8] ss:$16 sps:$4 sm:$0xff]   ;;  %v7536_v14 = vld [vmem:[#allocation2 + $0x11c4] ss:$16 sps:$4 sm:$0xff]  }
 0x220   :  { %5083 = vmatprep.subr.bf16.mxu0 %v7444_v22  ;;  %5575 = vmatprep.subr.bf16.mxu1 %v7447_v23  ;;  %v7539_v22 = vld [vmem:[#allocation2 + $0x11cc] ss:$16 sps:$4 sm:$0xff]   ;;  %v7534_v23 = vld [vmem:[#allocation2 + $0x11c0] ss:$16 sps:$4 sm:$0xff]  }
 0x223   :  { %5084 = vmatpush1.bf16.msra.mxu0 %v7442_v24  ;;  %5576 = vmatpush1.bf16.msra.mxu1 %v7445_v17  ;;  %v7537_v24 = vld [vmem:[#allocation2 + $0x11c8] ss:$16 sps:$4 sm:$0xff]   ;;  %v7542_v17 = vld [vmem:[#allocation2 + $0x11e4] ss:$16 sps:$4 sm:$0xff]  }
 0x224   :  { %5094 = vmatprep.subr.bf16.mxu0 %v7452_v26  ;;  %5586 = vmatprep.subr.bf16.mxu1 %v7455_v27  ;;  %v7545_v26 = vld [vmem:[#allocation2 + $0x11ec] ss:$16 sps:$4 sm:$0xff]   ;;  %v7540_v27 = vld [vmem:[#allocation2 + $0x11e0] ss:$16 sps:$4 sm:$0xff]  }
 0x226   :  { %5086 = vmatmul.mubr.bf16.vlgmr.msra.gmra.mrb[0].mxu0 %v5788_v28  ;;  %5578 = vmatmul.mubr.bf16.vlgmr.msra.gmra.mrb[0].mxu1 %v5788_v28  ;;  %v7543_v28 = vld [vmem:[#allocation2 + $0x11e8] ss:$16 sps:$4 sm:$0xff]  }
 0x227   :  { %5095 = vmatpush1.bf16.msra.mxu0 %v7450_v29  ;;  %5587 = vmatpush1.bf16.msra.mxu1 %v7453_v30  ;;  %v7550_v29 = vld [vmem:[#allocation2 + $0x1204] ss:$16 sps:$4 sm:$0xff]   ;;  %v7553_v30 = vld [vmem:[#allocation2 + $0x120c] ss:$16 sps:$4 sm:$0xff]  }
 0x228   :  { %5096 = vmatprep.subr.bf16.mxu0 %v7458_v31  ;;  %5588 = vmatprep.subr.bf16.mxu1 %v7461_v21  ;;  %v5790_v31 = vcombine.low %v8007_v19, %v8007_v19  ;;  %v8016_v21 = vld [vmem:[%s8046_s0 + $0x48] sm:$0xff]  ;;  %v7554_v19 = vld [vmem:[#allocation2 + $0x1220] ss:$16 sps:$4 sm:$0xff]  }
 0x229   :  { %5126 = vmatprep.mubr.bf16.mxu0 %v5791_v32  ;;  %5618 = vmatprep.mubr.bf16.mxu1 %v5791_v32  ;;  %v7548_v32 = vld [vmem:[#allocation2 + $0x1200] ss:$16 sps:$4 sm:$0xff]  }
 0x22b   :  { %5097 = vmatpush1.bf16.msra.mxu0 %v7456_v25  ;;  %5589 = vmatpush1.bf16.msra.mxu1 %v7459_v33  ;;  %v7551_v25 = vld [vmem:[#allocation2 + $0x1208] ss:$16 sps:$4 sm:$0xff]   ;;  %v7556_v33 = vld [vmem:[#allocation2 + $0x1224] ss:$16 sps:$4 sm:$0xff]  }
 0x22c   :  { %5098 = vmatprep.subr.bf16.mxu0 %v7464_v34  ;;  %5590 = vmatprep.subr.bf16.mxu1 %v7467_v35  ;;  %v7559_v34 = vld [vmem:[#allocation2 + $0x122c] ss:$16 sps:$4 sm:$0xff]   ;;  %v5793_v35 = vcombine.high %v8016_v21, %v8016_v21 }
 0x22f   :  { %5099 = vmatpush1.bf16.msra.mxu0 %v7462_v36  ;;  %5591 = vmatpush1.bf16.msra.mxu1 %v7465_v37  ;;  %v7557_v36 = vld [vmem:[#allocation2 + $0x1228] ss:$16 sps:$4 sm:$0xff]   ;;  %v7562_v37 = vld [vmem:[#allocation2 + $0x1244] ss:$16 sps:$4 sm:$0xff]  }
 0x230   :  { %5100 = vmatprep.subr.bf16.mxu0 %v7470_v38  ;;  %5592 = vmatprep.subr.bf16.mxu1 %v7473_v39  ;;  %v7565_v38 = vld [vmem:[#allocation2 + $0x124c] ss:$16 sps:$4 sm:$0xff]   ;;  %v7560_v39 = vld [vmem:[#allocation2 + $0x1240] ss:$16 sps:$4 sm:$0xff]  }
 0x233   :  { %5101 = vmatpush1.bf16.msra.mxu0 %v7468_v40  ;;  %5593 = vmatpush1.bf16.msra.mxu1 %v7471_v41  ;;  %v7563_v40 = vld [vmem:[#allocation2 + $0x1248] ss:$16 sps:$4 sm:$0xff]   ;;  %v7568_v41 = vld [vmem:[#allocation2 + $0x1264] ss:$16 sps:$4 sm:$0xff]  }
 0x234   :  { %5102 = vmatprep.subr.bf16.mxu0 %v7476_v42  ;;  %5594 = vmatprep.subr.bf16.mxu1 %v7479_v43  ;;  %v7571_v42 = vld [vmem:[#allocation2 + $0x126c] ss:$16 sps:$4 sm:$0xff]   ;;  %v7566_v43 = vld [vmem:[#allocation2 + $0x1260] ss:$16 sps:$4 sm:$0xff]  }
 0x237   :  { %5103 = vmatpush1.bf16.msra.mxu0 %v7474_v44  ;;  %5595 = vmatpush1.bf16.msra.mxu1 %v7477_v45  ;;  %v7569_v44 = vld [vmem:[#allocation2 + $0x1268] ss:$16 sps:$4 sm:$0xff]   ;;  %v7574_v45 = vld [vmem:[#allocation2 + $0x1284] ss:$16 sps:$4 sm:$0xff]  }
 0x238   :  { %5104 = vmatprep.subr.bf16.mxu0 %v7482_v46  ;;  %5596 = vmatprep.subr.bf16.mxu1 %v7485_v47  ;;  %v7577_v46 = vld [vmem:[#allocation2 + $0x128c] ss:$16 sps:$4 sm:$0xff]   ;;  %v7572_v47 = vld [vmem:[#allocation2 + $0x1280] ss:$16 sps:$4 sm:$0xff]  }
 0x23b   :  { %5105 = vmatpush1.bf16.msra.mxu0 %v7480_v48  ;;  %5597 = vmatpush1.bf16.msra.mxu1 %v7483_v49  ;;  %v7575_v48 = vld [vmem:[#allocation2 + $0x1288] ss:$16 sps:$4 sm:$0xff]   ;;  %v7580_v49 = vld [vmem:[#allocation2 + $0x12a4] ss:$16 sps:$4 sm:$0xff]  }
 0x23c   :  { %5106 = vmatprep.subr.bf16.mxu0 %v7488_v50  ;;  %5598 = vmatprep.subr.bf16.mxu1 %v7491_v51  ;;  %v7583_v50 = vld [vmem:[#allocation2 + $0x12ac] ss:$16 sps:$4 sm:$0xff]   ;;  %v7578_v51 = vld [vmem:[#allocation2 + $0x12a0] ss:$16 sps:$4 sm:$0xff]  }
 0x23f   :  { %5107 = vmatpush1.bf16.msra.mxu0 %v7486_v52  ;;  %5599 = vmatpush1.bf16.msra.mxu1 %v7489_v53  ;;  %v7581_v52 = vld [vmem:[#allocation2 + $0x12a8] ss:$16 sps:$4 sm:$0xff]   ;;  %v7586_v53 = vld [vmem:[#allocation2 + $0x12c4] ss:$16 sps:$4 sm:$0xff]  }
 0x240   :  { %5108 = vmatprep.subr.bf16.mxu0 %v7494_v54  ;;  %5600 = vmatprep.subr.bf16.mxu1 %v7497_v55  ;;  %v7589_v54 = vld [vmem:[#allocation2 + $0x12cc] ss:$16 sps:$4 sm:$0xff]   ;;  %v7584_v55 = vld [vmem:[#allocation2 + $0x12c0] ss:$16 sps:$4 sm:$0xff]  }
 0x243   :  { %5109 = vmatpush1.bf16.msra.mxu0 %v7492_v56  ;;  %5601 = vmatpush1.bf16.msra.mxu1 %v7495_v57  ;;  %v7587_v56 = vld [vmem:[#allocation2 + $0x12c8] ss:$16 sps:$4 sm:$0xff]   ;;  %v7592_v57 = vld [vmem:[#allocation2 + $0x12e4] ss:$16 sps:$4 sm:$0xff]  }
 0x244   :  { %5110 = vmatprep.subr.bf16.mxu0 %v7500_v58  ;;  %5602 = vmatprep.subr.bf16.mxu1 %v7503_v59  ;;  %v7595_v58 = vld [vmem:[#allocation2 + $0x12ec] ss:$16 sps:$4 sm:$0xff]   ;;  %v7590_v59 = vld [vmem:[#allocation2 + $0x12e0] ss:$16 sps:$4 sm:$0xff]  }
 0x247   :  { %5111 = vmatpush1.bf16.msra.mxu0 %v7498_v60  ;;  %5603 = vmatpush1.bf16.msra.mxu1 %v7501_v61  ;;  %v7593_v60 = vld [vmem:[#allocation2 + $0x12e8] ss:$16 sps:$4 sm:$0xff]   ;;  %v7598_v61 = vld [vmem:[#allocation2 + $0x1304] ss:$16 sps:$4 sm:$0xff]  }
 0x248   :  { %5112 = vmatprep.subr.bf16.mxu0 %v7506_v62  ;;  %5604 = vmatprep.subr.bf16.mxu1 %v7509_v63  ;;  %v7601_v62 = vld [vmem:[#allocation2 + $0x130c] ss:$16 sps:$4 sm:$0xff]   ;;  %v7596_v63 = vld [vmem:[#allocation2 + $0x1300] ss:$16 sps:$4 sm:$0xff]  }
 0x24b   :  { %5113 = vmatpush1.bf16.msra.mxu0 %v7504_v0  ;;  %5605 = vmatpush1.bf16.msra.mxu1 %v7507_v1  ;;  %v7599_v0 = vld [vmem:[#allocation2 + $0x1308] ss:$16 sps:$4 sm:$0xff]   ;;  %v7604_v1 = vld [vmem:[#allocation2 + $0x1324] ss:$16 sps:$4 sm:$0xff]  }
 0x24c   :  { %5114 = vmatprep.subr.bf16.mxu0 %v7512_v2  ;;  %5606 = vmatprep.subr.bf16.mxu1 %v7515_v3  ;;  %v7607_v2 = vld [vmem:[#allocation2 + $0x132c] ss:$16 sps:$4 sm:$0xff]   ;;  %v7602_v3 = vld [vmem:[#allocation2 + $0x1320] ss:$16 sps:$4 sm:$0xff]  }
 0x24f   :  { %5115 = vmatpush1.bf16.msra.mxu0 %v7510_v4  ;;  %5607 = vmatpush1.bf16.msra.mxu1 %v7513_v5  ;;  %v7605_v4 = vld [vmem:[#allocation2 + $0x1328] ss:$16 sps:$4 sm:$0xff]   ;;  %v7610_v5 = vld [vmem:[#allocation2 + $0x1344] ss:$16 sps:$4 sm:$0xff]  }
 0x250   :  { %5116 = vmatprep.subr.bf16.mxu0 %v7518_v6  ;;  %5608 = vmatprep.subr.bf16.mxu1 %v7521_v7  ;;  %v7613_v6 = vld [vmem:[#allocation2 + $0x134c] ss:$16 sps:$4 sm:$0xff]   ;;  %v7608_v7 = vld [vmem:[#allocation2 + $0x1340] ss:$16 sps:$4 sm:$0xff]  }
 0x253   :  { %5117 = vmatpush1.bf16.msra.mxu0 %v7516_v8  ;;  %5609 = vmatpush1.bf16.msra.mxu1 %v7519_v9  ;;  %v7611_v8 = vld [vmem:[#allocation2 + $0x1348] ss:$16 sps:$4 sm:$0xff]   ;;  %v7616_v9 = vld [vmem:[#allocation2 + $0x1364] ss:$16 sps:$4 sm:$0xff]  }
 0x254   :  { %5118 = vmatprep.subr.bf16.mxu0 %v7524_v10  ;;  %5610 = vmatprep.subr.bf16.mxu1 %v7527_v12  ;;  %v7619_v10 = vld [vmem:[#allocation2 + $0x136c] ss:$16 sps:$4 sm:$0xff]   ;;  %v7614_v12 = vld [vmem:[#allocation2 + $0x1360] ss:$16 sps:$4 sm:$0xff]  }
 0x257   :  { %5119 = vmatpush1.bf16.msra.mxu0 %v7522_v13  ;;  %5611 = vmatpush1.bf16.msra.mxu1 %v7525_v15  ;;  %v7617_v13 = vld [vmem:[#allocation2 + $0x1368] ss:$16 sps:$4 sm:$0xff]   ;;  %v7622_v15 = vld [vmem:[#allocation2 + $0x1384] ss:$16 sps:$4 sm:$0xff]  }
 0x258   :  { %5120 = vmatprep.subr.bf16.mxu0 %v7530_v16  ;;  %5612 = vmatprep.subr.bf16.mxu1 %v7533_v18  ;;  %v7625_v16 = vld [vmem:[#allocation2 + $0x138c] ss:$16 sps:$4 sm:$0xff]   ;;  %v7620_v18 = vld [vmem:[#allocation2 + $0x1380] ss:$16 sps:$4 sm:$0xff]  }
 0x25b   :  { %5121 = vmatpush1.bf16.msra.mxu0 %v7528_v11  ;;  %5613 = vmatpush1.bf16.msra.mxu1 %v7531_v20  ;;  %v7623_v11 = vld [vmem:[#allocation2 + $0x1388] ss:$16 sps:$4 sm:$0xff]   ;;  %v7628_v20 = vld [vmem:[#allocation2 + $0x13a4] ss:$16 sps:$4 sm:$0xff]  }
 0x25c   :  { %5122 = vmatprep.subr.bf16.mxu0 %v7536_v14  ;;  %5614 = vmatprep.subr.bf16.mxu1 %v7539_v22  ;;  %v7631_v14 = vld [vmem:[#allocation2 + $0x13ac] ss:$16 sps:$4 sm:$0xff]   ;;  %v7626_v22 = vld [vmem:[#allocation2 + $0x13a0] ss:$16 sps:$4 sm:$0xff]  }
 0x25f   :  { %5123 = vmatpush1.bf16.msra.mxu0 %v7534_v23  ;;  %5615 = vmatpush1.bf16.msra.mxu1 %v7537_v24  ;;  %v7629_v23 = vld [vmem:[#allocation2 + $0x13a8] ss:$16 sps:$4 sm:$0xff]   ;;  %v7634_v24 = vld [vmem:[#allocation2 + $0x13c4] ss:$16 sps:$4 sm:$0xff]  }
 0x260   :  { %5124 = vmatprep.subr.bf16.mxu0 %v7542_v17  ;;  %5616 = vmatprep.subr.bf16.mxu1 %v7545_v26  ;;  %v7637_v17 = vld [vmem:[#allocation2 + $0x13cc] ss:$16 sps:$4 sm:$0xff]   ;;  %v7632_v26 = vld [vmem:[#allocation2 + $0x13c0] ss:$16 sps:$4 sm:$0xff]  }
 0x263   :  { %5125 = vmatpush1.bf16.msra.mxu0 %v7540_v27  ;;  %5617 = vmatpush1.bf16.msra.mxu1 %v7543_v28  ;;  %v7635_v27 = vld [vmem:[#allocation2 + $0x13c8] ss:$16 sps:$4 sm:$0xff]   ;;  %v7640_v28 = vld [vmem:[#allocation2 + $0x13e4] ss:$16 sps:$4 sm:$0xff]  }
 0x264   :  { %5135 = vmatprep.subr.bf16.mxu0 %v7550_v29  ;;  %5627 = vmatprep.subr.bf16.mxu1 %v7553_v30  ;;  %v7643_v29 = vld [vmem:[#allocation2 + $0x13ec] ss:$16 sps:$4 sm:$0xff]   ;;  %v7638_v30 = vld [vmem:[#allocation2 + $0x13e0] ss:$16 sps:$4 sm:$0xff]  }
 0x266   :  { %5127 = vmatmul.mubr.bf16.vlgmr.msra.gmra.mrb[0].mxu0 %v5790_v31  ;;  %5619 = vmatmul.mubr.bf16.vlgmr.msra.gmra.mrb[0].mxu1 %v5790_v31  ;;  %v7641_v31 = vld [vmem:[#allocation2 + $0x13e8] ss:$16 sps:$4 sm:$0xff]  }
 0x267   :  { %5136 = vmatpush1.bf16.msra.mxu0 %v7548_v32  ;;  %5628 = vmatpush1.bf16.msra.mxu1 %v7551_v25  ;;  %v7648_v32 = vld [vmem:[#allocation2 + $0x1404] ss:$16 sps:$4 sm:$0xff]   ;;  %v7651_v25 = vld [vmem:[#allocation2 + $0x140c] ss:$16 sps:$4 sm:$0xff]  }
 0x268   :  { %5137 = vmatprep.subr.bf16.mxu0 %v7556_v33  ;;  %5629 = vmatprep.subr.bf16.mxu1 %v7559_v34  ;;  %v5792_v33 = vcombine.low %v8016_v21, %v8016_v21  ;;  %v8025_v34 = vld [vmem:[%s8046_s0 + $0x50] sm:$0xff] }
 0x269   :  { %5167 = vmatprep.mubr.bf16.mxu0 %v5793_v35  ;;  %5659 = vmatprep.mubr.bf16.mxu1 %v5793_v35  ;;  %v7646_v35 = vld [vmem:[#allocation2 + $0x1400] ss:$16 sps:$4 sm:$0xff]  }
 0x26a   :  { %v7652_v21 = vld [vmem:[#allocation2 + $0x1420] ss:$16 sps:$4 sm:$0xff]  }
 0x26b   :  { %5138 = vmatpush1.bf16.msra.mxu0 %v7554_v19  ;;  %5630 = vmatpush1.bf16.msra.mxu1 %v7557_v36  ;;  %v7649_v19 = vld [vmem:[#allocation2 + $0x1408] ss:$16 sps:$4 sm:$0xff]   ;;  %v7654_v36 = vld [vmem:[#allocation2 + $0x1424] ss:$16 sps:$4 sm:$0xff]  }
 0x26c   :  { %5139 = vmatprep.subr.bf16.mxu0 %v7562_v37  ;;  %5631 = vmatprep.subr.bf16.mxu1 %v7565_v38  ;;  %v7657_v37 = vld [vmem:[#allocation2 + $0x142c] ss:$16 sps:$4 sm:$0xff]   ;;  %v5795_v38 = vcombine.high %v8025_v34, %v8025_v34 }
 0x26f   :  { %5140 = vmatpush1.bf16.msra.mxu0 %v7560_v39  ;;  %5632 = vmatpush1.bf16.msra.mxu1 %v7563_v40  ;;  %v7655_v39 = vld [vmem:[#allocation2 + $0x1428] ss:$16 sps:$4 sm:$0xff]   ;;  %v7660_v40 = vld [vmem:[#allocation2 + $0x1444] ss:$16 sps:$4 sm:$0xff]  }
 0x270   :  { %5141 = vmatprep.subr.bf16.mxu0 %v7568_v41  ;;  %5633 = vmatprep.subr.bf16.mxu1 %v7571_v42  ;;  %v7663_v41 = vld [vmem:[#allocation2 + $0x144c] ss:$16 sps:$4 sm:$0xff]   ;;  %v7658_v42 = vld [vmem:[#allocation2 + $0x1440] ss:$16 sps:$4 sm:$0xff]  }
 0x273   :  { %5142 = vmatpush1.bf16.msra.mxu0 %v7566_v43  ;;  %5634 = vmatpush1.bf16.msra.mxu1 %v7569_v44  ;;  %v7661_v43 = vld [vmem:[#allocation2 + $0x1448] ss:$16 sps:$4 sm:$0xff]   ;;  %v7666_v44 = vld [vmem:[#allocation2 + $0x1464] ss:$16 sps:$4 sm:$0xff]  }
 0x274   :  { %5143 = vmatprep.subr.bf16.mxu0 %v7574_v45  ;;  %5635 = vmatprep.subr.bf16.mxu1 %v7577_v46  ;;  %v7669_v45 = vld [vmem:[#allocation2 + $0x146c] ss:$16 sps:$4 sm:$0xff]   ;;  %v7664_v46 = vld [vmem:[#allocation2 + $0x1460] ss:$16 sps:$4 sm:$0xff]  }
 0x277   :  { %5144 = vmatpush1.bf16.msra.mxu0 %v7572_v47  ;;  %5636 = vmatpush1.bf16.msra.mxu1 %v7575_v48  ;;  %v7667_v47 = vld [vmem:[#allocation2 + $0x1468] ss:$16 sps:$4 sm:$0xff]   ;;  %v7672_v48 = vld [vmem:[#allocation2 + $0x1484] ss:$16 sps:$4 sm:$0xff]  }
 0x278   :  { %5145 = vmatprep.subr.bf16.mxu0 %v7580_v49  ;;  %5637 = vmatprep.subr.bf16.mxu1 %v7583_v50  ;;  %v7675_v49 = vld [vmem:[#allocation2 + $0x148c] ss:$16 sps:$4 sm:$0xff]   ;;  %v7670_v50 = vld [vmem:[#allocation2 + $0x1480] ss:$16 sps:$4 sm:$0xff]  }
 0x27b   :  { %5146 = vmatpush1.bf16.msra.mxu0 %v7578_v51  ;;  %5638 = vmatpush1.bf16.msra.mxu1 %v7581_v52  ;;  %v7673_v51 = vld [vmem:[#allocation2 + $0x1488] ss:$16 sps:$4 sm:$0xff]   ;;  %v7678_v52 = vld [vmem:[#allocation2 + $0x14a4] ss:$16 sps:$4 sm:$0xff]  }
 0x27c   :  { %5147 = vmatprep.subr.bf16.mxu0 %v7586_v53  ;;  %5639 = vmatprep.subr.bf16.mxu1 %v7589_v54  ;;  %v7681_v53 = vld [vmem:[#allocation2 + $0x14ac] ss:$16 sps:$4 sm:$0xff]   ;;  %v7676_v54 = vld [vmem:[#allocation2 + $0x14a0] ss:$16 sps:$4 sm:$0xff]  }
 0x27f   :  { %5148 = vmatpush1.bf16.msra.mxu0 %v7584_v55  ;;  %5640 = vmatpush1.bf16.msra.mxu1 %v7587_v56  ;;  %v7679_v55 = vld [vmem:[#allocation2 + $0x14a8] ss:$16 sps:$4 sm:$0xff]   ;;  %v7684_v56 = vld [vmem:[#allocation2 + $0x14c4] ss:$16 sps:$4 sm:$0xff]  }
 0x280   :  { %5149 = vmatprep.subr.bf16.mxu0 %v7592_v57  ;;  %5641 = vmatprep.subr.bf16.mxu1 %v7595_v58  ;;  %v7687_v57 = vld [vmem:[#allocation2 + $0x14cc] ss:$16 sps:$4 sm:$0xff]   ;;  %v7682_v58 = vld [vmem:[#allocation2 + $0x14c0] ss:$16 sps:$4 sm:$0xff]  }
 0x283   :  { %5150 = vmatpush1.bf16.msra.mxu0 %v7590_v59  ;;  %5642 = vmatpush1.bf16.msra.mxu1 %v7593_v60  ;;  %v7685_v59 = vld [vmem:[#allocation2 + $0x14c8] ss:$16 sps:$4 sm:$0xff]   ;;  %v7690_v60 = vld [vmem:[#allocation2 + $0x14e4] ss:$16 sps:$4 sm:$0xff]  }
 0x284   :  { %5151 = vmatprep.subr.bf16.mxu0 %v7598_v61  ;;  %5643 = vmatprep.subr.bf16.mxu1 %v7601_v62  ;;  %v7693_v61 = vld [vmem:[#allocation2 + $0x14ec] ss:$16 sps:$4 sm:$0xff]   ;;  %v7688_v62 = vld [vmem:[#allocation2 + $0x14e0] ss:$16 sps:$4 sm:$0xff]  }
 0x287   :  { %5152 = vmatpush1.bf16.msra.mxu0 %v7596_v63  ;;  %5644 = vmatpush1.bf16.msra.mxu1 %v7599_v0  ;;  %v7691_v63 = vld [vmem:[#allocation2 + $0x14e8] ss:$16 sps:$4 sm:$0xff]   ;;  %v7696_v0 = vld [vmem:[#allocation2 + $0x1504] ss:$16 sps:$4 sm:$0xff]  }
 0x288   :  { %5153 = vmatprep.subr.bf16.mxu0 %v7604_v1  ;;  %5645 = vmatprep.subr.bf16.mxu1 %v7607_v2  ;;  %v7699_v1 = vld [vmem:[#allocation2 + $0x150c] ss:$16 sps:$4 sm:$0xff]   ;;  %v7694_v2 = vld [vmem:[#allocation2 + $0x1500] ss:$16 sps:$4 sm:$0xff]  }
 0x28b   :  { %5154 = vmatpush1.bf16.msra.mxu0 %v7602_v3  ;;  %5646 = vmatpush1.bf16.msra.mxu1 %v7605_v4  ;;  %v7697_v3 = vld [vmem:[#allocation2 + $0x1508] ss:$16 sps:$4 sm:$0xff]   ;;  %v7702_v4 = vld [vmem:[#allocation2 + $0x1524] ss:$16 sps:$4 sm:$0xff]  }
 0x28c   :  { %5155 = vmatprep.subr.bf16.mxu0 %v7610_v5  ;;  %5647 = vmatprep.subr.bf16.mxu1 %v7613_v6  ;;  %v7705_v5 = vld [vmem:[#allocation2 + $0x152c] ss:$16 sps:$4 sm:$0xff]   ;;  %v7700_v6 = vld [vmem:[#allocation2 + $0x1520] ss:$16 sps:$4 sm:$0xff]  }
 0x28f   :  { %5156 = vmatpush1.bf16.msra.mxu0 %v7608_v7  ;;  %5648 = vmatpush1.bf16.msra.mxu1 %v7611_v8  ;;  %v7703_v7 = vld [vmem:[#allocation2 + $0x1528] ss:$16 sps:$4 sm:$0xff]   ;;  %v7708_v8 = vld [vmem:[#allocation2 + $0x1544] ss:$16 sps:$4 sm:$0xff]  }
 0x290   :  { %5157 = vmatprep.subr.bf16.mxu0 %v7616_v9  ;;  %5649 = vmatprep.subr.bf16.mxu1 %v7619_v10  ;;  %v7711_v9 = vld [vmem:[#allocation2 + $0x154c] ss:$16 sps:$4 sm:$0xff]   ;;  %v7706_v10 = vld [vmem:[#allocation2 + $0x1540] ss:$16 sps:$4 sm:$0xff]  }
 0x293   :  { %5158 = vmatpush1.bf16.msra.mxu0 %v7614_v12  ;;  %5650 = vmatpush1.bf16.msra.mxu1 %v7617_v13  ;;  %v7709_v12 = vld [vmem:[#allocation2 + $0x1548] ss:$16 sps:$4 sm:$0xff]   ;;  %v7714_v13 = vld [vmem:[#allocation2 + $0x1564] ss:$16 sps:$4 sm:$0xff]  }
 0x294   :  { %5159 = vmatprep.subr.bf16.mxu0 %v7622_v15  ;;  %5651 = vmatprep.subr.bf16.mxu1 %v7625_v16  ;;  %v7717_v15 = vld [vmem:[#allocation2 + $0x156c] ss:$16 sps:$4 sm:$0xff]   ;;  %v7712_v16 = vld [vmem:[#allocation2 + $0x1560] ss:$16 sps:$4 sm:$0xff]  }
 0x297   :  { %5160 = vmatpush1.bf16.msra.mxu0 %v7620_v18  ;;  %5652 = vmatpush1.bf16.msra.mxu1 %v7623_v11  ;;  %v7715_v18 = vld [vmem:[#allocation2 + $0x1568] ss:$16 sps:$4 sm:$0xff]   ;;  %v7720_v11 = vld [vmem:[#allocation2 + $0x1584] ss:$16 sps:$4 sm:$0xff]  }
 0x298   :  { %5161 = vmatprep.subr.bf16.mxu0 %v7628_v20  ;;  %5653 = vmatprep.subr.bf16.mxu1 %v7631_v14  ;;  %v7723_v20 = vld [vmem:[#allocation2 + $0x158c] ss:$16 sps:$4 sm:$0xff]   ;;  %v7718_v14 = vld [vmem:[#allocation2 + $0x1580] ss:$16 sps:$4 sm:$0xff]  }
 0x29b   :  { %5162 = vmatpush1.bf16.msra.mxu0 %v7626_v22  ;;  %5654 = vmatpush1.bf16.msra.mxu1 %v7629_v23  ;;  %v7721_v22 = vld [vmem:[#allocation2 + $0x1588] ss:$16 sps:$4 sm:$0xff]   ;;  %v7726_v23 = vld [vmem:[#allocation2 + $0x15a4] ss:$16 sps:$4 sm:$0xff]  }
 0x29c   :  { %5163 = vmatprep.subr.bf16.mxu0 %v7634_v24  ;;  %5655 = vmatprep.subr.bf16.mxu1 %v7637_v17  ;;  %v7729_v24 = vld [vmem:[#allocation2 + $0x15ac] ss:$16 sps:$4 sm:$0xff]   ;;  %v7724_v17 = vld [vmem:[#allocation2 + $0x15a0] ss:$16 sps:$4 sm:$0xff]  }
 0x29f   :  { %5164 = vmatpush1.bf16.msra.mxu0 %v7632_v26  ;;  %5656 = vmatpush1.bf16.msra.mxu1 %v7635_v27  ;;  %v7727_v26 = vld [vmem:[#allocation2 + $0x15a8] ss:$16 sps:$4 sm:$0xff]   ;;  %v7732_v27 = vld [vmem:[#allocation2 + $0x15c4] ss:$16 sps:$4 sm:$0xff]  }
 0x2a0   :  { %5165 = vmatprep.subr.bf16.mxu0 %v7640_v28  ;;  %5657 = vmatprep.subr.bf16.mxu1 %v7643_v29  ;;  %v7735_v28 = vld [vmem:[#allocation2 + $0x15cc] ss:$16 sps:$4 sm:$0xff]   ;;  %v7730_v29 = vld [vmem:[#allocation2 + $0x15c0] ss:$16 sps:$4 sm:$0xff]  }
 0x2a3   :  { %5166 = vmatpush1.bf16.msra.mxu0 %v7638_v30  ;;  %5658 = vmatpush1.bf16.msra.mxu1 %v7641_v31  ;;  %v7733_v30 = vld [vmem:[#allocation2 + $0x15c8] ss:$16 sps:$4 sm:$0xff]   ;;  %v7738_v31 = vld [vmem:[#allocation2 + $0x15e4] ss:$16 sps:$4 sm:$0xff]  }
 0x2a4   :  { %5176 = vmatprep.subr.bf16.mxu0 %v7648_v32  ;;  %5668 = vmatprep.subr.bf16.mxu1 %v7651_v25  ;;  %v7741_v32 = vld [vmem:[#allocation2 + $0x15ec] ss:$16 sps:$4 sm:$0xff]   ;;  %v7736_v25 = vld [vmem:[#allocation2 + $0x15e0] ss:$16 sps:$4 sm:$0xff]  }
 0x2a6   :  { %5168 = vmatmul.mubr.bf16.vlgmr.msra.gmra.mrb[0].mxu0 %v5792_v33  ;;  %5660 = vmatmul.mubr.bf16.vlgmr.msra.gmra.mrb[0].mxu1 %v5792_v33  ;;  %v7739_v33 = vld [vmem:[#allocation2 + $0x15e8] ss:$16 sps:$4 sm:$0xff]  }
 0x2a7   :  { %5177 = vmatpush1.bf16.msra.mxu0 %v7646_v35  ;;  %5669 = vmatpush1.bf16.msra.mxu1 %v7649_v19  ;;  %v7746_v35 = vld [vmem:[#allocation2 + $0x1604] ss:$16 sps:$4 sm:$0xff]   ;;  %v7749_v19 = vld [vmem:[#allocation2 + $0x160c] ss:$16 sps:$4 sm:$0xff]  }
 0x2a8   :  { %5178 = vmatprep.subr.bf16.mxu0 %v7654_v36  ;;  %5670 = vmatprep.subr.bf16.mxu1 %v7657_v37  ;;  %v5794_v36 = vcombine.low %v8025_v34, %v8025_v34  ;;  %v8034_v37 = vld [vmem:[%s8046_s0 + $0x58] sm:$0xff]  ;;  %v7750_v34 = vld [vmem:[#allocation2 + $0x1620] ss:$16 sps:$4 sm:$0xff]  }
 0x2a9   :  { %5208 = vmatprep.mubr.bf16.mxu0 %v5795_v38  ;;  %5700 = vmatprep.mubr.bf16.mxu1 %v5795_v38  ;;  %v7744_v38 = vld [vmem:[#allocation2 + $0x1600] ss:$16 sps:$4 sm:$0xff]  }
 0x2ab   :  { %5179 = vmatpush1.bf16.msra.mxu0 %v7652_v21  ;;  %5671 = vmatpush1.bf16.msra.mxu1 %v7655_v39  ;;  %v7747_v21 = vld [vmem:[#allocation2 + $0x1608] ss:$16 sps:$4 sm:$0xff]   ;;  %v7752_v39 = vld [vmem:[#allocation2 + $0x1624] ss:$16 sps:$4 sm:$0xff]  }
 0x2ac   :  { %5180 = vmatprep.subr.bf16.mxu0 %v7660_v40  ;;  %5672 = vmatprep.subr.bf16.mxu1 %v7663_v41  ;;  %v7755_v40 = vld [vmem:[#allocation2 + $0x162c] ss:$16 sps:$4 sm:$0xff]   ;;  %v5797_v41 = vcombine.high %v8034_v37, %v8034_v37 }
 0x2af   :  { %5181 = vmatpush1.bf16.msra.mxu0 %v7658_v42  ;;  %5673 = vmatpush1.bf16.msra.mxu1 %v7661_v43  ;;  %v7753_v42 = vld [vmem:[#allocation2 + $0x1628] ss:$16 sps:$4 sm:$0xff]   ;;  %v7758_v43 = vld [vmem:[#allocation2 + $0x1644] ss:$16 sps:$4 sm:$0xff]  }
 0x2b0   :  { %5182 = vmatprep.subr.bf16.mxu0 %v7666_v44  ;;  %5674 = vmatprep.subr.bf16.mxu1 %v7669_v45  ;;  %v7761_v44 = vld [vmem:[#allocation2 + $0x164c] ss:$16 sps:$4 sm:$0xff]   ;;  %v7756_v45 = vld [vmem:[#allocation2 + $0x1640] ss:$16 sps:$4 sm:$0xff]  }
 0x2b3   :  { %5183 = vmatpush1.bf16.msra.mxu0 %v7664_v46  ;;  %5675 = vmatpush1.bf16.msra.mxu1 %v7667_v47  ;;  %v7759_v46 = vld [vmem:[#allocation2 + $0x1648] ss:$16 sps:$4 sm:$0xff]   ;;  %v7764_v47 = vld [vmem:[#allocation2 + $0x1664] ss:$16 sps:$4 sm:$0xff]  }
 0x2b4   :  { %5184 = vmatprep.subr.bf16.mxu0 %v7672_v48  ;;  %5676 = vmatprep.subr.bf16.mxu1 %v7675_v49  ;;  %v7767_v48 = vld [vmem:[#allocation2 + $0x166c] ss:$16 sps:$4 sm:$0xff]   ;;  %v7762_v49 = vld [vmem:[#allocation2 + $0x1660] ss:$16 sps:$4 sm:$0xff]  }
 0x2b7   :  { %5185 = vmatpush1.bf16.msra.mxu0 %v7670_v50  ;;  %5677 = vmatpush1.bf16.msra.mxu1 %v7673_v51  ;;  %v7765_v50 = vld [vmem:[#allocation2 + $0x1668] ss:$16 sps:$4 sm:$0xff]   ;;  %v7770_v51 = vld [vmem:[#allocation2 + $0x1684] ss:$16 sps:$4 sm:$0xff]  }
 0x2b8   :  { %5186 = vmatprep.subr.bf16.mxu0 %v7678_v52  ;;  %5678 = vmatprep.subr.bf16.mxu1 %v7681_v53  ;;  %v7773_v52 = vld [vmem:[#allocation2 + $0x168c] ss:$16 sps:$4 sm:$0xff]   ;;  %v7768_v53 = vld [vmem:[#allocation2 + $0x1680] ss:$16 sps:$4 sm:$0xff]  }
 0x2bb   :  { %5187 = vmatpush1.bf16.msra.mxu0 %v7676_v54  ;;  %5679 = vmatpush1.bf16.msra.mxu1 %v7679_v55  ;;  %v7771_v54 = vld [vmem:[#allocation2 + $0x1688] ss:$16 sps:$4 sm:$0xff]   ;;  %v7776_v55 = vld [vmem:[#allocation2 + $0x16a4] ss:$16 sps:$4 sm:$0xff]  }
 0x2bc   :  { %5188 = vmatprep.subr.bf16.mxu0 %v7684_v56  ;;  %5680 = vmatprep.subr.bf16.mxu1 %v7687_v57  ;;  %v7779_v56 = vld [vmem:[#allocation2 + $0x16ac] ss:$16 sps:$4 sm:$0xff]   ;;  %v7774_v57 = vld [vmem:[#allocation2 + $0x16a0] ss:$16 sps:$4 sm:$0xff]  }
 0x2bf   :  { %5189 = vmatpush1.bf16.msra.mxu0 %v7682_v58  ;;  %5681 = vmatpush1.bf16.msra.mxu1 %v7685_v59  ;;  %v7777_v58 = vld [vmem:[#allocation2 + $0x16a8] ss:$16 sps:$4 sm:$0xff]   ;;  %v7782_v59 = vld [vmem:[#allocation2 + $0x16c4] ss:$16 sps:$4 sm:$0xff]  }
 0x2c0   :  { %5190 = vmatprep.subr.bf16.mxu0 %v7690_v60  ;;  %5682 = vmatprep.subr.bf16.mxu1 %v7693_v61  ;;  %v7785_v60 = vld [vmem:[#allocation2 + $0x16cc] ss:$16 sps:$4 sm:$0xff]   ;;  %v7780_v61 = vld [vmem:[#allocation2 + $0x16c0] ss:$16 sps:$4 sm:$0xff]  }
 0x2c3   :  { %5191 = vmatpush1.bf16.msra.mxu0 %v7688_v62  ;;  %5683 = vmatpush1.bf16.msra.mxu1 %v7691_v63  ;;  %v7783_v62 = vld [vmem:[#allocation2 + $0x16c8] ss:$16 sps:$4 sm:$0xff]   ;;  %v7788_v63 = vld [vmem:[#allocation2 + $0x16e4] ss:$16 sps:$4 sm:$0xff]  }
 0x2c4   :  { %5192 = vmatprep.subr.bf16.mxu0 %v7696_v0  ;;  %5684 = vmatprep.subr.bf16.mxu1 %v7699_v1  ;;  %v7791_v0 = vld [vmem:[#allocation2 + $0x16ec] ss:$16 sps:$4 sm:$0xff]   ;;  %v7786_v1 = vld [vmem:[#allocation2 + $0x16e0] ss:$16 sps:$4 sm:$0xff]  }
 0x2c7   :  { %5193 = vmatpush1.bf16.msra.mxu0 %v7694_v2  ;;  %5685 = vmatpush1.bf16.msra.mxu1 %v7697_v3  ;;  %v7789_v2 = vld [vmem:[#allocation2 + $0x16e8] ss:$16 sps:$4 sm:$0xff]   ;;  %v7794_v3 = vld [vmem:[#allocation2 + $0x1704] ss:$16 sps:$4 sm:$0xff]  }
 0x2c8   :  { %5194 = vmatprep.subr.bf16.mxu0 %v7702_v4  ;;  %5686 = vmatprep.subr.bf16.mxu1 %v7705_v5  ;;  %v7797_v4 = vld [vmem:[#allocation2 + $0x170c] ss:$16 sps:$4 sm:$0xff]   ;;  %v7792_v5 = vld [vmem:[#allocation2 + $0x1700] ss:$16 sps:$4 sm:$0xff]  }
 0x2cb   :  { %5195 = vmatpush1.bf16.msra.mxu0 %v7700_v6  ;;  %5687 = vmatpush1.bf16.msra.mxu1 %v7703_v7  ;;  %v7795_v6 = vld [vmem:[#allocation2 + $0x1708] ss:$16 sps:$4 sm:$0xff]   ;;  %v7800_v7 = vld [vmem:[#allocation2 + $0x1724] ss:$16 sps:$4 sm:$0xff]  }
 0x2cc   :  { %5196 = vmatprep.subr.bf16.mxu0 %v7708_v8  ;;  %5688 = vmatprep.subr.bf16.mxu1 %v7711_v9  ;;  %v7803_v8 = vld [vmem:[#allocation2 + $0x172c] ss:$16 sps:$4 sm:$0xff]   ;;  %v7798_v9 = vld [vmem:[#allocation2 + $0x1720] ss:$16 sps:$4 sm:$0xff]  }
 0x2cf   :  { %5197 = vmatpush1.bf16.msra.mxu0 %v7706_v10  ;;  %5689 = vmatpush1.bf16.msra.mxu1 %v7709_v12  ;;  %v7801_v10 = vld [vmem:[#allocation2 + $0x1728] ss:$16 sps:$4 sm:$0xff]   ;;  %v7806_v12 = vld [vmem:[#allocation2 + $0x1744] ss:$16 sps:$4 sm:$0xff]  }
 0x2d0   :  { %5198 = vmatprep.subr.bf16.mxu0 %v7714_v13  ;;  %5690 = vmatprep.subr.bf16.mxu1 %v7717_v15  ;;  %v7809_v13 = vld [vmem:[#allocation2 + $0x174c] ss:$16 sps:$4 sm:$0xff]   ;;  %v7804_v15 = vld [vmem:[#allocation2 + $0x1740] ss:$16 sps:$4 sm:$0xff]  }
 0x2d3   :  { %5199 = vmatpush1.bf16.msra.mxu0 %v7712_v16  ;;  %5691 = vmatpush1.bf16.msra.mxu1 %v7715_v18  ;;  %v7807_v16 = vld [vmem:[#allocation2 + $0x1748] ss:$16 sps:$4 sm:$0xff]   ;;  %v7812_v18 = vld [vmem:[#allocation2 + $0x1764] ss:$16 sps:$4 sm:$0xff]  }
 0x2d4   :  { %5200 = vmatprep.subr.bf16.mxu0 %v7720_v11  ;;  %5692 = vmatprep.subr.bf16.mxu1 %v7723_v20  ;;  %v7815_v11 = vld [vmem:[#allocation2 + $0x176c] ss:$16 sps:$4 sm:$0xff]   ;;  %v7810_v20 = vld [vmem:[#allocation2 + $0x1760] ss:$16 sps:$4 sm:$0xff]  }
 0x2d7   :  { %5201 = vmatpush1.bf16.msra.mxu0 %v7718_v14  ;;  %5693 = vmatpush1.bf16.msra.mxu1 %v7721_v22  ;;  %v7813_v14 = vld [vmem:[#allocation2 + $0x1768] ss:$16 sps:$4 sm:$0xff]   ;;  %v7818_v22 = vld [vmem:[#allocation2 + $0x1784] ss:$16 sps:$4 sm:$0xff]  }
 0x2d8   :  { %5202 = vmatprep.subr.bf16.mxu0 %v7726_v23  ;;  %5694 = vmatprep.subr.bf16.mxu1 %v7729_v24  ;;  %v7821_v23 = vld [vmem:[#allocation2 + $0x178c] ss:$16 sps:$4 sm:$0xff]   ;;  %v7816_v24 = vld [vmem:[#allocation2 + $0x1780] ss:$16 sps:$4 sm:$0xff]  }
 0x2db   :  { %5203 = vmatpush1.bf16.msra.mxu0 %v7724_v17  ;;  %5695 = vmatpush1.bf16.msra.mxu1 %v7727_v26  ;;  %v7819_v17 = vld [vmem:[#allocation2 + $0x1788] ss:$16 sps:$4 sm:$0xff]   ;;  %v7824_v26 = vld [vmem:[#allocation2 + $0x17a4] ss:$16 sps:$4 sm:$0xff]  }
 0x2dc   :  { %5204 = vmatprep.subr.bf16.mxu0 %v7732_v27  ;;  %5696 = vmatprep.subr.bf16.mxu1 %v7735_v28  ;;  %v7827_v27 = vld [vmem:[#allocation2 + $0x17ac] ss:$16 sps:$4 sm:$0xff]   ;;  %v7822_v28 = vld [vmem:[#allocation2 + $0x17a0] ss:$16 sps:$4 sm:$0xff]  }
 0x2df   :  { %5205 = vmatpush1.bf16.msra.mxu0 %v7730_v29  ;;  %5697 = vmatpush1.bf16.msra.mxu1 %v7733_v30  ;;  %v7825_v29 = vld [vmem:[#allocation2 + $0x17a8] ss:$16 sps:$4 sm:$0xff]   ;;  %v7830_v30 = vld [vmem:[#allocation2 + $0x17c4] ss:$16 sps:$4 sm:$0xff]  }
 0x2e0   :  { %5206 = vmatprep.subr.bf16.mxu0 %v7738_v31  ;;  %5698 = vmatprep.subr.bf16.mxu1 %v7741_v32  ;;  %v7833_v31 = vld [vmem:[#allocation2 + $0x17cc] ss:$16 sps:$4 sm:$0xff]   ;;  %v7828_v32 = vld [vmem:[#allocation2 + $0x17c0] ss:$16 sps:$4 sm:$0xff]  }
 0x2e3   :  { %5207 = vmatpush1.bf16.msra.mxu0 %v7736_v25  ;;  %5699 = vmatpush1.bf16.msra.mxu1 %v7739_v33  ;;  %v7831_v25 = vld [vmem:[#allocation2 + $0x17c8] ss:$16 sps:$4 sm:$0xff]   ;;  %v7836_v33 = vld [vmem:[#allocation2 + $0x17e4] ss:$16 sps:$4 sm:$0xff]  }
 0x2e4   :  { %5217 = vmatprep.subr.bf16.mxu0 %v7746_v35  ;;  %5709 = vmatprep.subr.bf16.mxu1 %v7749_v19  ;;  %v7839_v35 = vld [vmem:[#allocation2 + $0x17ec] ss:$16 sps:$4 sm:$0xff]   ;;  %v7834_v19 = vld [vmem:[#allocation2 + $0x17e0] ss:$16 sps:$4 sm:$0xff]  }
 0x2e6   :  { %5209 = vmatmul.mubr.bf16.vlgmr.msra.gmra.mrb[0].mxu0 %v5794_v36  ;;  %5701 = vmatmul.mubr.bf16.vlgmr.msra.gmra.mrb[0].mxu1 %v5794_v36  ;;  %v7837_v36 = vld [vmem:[#allocation2 + $0x17e8] ss:$16 sps:$4 sm:$0xff]  }
 0x2e7   :  { %5218 = vmatpush1.bf16.msra.mxu0 %v7744_v38  ;;  %5710 = vmatpush1.bf16.msra.mxu1 %v7747_v21  ;;  %v5796_v38 = vcombine.low %v8034_v37, %v8034_v37  ;;  %v822_v21 = vlaneseq }
 0x2e8   :  { %5219 = vmatprep.subr.bf16.mxu0 %v7752_v39  ;;  %5711 = vmatprep.subr.bf16.mxu1 %v7755_v40 }
 0x2e9   :  { %5249 = vmatprep.mubr.bf16.mxu0 %v5797_v41  ;;  %5741 = vmatprep.mubr.bf16.mxu1 %v5797_v41  ;;  %v823_v39 = vshrl.u32 %v822_v21, 7 }
 0x2eb   :  { %5220 = vmatpush1.bf16.msra.mxu0 %v7750_v34  ;;  %5712 = vmatpush1.bf16.msra.mxu1 %v7753_v42  ;;  %v824_v40 = vsub.s32 0, %v823_v39  ;;  %v832_v41 = vsub.s32 2, %v823_v39  ;;  %v820_v34 = vld [vmem:[#allocation4] sm:$0xf]  ;;  %v828_v42 = vsub.s32 1, %v823_v39 }
 0x2ec   :  { %5221 = vmatprep.subr.bf16.mxu0 %v7758_v43  ;;  %5713 = vmatprep.subr.bf16.mxu1 %v7761_v44  ;;  %v836_v43 = vsub.s32 3, %v823_v39 }
 0x2ed   :  { %v825_v44 = vrot.slane %v820_v34, %v824_v40 }
 0x2ef   :  { %5222 = vmatpush1.bf16.msra.mxu0 %v7756_v45  ;;  %5714 = vmatpush1.bf16.msra.mxu1 %v7759_v46  ;;  %v833_v45 = vrot.slane %v820_v34, %v832_v41  ;;  %v829_v46 = vrot.slane %v820_v34, %v828_v42 }
 0x2f0   :  { %5223 = vmatprep.subr.bf16.mxu0 %v7764_v47  ;;  %5715 = vmatprep.subr.bf16.mxu1 %v7767_v48  ;;  %v837_v47 = vrot.slane %v820_v34, %v836_v43 }
 0x2f3   :  { %5224 = vmatpush1.bf16.msra.mxu0 %v7762_v49  ;;  %5716 = vmatpush1.bf16.msra.mxu1 %v7765_v50 }
 0x2f4   :  { %5225 = vmatprep.subr.bf16.mxu0 %v7770_v51  ;;  %5717 = vmatprep.subr.bf16.mxu1 %v7773_v52 }
 0x2f7   :  { %5226 = vmatpush1.bf16.msra.mxu0 %v7768_v53  ;;  %5718 = vmatpush1.bf16.msra.mxu1 %v7771_v54 }
 0x2f8   :  { %5227 = vmatprep.subr.bf16.mxu0 %v7776_v55  ;;  %5719 = vmatprep.subr.bf16.mxu1 %v7779_v56 }
 0x2fb   :  { %5228 = vmatpush1.bf16.msra.mxu0 %v7774_v57  ;;  %5720 = vmatpush1.bf16.msra.mxu1 %v7777_v58 }
 0x2fc   :  { %5229 = vmatprep.subr.bf16.mxu0 %v7782_v59  ;;  %5721 = vmatprep.subr.bf16.mxu1 %v7785_v60 }
 0x2ff   :  { %5230 = vmatpush1.bf16.msra.mxu0 %v7780_v61  ;;  %5722 = vmatpush1.bf16.msra.mxu1 %v7783_v62 }
 0x300   :  { %5231 = vmatprep.subr.bf16.mxu0 %v7788_v63  ;;  %5723 = vmatprep.subr.bf16.mxu1 %v7791_v0 }
 0x303   :  { %5232 = vmatpush1.bf16.msra.mxu0 %v7786_v1  ;;  %5724 = vmatpush1.bf16.msra.mxu1 %v7789_v2 }
 0x304   :  { %5233 = vmatprep.subr.bf16.mxu0 %v7794_v3  ;;  %5725 = vmatprep.subr.bf16.mxu1 %v7797_v4 }
 0x307   :  { %5234 = vmatpush1.bf16.msra.mxu0 %v7792_v5  ;;  %5726 = vmatpush1.bf16.msra.mxu1 %v7795_v6 }
 0x308   :  { %5235 = vmatprep.subr.bf16.mxu0 %v7800_v7  ;;  %5727 = vmatprep.subr.bf16.mxu1 %v7803_v8 }
 0x30b   :  { %5236 = vmatpush1.bf16.msra.mxu0 %v7798_v9  ;;  %5728 = vmatpush1.bf16.msra.mxu1 %v7801_v10 }
 0x30c   :  { %5237 = vmatprep.subr.bf16.mxu0 %v7806_v12  ;;  %5729 = vmatprep.subr.bf16.mxu1 %v7809_v13 }
 0x30f   :  { %5238 = vmatpush1.bf16.msra.mxu0 %v7804_v15  ;;  %5730 = vmatpush1.bf16.msra.mxu1 %v7807_v16 }
 0x310   :  { %5239 = vmatprep.subr.bf16.mxu0 %v7812_v18  ;;  %5731 = vmatprep.subr.bf16.mxu1 %v7815_v11 }
 0x313   :  { %5240 = vmatpush1.bf16.msra.mxu0 %v7810_v20  ;;  %5732 = vmatpush1.bf16.msra.mxu1 %v7813_v14 }
 0x314   :  { %5241 = vmatprep.subr.bf16.mxu0 %v7818_v22  ;;  %5733 = vmatprep.subr.bf16.mxu1 %v7821_v23 }
 0x317   :  { %5242 = vmatpush1.bf16.msra.mxu0 %v7816_v24  ;;  %5734 = vmatpush1.bf16.msra.mxu1 %v7819_v17 }
 0x318   :  { %5243 = vmatprep.subr.bf16.mxu0 %v7824_v26  ;;  %5735 = vmatprep.subr.bf16.mxu1 %v7827_v27 }
 0x31b   :  { %5244 = vmatpush1.bf16.msra.mxu0 %v7822_v28  ;;  %5736 = vmatpush1.bf16.msra.mxu1 %v7825_v29 }
 0x31c   :  { %5245 = vmatprep.subr.bf16.mxu0 %v7830_v30  ;;  %5737 = vmatprep.subr.bf16.mxu1 %v7833_v31 }
 0x31f   :  { %5246 = vmatpush1.bf16.msra.mxu0 %v7828_v32  ;;  %5738 = vmatpush1.bf16.msra.mxu1 %v7831_v25 }
 0x320   :  { %5247 = vmatprep.subr.bf16.mxu0 %v7836_v33  ;;  %5739 = vmatprep.subr.bf16.mxu1 %v7839_v35 }
 0x323   :  { %5248 = vmatpush1.bf16.msra.mxu0 %v7834_v19  ;;  %5740 = vmatpush1.bf16.msra.mxu1 %v7837_v36 }
 0x326   :  { %5250 = vmatmul.mubr.bf16.vlgmr.msra.gmra.mrb[0].mxu0 %v5796_v38  ;;  %5742 = vmatmul.mubr.bf16.vlgmr.msra.gmra.mrb[0].mxu1 %v5796_v38 }
 0x3f9   :  { %v5251_v48 = vpop.f32.mrb[0].mxu0  ;;  %v5743_v49 = vpop.f32.mrb[0].mxu1 }
 0x3fa   :  { %v6570_v50 = vadd.f32 %v5251_v48, %v825_v44  ;;  %v6572_v51 = vadd.f32 %v5743_v49, %v833_v45  ;;  %v5253_v37 = vpop.f32.mrb[1].mxu0  ;;  %v5745_v52 = vpop.f32.mrb[1].mxu1 }
 0x3fb   :  { %v6571_v53 = vadd.f32 %v5253_v37, %v829_v46  ;;  %v6573_v54 = vadd.f32 %v5745_v52, %v837_v47  ;;  %v5255_v55 = vpop.f32.mrb[2].mxu0  ;;  %v5747_v56 = vpop.f32.mrb[2].mxu1 }
 0x3fc   :  { %v5256_v57 = vpop.f32.mrb[3].mxu0  ;;  %v5748_v58 = vpop.f32.mrb[3].mxu1 }
 0x3fd   :  { %v6568_v59 = vpack.c.bf16 %v6571_v53, %v6570_v50  ;;  %v6569_v60 = vpack.c.bf16 %v6573_v54, %v6572_v51 }
 0x3ff   :  { %5766 = vst [vmem:[%s8049_s3] sm:$0xff] %v6568_v59  ;;  %5767 = vst [vmem:[%s8049_s3 + $0x8] sm:$0xff] %v6569_v60 }
 0x400   :  { %5772 = vsyncpa [#allocation3], 1 }
 0x401   :  { %5773 = vsyncpa [#allocation5], 1 }

// kernel: _lambda_.4
= control target key start
LH: loop header
LB: loop body
LE: loop exit
PB: predicated region body
PF: predicated region fallthrough
CT: control target
= control target key end

     0   :  { %s1068_s12 = smov 0   ;;  %s1190_s0 = inlined_call_operand.vmem [shape: bf16[512,48], index: 0, kind: input, shape index: {}]   ;;  %s1191_s1 = inlined_call_operand.vmem [shape: bf16[48,128], index: 1, kind: input, shape index: {}]   ;;  %s1192_s2 = inlined_call_operand.vmem [shape: f32[1,128], index: 2, kind: input, shape index: {}]   ;;  %s1193_s3 = inlined_call_operand.vmem [shape: bf16[512,128], index: 3, kind: output, shape index: {}]  }
   0x1 LB: > { %s744_s13 = sadd.s32 4294967295, %s1046_s12   ;;  %p748_p0 = scmp.ge.s32.totalorder %s1046_s12, 1  ;;  %s1046_s12 = sphi %s1068_s12, %s13_s12  }
   0x2   : > { %p138_p1 = scmp.lt.s32.totalorder %s1046_s12, 3 }
   0x4   : > { %p139_p2 = pnand %p748_p0, %p138_p1 }
   0x5   : > { %v1021_v0 = vld [vmem:[%s1191_s1] sm:$0xff] (!%p139_p2)   ;;  %s749_s16 = sshll.u32 (!%p139_p2), %s744_s13, 5  ;;  %v1022_v1 = vld [vmem:[%s1191_s1 + $0x8] sm:$0xff] (!%p139_p2)   ;;  %v1023_v2 = vld [vmem:[%s1191_s1 + $0x10] sm:$0xff] (!%p139_p2)   ;;  %vm318_vm0 = vcmask (!%p139_p2), 392192  }
   0x6   : > { %142 = sbr.rel (%p139_p2) target bundleno = 263 (0x107), region = 32  ;;  %p163_p3 = scmp.lt.s32.totalorder (!%p139_p2), %s749_s16, 63  ;;  %969 = vmatprep.subr.bf16.mxu0 (!%p139_p2), %v1021_v0  ;;  %1007 = vmatprep.subr.bf16.mxu1 (!%p139_p2), %v1021_v0  ;;  %v1130_v20 = vld [vmem:[%s1192_s2] ss:$0 sm:$0xff] (!%p139_p2) }
   0x7   : > { %970 = vmatpush3.bf16.msra.mxu0 (!%p139_p2), %v1021_v0  ;;  %1010 = vmatpush3.bf16.msra.mxu1 (!%p139_p2), %v1021_v0 }
   0x8   : > { %971 = vmatprep.subr.bf16.mxu0 (!%p139_p2), %v1022_v1  ;;  %1008 = vmatprep.subr.bf16.mxu1 (!%p139_p2), %v1022_v1 }
   0xb   : > { %972 = vmatpush3.bf16.msra.mxu0 (!%p139_p2), %v1022_v1  ;;  %1011 = vmatpush3.bf16.msra.mxu1 (!%p139_p2), %v1022_v1 }
   0xc   : > { %973 = vmatprep.subr.bf16.mxu0 (!%p139_p2), %v1023_v2  ;;  %1009 = vmatprep.subr.bf16.mxu1 (!%p139_p2), %v1023_v2 }
   0xd   : > { %s1195_s16 = smov (!%p163_p3, %s749_s16), 63 }
   0xe   : > { %s750_s21 = sshll.u32 %s1195_s16, 2 }
   0xf   : > { %s1093_s24 = scalar_lea.vmem %s1190_s0, %s750_s21  ;;  %974 = vmatpush3.bf16.msra.mxu0 %v1023_v2  ;;  %1012 = vmatpush3.bf16.msra.mxu1 %v1023_v2  ;;  %s1143_s29 = scalar_lea.vmem %s1193_s3, %s750_s21 }
  0x10   : > { %v1024_v3 = vld [vmem:[%s1093_s24] sm:$0xff]   ;;  %v1026_v5 = vld [vmem:[%s1093_s24 + $0x8] sm:$0xff]   ;;  %v1028_v7 = vld [vmem:[%s1093_s24 + $0x10] sm:$0xff]  }
  0x11   : > { %v1025_v4 = vld [vmem:[%s1093_s24 + $0x40] sm:$0xff]   ;;  %975 = vmatprep.mubr.msk.bf16.mxu0 %vm318_vm0, %v1024_v3  ;;  %v1027_v6 = vld [vmem:[%s1093_s24 + $0x48] sm:$0xff]   ;;  %v1029_v8 = vld [vmem:[%s1093_s24 + $0x50] sm:$0xff]  }
  0x12   : > { %991 = vmatprep.mubr.msk.bf16.mxu1 %vm318_vm0, %v1025_v4  ;;  %976 = vmatmul.mubr.msk.bf16.vlgmr.msra.gmra.mrb[0].mxu0 %vm318_vm0, %v1026_v5  ;;  %v1030_v9 = vld [vmem:[%s1093_s24 + $0x18] sm:$0xff]   ;;  %v1032_v11 = vld [vmem:[%s1093_s24 + $0x20] sm:$0xff]   ;;  %v1034_v13 = vld [vmem:[%s1093_s24 + $0x28] sm:$0xff]  }
  0x13   : > { %992 = vmatmul.mubr.msk.bf16.vlgmr.msra.gmra.mrb[0].mxu1 %vm318_vm0, %v1027_v6  ;;  %979 = vmatprep.mubr.msk.bf16.mxu0 %vm318_vm0, %v1028_v7  ;;  %v1031_v10 = vld [vmem:[%s1093_s24 + $0x58] sm:$0xff]   ;;  %v1033_v12 = vld [vmem:[%s1093_s24 + $0x60] sm:$0xff]   ;;  %v1035_v14 = vld [vmem:[%s1093_s24 + $0x68] sm:$0xff]  }
  0x14   : > { %995 = vmatprep.mubr.msk.bf16.mxu1 %vm318_vm0, %v1029_v8  ;;  %v1036_v15 = vld [vmem:[%s1093_s24 + $0x30] sm:$0xff]   ;;  %v1038_v17 = vld [vmem:[%s1093_s24 + $0x38] sm:$0xff]  }
  0x15   : > { %v1037_v16 = vld [vmem:[%s1093_s24 + $0x70] sm:$0xff]   ;;  %v1039_v18 = vld [vmem:[%s1093_s24 + $0x78] sm:$0xff]  }
  0x1a   : > { %980 = vmatmul.mubr.msk.bf16.gmra.mrb[4].mxu0 %vm318_vm0, %v1030_v9 }
  0x1b   : > { %996 = vmatmul.mubr.msk.bf16.gmra.mrb[4].mxu1 %vm318_vm0, %v1031_v10  ;;  %983 = vmatprep.mubr.msk.bf16.mxu0 %vm318_vm0, %v1032_v11 }
  0x1c   : > { %999 = vmatprep.mubr.msk.bf16.mxu1 %vm318_vm0, %v1033_v12 }
  0x22   : > { %984 = vmatmul.mubr.msk.bf16.gmra.mrb[8].mxu0 %vm318_vm0, %v1034_v13 }
  0x23   : > { %1000 = vmatmul.mubr.msk.bf16.gmra.mrb[8].mxu1 %vm318_vm0, %v1035_v14  ;;  %987 = vmatprep.mubr.msk.bf16.mxu0 %vm318_vm0, %v1036_v15 }
  0x24   : > { %1003 = vmatprep.mubr.msk.bf16.mxu1 %vm318_vm0, %v1037_v16 }
  0x2a   : > { %988 = vmatmul.mubr.msk.bf16.gmra.mrb[12].mxu0 %vm318_vm0, %v1038_v17 }
  0x2b   : > { %1004 = vmatmul.mubr.msk.bf16.gmra.mrb[12].mxu1 %vm318_vm0, %v1039_v18 }
  0xe5   : > { %v977_v19 = vpop.f32.mrb[0].mxu0 }
  0xe6   : > { %v993_v21 = vpop.f32.mrb[0].mxu1  ;;  %v401_v22 = vpop.f32.mrb[1].mxu0  ;;  %v410_v26 = vadd.f32 %v977_v19, %v1130_v20 }
  0xe7   : > { %v465_v23 = vpop.f32.mrb[1].mxu1  ;;  %v978_v24 = vpop.f32.mrb[2].mxu0  ;;  %v474_v27 = vadd.f32 %v993_v21, %v1130_v20  ;;  %v402_v32 = vadd.f32 %v1130_v20, %v401_v22 }
  0xe8   : > { %v994_v25 = vpop.f32.mrb[2].mxu1  ;;  %v413_v28 = vadd.f32 %v978_v24, %v1130_v20  ;;  %v404_v30 = vpop.f32.mrb[3].mxu0  ;;  %v466_v33 = vadd.f32 %v1130_v20, %v465_v23 }
  0xe9   : > { %v477_v29 = vadd.f32 %v994_v25, %v1130_v20  ;;  %v468_v31 = vpop.f32.mrb[3].mxu1  ;;  %v405_v34 = vadd.f32 %v1130_v20, %v404_v30 }
  0xea   : > { %v469_v35 = vadd.f32 %v1130_v20, %v468_v31  ;;  %v863_v36 = vpack.c.bf16 %v413_v28, %v410_v26 }
  0xeb   : > { %v903_v37 = vpack.c.bf16 %v477_v29, %v474_v27  ;;  %v858_v38 = vpack.c.bf16 %v405_v34, %v402_v32 }
  0xec   : > { %v898_v39 = vpack.c.bf16 %v469_v35, %v466_v33  ;;  %935 = vst [vmem:[%s1143_s29 + $0x8] sm:$0xff] %v863_v36  }
  0xed   : > { %943 = vst [vmem:[%s1143_s29 + $0x48] sm:$0xff] %v903_v37   ;;  %859 = vst [vmem:[%s1143_s29] sm:$0xff] %v858_v38   ;;  %v981_v40 = vpop.f32.mrb[4].mxu0 }
  0xee   : > { %942 = vst [vmem:[%s1143_s29 + $0x40] sm:$0xff] %v898_v39   ;;  %v997_v41 = vpop.f32.mrb[4].mxu1  ;;  %v417_v42 = vpop.f32.mrb[5].mxu0  ;;  %v426_v46 = vadd.f32 %v981_v40, %v1130_v20 }
  0xef   : > { %v481_v43 = vpop.f32.mrb[5].mxu1  ;;  %v982_v44 = vpop.f32.mrb[6].mxu0  ;;  %v490_v47 = vadd.f32 %v997_v41, %v1130_v20  ;;  %v418_v52 = vadd.f32 %v1130_v20, %v417_v42 }
  0xf0   : > { %v998_v45 = vpop.f32.mrb[6].mxu1  ;;  %v429_v48 = vadd.f32 %v982_v44, %v1130_v20  ;;  %v420_v50 = vpop.f32.mrb[7].mxu0  ;;  %v482_v53 = vadd.f32 %v1130_v20, %v481_v43 }
  0xf1   : > { %v493_v49 = vadd.f32 %v998_v45, %v1130_v20  ;;  %v484_v51 = vpop.f32.mrb[7].mxu1  ;;  %v421_v54 = vadd.f32 %v1130_v20, %v420_v50 }
  0xf2   : > { %v485_v55 = vadd.f32 %v1130_v20, %v484_v51  ;;  %v873_v56 = vpack.c.bf16 %v429_v48, %v426_v46 }
  0xf3   : > { %v913_v57 = vpack.c.bf16 %v493_v49, %v490_v47  ;;  %v868_v58 = vpack.c.bf16 %v421_v54, %v418_v52 }
  0xf4   : > { %v908_v59 = vpack.c.bf16 %v485_v55, %v482_v53  ;;  %937 = vst [vmem:[%s1143_s29 + $0x18] sm:$0xff] %v873_v56  }
  0xf5   : > { %945 = vst [vmem:[%s1143_s29 + $0x58] sm:$0xff] %v913_v57   ;;  %936 = vst [vmem:[%s1143_s29 + $0x10] sm:$0xff] %v868_v58   ;;  %v985_v60 = vpop.f32.mrb[8].mxu0 }
  0xf6   : > { %944 = vst [vmem:[%s1143_s29 + $0x50] sm:$0xff] %v908_v59   ;;  %v1001_v61 = vpop.f32.mrb[8].mxu1  ;;  %v433_v62 = vpop.f32.mrb[9].mxu0  ;;  %v442_v2 = vadd.f32 %v985_v60, %v1130_v20 }
  0xf7   : > { %v497_v63 = vpop.f32.mrb[9].mxu1  ;;  %v986_v0 = vpop.f32.mrb[10].mxu0  ;;  %v506_v3 = vadd.f32 %v1001_v61, %v1130_v20  ;;  %v434_v8 = vadd.f32 %v1130_v20, %v433_v62 }
  0xf8   : > { %v1002_v1 = vpop.f32.mrb[10].mxu1  ;;  %v445_v4 = vadd.f32 %v986_v0, %v1130_v20  ;;  %v436_v6 = vpop.f32.mrb[11].mxu0  ;;  %v498_v9 = vadd.f32 %v1130_v20, %v497_v63 }
  0xf9   : > { %v509_v5 = vadd.f32 %v1002_v1, %v1130_v20  ;;  %v500_v7 = vpop.f32.mrb[11].mxu1  ;;  %v437_v10 = vadd.f32 %v1130_v20, %v436_v6 }
  0xfa   : > { %v501_v11 = vadd.f32 %v1130_v20, %v500_v7  ;;  %v883_v12 = vpack.c.bf16 %v445_v4, %v442_v2 }
  0xfb   : > { %v923_v13 = vpack.c.bf16 %v509_v5, %v506_v3  ;;  %v878_v14 = vpack.c.bf16 %v437_v10, %v434_v8 }
  0xfc   : > { %v918_v15 = vpack.c.bf16 %v501_v11, %v498_v9  ;;  %939 = vst [vmem:[%s1143_s29 + $0x28] sm:$0xff] %v883_v12  }
  0xfd   : > { %947 = vst [vmem:[%s1143_s29 + $0x68] sm:$0xff] %v923_v13   ;;  %938 = vst [vmem:[%s1143_s29 + $0x20] sm:$0xff] %v878_v14   ;;  %v989_v16 = vpop.f32.mrb[12].mxu0 }
  0xfe   : > { %946 = vst [vmem:[%s1143_s29 + $0x60] sm:$0xff] %v918_v15   ;;  %v1005_v17 = vpop.f32.mrb[12].mxu1  ;;  %v449_v18 = vpop.f32.mrb[13].mxu0  ;;  %v458_v23 = vadd.f32 %v989_v16, %v1130_v20 }
  0xff   : > { %v513_v19 = vpop.f32.mrb[13].mxu1  ;;  %v990_v21 = vpop.f32.mrb[14].mxu0  ;;  %v522_v24 = vadd.f32 %v1005_v17, %v1130_v20  ;;  %v450_v29 = vadd.f32 %v1130_v20, %v449_v18 }
 0x100   : > { %v1006_v22 = vpop.f32.mrb[14].mxu1  ;;  %v461_v25 = vadd.f32 %v990_v21, %v1130_v20  ;;  %v452_v27 = vpop.f32.mrb[15].mxu0  ;;  %v514_v30 = vadd.f32 %v1130_v20, %v513_v19 }
 0x101   : > { %v525_v26 = vadd.f32 %v1006_v22, %v1130_v20  ;;  %v516_v28 = vpop.f32.mrb[15].mxu1  ;;  %v453_v31 = vadd.f32 %v1130_v20, %v452_v27 }
 0x102   : > { %v517_v32 = vadd.f32 %v1130_v20, %v516_v28  ;;  %v893_v33 = vpack.c.bf16 %v461_v25, %v458_v23 }
 0x103   : > { %v933_v34 = vpack.c.bf16 %v525_v26, %v522_v24  ;;  %v888_v35 = vpack.c.bf16 %v453_v31, %v450_v29 }
 0x104   : > { %v928_v36 = vpack.c.bf16 %v517_v32, %v514_v30  ;;  %941 = vst [vmem:[%s1143_s29 + $0x38] sm:$0xff] %v893_v33  }
 0x105   : > { %949 = vst [vmem:[%s1143_s29 + $0x78] sm:$0xff] %v933_v34   ;;  %940 = vst [vmem:[%s1143_s29 + $0x30] sm:$0xff] %v888_v35  }
 0x106   : > { %948 = vst [vmem:[%s1143_s29 + $0x70] sm:$0xff] %v928_v36  }
 0x107 PF: > { %s13_s12 = sadd.s32 1, %s1046_s12  }
 0x108   : > { %p10_p4 = scmp.ge.s32.totalorder %s13_s12, 4  }
 0x10a   :  { %12 = sbr.rel (!%p10_p4) target bundleno = 1 (0x1), region = 62 }

// kernel: _lambda_.7
= control target key start
LH: loop header
LB: loop body
LE: loop exit
PB: predicated region body
PF: predicated region fallthrough
CT: control target
= control target key end

     0   :  { %s518_s12 = smov 0   ;;  %s563_s0 = inlined_call_operand.vmem [shape: bf16[2,256,128], index: 0, kind: input, shape index: {}]   ;;  %s564_s1 = inlined_call_operand.vmem [shape: bf16[2,128], index: 1, kind: input, shape index: {}]   ;;  %s565_s2 = inlined_call_operand.vmem [shape: f32[2,1], index: 2, kind: input, shape index: {}]   ;;  %s566_s3 = inlined_call_operand.vmem [shape: f32[2,2,256], index: 3, kind: output, shape index: {}]  }
   0x1 LB: > { %s415_s13 = sadd.s32 4294967295, %s495_s12   ;;  %p419_p0 = scmp.ge.s32.totalorder %s495_s12, 1  ;;  %s495_s12 = sphi %s518_s12, %s13_s12  }
   0x2   : > { %p137_p1 = scmp.lt.s32.totalorder %s495_s12, 3 }
   0x4   : > { %p138_p2 = pnand %p419_p0, %p137_p1 }
   0x5   : > { %p161_p3 = scmp.lt.s32.totalorder (!%p138_p2), %s415_s13, 1  ;;  %v172_v0 = vld [vmem:[%s564_s1] sm:$0x1] (!%p138_p2)  ;;  %v497_v2 = vmov (!%p138_p2), 0  }
   0x6   : > { %141 = sbr.rel (%p138_p2) target bundleno = 299 (0x12b), region = 32  ;;  %v205_v1 = vld [vmem:[%s565_s2] sm:$0x3] (!%p138_p2)  ;;  %461 = vmatprep.mubr.bf16.mxu0 (!%p138_p2), %v172_v0  ;;  %472 = vset.pattern.permute.xlu0 (!%p138_p2), %v497_v2 }
   0x7   : > { %208 = vperm.xlu0 (!%p138_p2), %472, %v205_v1  }
   0xd   : > { %s568_s13 = smov (!%p161_p3, %s415_s13), 1 }
   0xe   : > { %s443_s18 = sshll.u32 %s568_s13, 7  ;;  %s444_s22 = sshll.u32 %s568_s13, 2 }
   0xf   : > { %s538_s21 = scalar_lea.vmem %s563_s0, %s443_s18  ;;  %s170_s25 = scalar_lea.vmem %s566_s3, %s444_s22 }
  0x10   : > { %v473_v3 = vld [vmem:[%s538_s21 + $0x40] sm:$0xff]   ;;  %v475_v5 = vld [vmem:[%s538_s21 + $0x48] sm:$0xff]   ;;  %v477_v7 = vld [vmem:[%s538_s21 + $0x50] sm:$0xff]  }
  0x11   : > { %v474_v4 = vld [vmem:[%s538_s21] sm:$0xff]   ;;  %445 = vmatprep.subr.bf16.mxu0 %v473_v3  ;;  %v476_v6 = vld [vmem:[%s538_s21 + $0x8] sm:$0xff]   ;;  %v478_v8 = vld [vmem:[%s538_s21 + $0x10] sm:$0xff]  }
  0x12   : > { %446 = vmatpush3.bf16.xpose.msra.mxu0 %v474_v4  ;;  %v479_v9 = vld [vmem:[%s538_s21 + $0x58] sm:$0xff]   ;;  %v481_v11 = vld [vmem:[%s538_s21 + $0x60] sm:$0xff]   ;;  %v483_v13 = vld [vmem:[%s538_s21 + $0x68] sm:$0xff]  }
  0x13   : > { %447 = vmatprep.subr.bf16.mxu0 %v475_v5  ;;  %v480_v10 = vld [vmem:[%s538_s21 + $0x18] sm:$0xff]   ;;  %v482_v12 = vld [vmem:[%s538_s21 + $0x20] sm:$0xff]   ;;  %v484_v14 = vld [vmem:[%s538_s21 + $0x28] sm:$0xff]  }
  0x14   : > { %v485_v15 = vld [vmem:[%s538_s21 + $0x70] sm:$0xff]   ;;  %v487_v17 = vld [vmem:[%s538_s21 + $0x78] sm:$0xff]  }
  0x15   : > { %v486_v16 = vld [vmem:[%s538_s21 + $0x30] sm:$0xff]   ;;  %v488_v18 = vld [vmem:[%s538_s21 + $0x38] sm:$0xff]  }
  0x1a   : > { %448 = vmatpush3.bf16.xpose.msra.mxu0 %v476_v6 }
  0x1b   : > { %449 = vmatprep.subr.bf16.mxu0 %v477_v7 }
  0x22   : > { %450 = vmatpush3.bf16.xpose.msra.mxu0 %v478_v8 }
  0x23   : > { %451 = vmatprep.subr.bf16.mxu0 %v479_v9 }
  0x2a   : > { %452 = vmatpush3.bf16.xpose.msra.mxu0 %v480_v10 }
  0x2b   : > { %453 = vmatprep.subr.bf16.mxu0 %v481_v11 }
  0x32   : > { %454 = vmatpush3.bf16.xpose.msra.mxu0 %v482_v12 }
  0x33   : > { %455 = vmatprep.subr.bf16.mxu0 %v483_v13 }
  0x3a   : > { %456 = vmatpush3.bf16.xpose.msra.mxu0 %v484_v14 }
  0x3b   : > { %457 = vmatprep.subr.bf16.mxu0 %v485_v15 }
  0x42   : > { %458 = vmatpush3.bf16.xpose.msra.mxu0 %v486_v16 }
  0x43   : > { %459 = vmatprep.subr.bf16.mxu0 %v487_v17 }
  0x4a   : > { %460 = vmatpush3.bf16.xpose.msra.mxu0 %v488_v18 }
  0x51   : > { %462 = vmatmul.mubr.bf16.vlgmr.msra.gmra.mrb[0].mxu0 %v172_v0 }
  0x86   : > { %v209_v19 = vpop.permute.xlu0 %208 }
 0x124   : > { %v341_v20 = vpop.f32.mrb[0].mxu0 }
 0x125   : > { %v342_v21 = vadd.f32 %v341_v20, %v209_v19  ;;  %v343_v22 = vpop.f32.mrb[1].mxu0 }
 0x126   : > { %v344_v23 = vadd.f32 %v343_v22, %v209_v19  ;;  %v345_v24 = vpop.f32.mrb[2].mxu0 }
 0x127   : > { %v346_v25 = vpop.f32.mrb[3].mxu0 }
 0x128   : > { %v350_v26 = vcombine.low %v342_v21, %v344_v23 }
 0x12a   : > { %440 = vst.sshfl [vmem:[%s170_s25] sm:$0x33 pattern:$0x76325410] %v350_v26 }
 0x12b PF: > { %s13_s12 = sadd.s32 1, %s495_s12  }
 0x12c   : > { %p10_p4 = scmp.ge.s32.totalorder %s13_s12, 4  }
 0x12e   :  { %12 = sbr.rel (!%p10_p4) target bundleno = 1 (0x1), region = 62 }

</bundles_post_ra>
